<compile_context>
chip_gen: v5e
topology: v5e:2x2
jax: 0.10.0
libtpu: 0.0.40
codegen_flags: <defaults>
</compile_context>

<pallas_src>
import jax
import jax.numpy as jnp
from jax.experimental import pallas as pl
from jax.experimental.pallas import tpu as pltpu


def _bilstm_fused_kernel(x_ref, wih0_ref, wihr_ref, whh_ref, b_ref, h0_ref, c0_ref,
                         y_ref, hn_ref, cn_ref,
                         y01_ref, xg_ref):
    """Fused multi-layer bidirectional LSTM. Runs once (grid=(1,)).

    x_ref    : (T*Bp, V)        flattened time-major layer-0 input
    wih0_ref : (V, 8H)          layer-0  [W_ih_f^T | W_ih_b^T]
    wihr_ref : (max(1,L-1), 2H, 8H)  layers>0 merged input weights
    whh_ref  : (L, 2H, 8H)      block-diagonal [W_hh_f^T ; W_hh_b^T]
    b_ref    : (L, 1, 8H)       [b_f | b_b]  (b_ih + b_hh per direction)
    h0/c0    : (2L, Bp, H)
    y_ref    : (T*Bp, 2H)       hn/cn: (2L, Bp, H)
    y01_ref  : (T*Bp, 2H)       inter-layer [fwd|bwd] outputs (scratch)
    xg_ref   : (T*Bp, 8H)       hoisted x @ W_ih + b, both directions (scratch)
    """
    L = whh_ref.shape[0]
    H = hn_ref.shape[-1]
    G4 = 4 * H
    Bp = hn_ref.shape[1]
    T = xg_ref.shape[0] // Bp

    def lstm_cell(gates, c_prev):
        # PyTorch gate order i, f, g, o within the 4H block.
        sig = jax.nn.sigmoid(gates)                    # one EUP push per vreg
        g = jnp.tanh(gates[:, 2 * H:3 * H])            # tanh only on the g lanes
        c_new = sig[:, H:2 * H] * c_prev + sig[:, 0:H] * g
        h_new = sig[:, 3 * H:4 * H] * jnp.tanh(c_new)
        return h_new, c_new

    for l in range(L):                                 # static, unrolled at trace time
        # ---- hoisted full-sequence input projection: ONE (.., 8H) matmul per layer ----
        if l == 0:
            xg_ref[...] = (jnp.dot(x_ref[...], wih0_ref[...],
                                   preferred_element_type=jnp.float32) + b_ref[l])
        else:
            xg_ref[...] = (jnp.dot(y01_ref[...], wihr_ref[l - 1],
                                   preferred_element_type=jnp.float32) + b_ref[l])

        whh_bd = whh_ref[l]                            # (2H, 8H) block-diagonal
        y_tgt = y_ref if l == L - 1 else y01_ref       # last layer -> straight into output

        carry0 = (h0_ref[2 * l + 0], c0_ref[2 * l + 0],
                  h0_ref[2 * l + 1], c0_ref[2 * l + 1])

        def step(t, carry):
            h_f, c_f, h_b, c_b = carry
            rf = pl.multiple_of(t * Bp, Bp)            # fwd consumes position t
            rb = pl.multiple_of((T - 1 - t) * Bp, Bp)  # bwd consumes position T-1-t
            # One fused recurrence matmul for both directions (block-diag W_hh).
            h_cat = jnp.concatenate([h_f, h_b], axis=-1)                      # (Bp, 2H)
            gh = jnp.dot(h_cat, whh_bd, preferred_element_type=jnp.float32)   # (Bp, 8H)
            g_f = xg_ref[pl.ds(rf, Bp), pl.ds(0, G4)] + gh[:, 0:G4]
            g_b = xg_ref[pl.ds(rb, Bp), pl.ds(G4, G4)] + gh[:, G4:2 * G4]
            # forward direction
            h_f, c_f = lstm_cell(g_f, c_f)
            y_tgt[pl.ds(rf, Bp), pl.ds(0, H)] = h_f
            # backward direction
            h_b, c_b = lstm_cell(g_b, c_b)
            y_tgt[pl.ds(rb, Bp), pl.ds(H, H)] = h_b
            return (h_f, c_f, h_b, c_b)

        h_f, c_f, h_b, c_b = jax.lax.fori_loop(0, T, step, carry0,
                                               unroll=min(T, 8))

        hn_ref[2 * l + 0] = h_f
        cn_ref[2 * l + 0] = c_f
        hn_ref[2 * l + 1] = h_b
        cn_ref[2 * l + 1] = c_b


def bidirectional_lstm_forward(inputs, params, h0, c0):
    """Mirrors torch.nn.LSTM(input_size=V, hidden_size=H, num_layers=L, bidirectional=True).

    inputs: (T, B, V); params[l][d] = dict(w_ih_t, w_hh_t, b); h0/c0: (L*2, B, H).
    Returns output (T, B, 2H), hn (L*2, B, H), cn (L*2, B, H).
    """
    T, B, V = inputs.shape
    L = len(params)
    H = h0.shape[-1]
    G4, G8 = 4 * H, 8 * H
    assert all(params[l][d]["w_hh_t"].shape == (H, G4)
               for l in range(L) for d in range(2)), \
        "all layers must share the same hidden size"
    Bp = max(8, ((B + 7) // 8) * 8)                    # pad batch to full sublanes

    # Padded / flattened layer-0 input (time-major, batch within a time step).
    x = (jnp.zeros((T, Bp, V), jnp.float32)
         .at[:, :B, :].set(inputs.astype(jnp.float32))
         .reshape(T * Bp, V))
    h0p = jnp.zeros((2 * L, Bp, H), jnp.float32).at[:, :B, :].set(h0.astype(jnp.float32))
    c0p = jnp.zeros((2 * L, Bp, H), jnp.float32).at[:, :B, :].set(c0.astype(jnp.float32))

    # Layer-0 input weights merged over directions: (V, 8H) = [W_ih_f^T | W_ih_b^T].
    wih0 = jnp.concatenate([params[0][0]["w_ih_t"], params[0][1]["w_ih_t"]],
                           axis=1).astype(jnp.float32)
    # Layers > 0 merged input weights (input = prev layer's [fwd|bwd] output): (L-1, 2H, 8H).
    if L > 1:
        wihr = jnp.stack(
            [jnp.concatenate([params[l][0]["w_ih_t"], params[l][1]["w_ih_t"]], axis=1)
             for l in range(1, L)], axis=0).astype(jnp.float32)
    else:
        wihr = jnp.zeros((1, 2 * H, G8), jnp.float32)  # unused dummy (L == 1)
    # Block-diagonal recurrent weights -> ONE (Bp,2H)@(2H,8H) matmul per time step.
    whh = jnp.zeros((L, 2 * H, G8), jnp.float32)
    bb = jnp.zeros((L, 1, G8), jnp.float32)
    for l in range(L):
        whh = whh.at[l, 0:H, 0:G4].set(params[l][0]["w_hh_t"].astype(jnp.float32))
        whh = whh.at[l, H:2 * H, G4:G8].set(params[l][1]["w_hh_t"].astype(jnp.float32))
        bb = bb.at[l, :, 0:G4].set(params[l][0]["b"].astype(jnp.float32))
        bb = bb.at[l, :, G4:G8].set(params[l][1]["b"].astype(jnp.float32))

    def full_spec(shape):
        n = len(shape)
        return pl.BlockSpec(shape, lambda i, n=n: (0,) * n)

    in_arrays = (x, wih0, wihr, whh, bb, h0p, c0p)
    out_shape = (
        jax.ShapeDtypeStruct((T * Bp, 2 * H), jnp.float32),   # y (flattened time-major)
        jax.ShapeDtypeStruct((2 * L, Bp, H), jnp.float32),    # hn
        jax.ShapeDtypeStruct((2 * L, Bp, H), jnp.float32),    # cn
    )
    scratch_shapes = [
        pltpu.VMEM((T * Bp, 2 * H), jnp.float32),   # y01: inter-layer [fwd|bwd] outputs
        pltpu.VMEM((T * Bp, G8), jnp.float32),      # xg : hoisted x@W_ih + b, both dirs
    ]

    # Explicit VMEM budget: in/out (x2 for pipelining buffers) + scratch + headroom.
    vmem_est = 4 * (sum(int(a.size) for a in in_arrays)
                    + T * Bp * 2 * H + 2 * (2 * L * Bp * H)     # outputs
                    + T * Bp * 2 * H + T * Bp * G8)             # scratch
    vmem_limit = min(max(2 * vmem_est + (8 << 20), 32 << 20), 128 << 20)

    grid_spec = pltpu.PrefetchScalarGridSpec(
        num_scalar_prefetch=0,
        grid=(1,),
        in_specs=[full_spec(a.shape) for a in in_arrays],
        out_specs=tuple(full_spec(s.shape) for s in out_shape),
        scratch_shapes=scratch_shapes,
    )
    y, hn, cn = pl.pallas_call(
        _bilstm_fused_kernel,
        out_shape=out_shape,
        grid_spec=grid_spec,
        compiler_params=pltpu.CompilerParams(
            dimension_semantics=("arbitrary",),
            vmem_limit_bytes=int(vmem_limit)),
    )(*in_arrays)

    y = y.reshape(T, Bp, 2 * H)[:, :B, :]
    return y, hn[:, :B, :], cn[:, :B, :]


# ----------------------------- pure-JAX reference -----------------------------
def _lstm_direction_ref(x, w_ih_t, w_hh_t, b, h0, c0):
    H = h0.shape[-1]

    def step(carry, x_t):
        h, c = carry
        gates = (jnp.dot(x_t, w_ih_t, precision=jax.lax.Precision.HIGHEST)
                 + jnp.dot(h, w_hh_t, precision=jax.lax.Precision.HIGHEST) + b)
        i = jax.nn.sigmoid(gates[:, 0 * H:1 * H])
        f = jax.nn.sigmoid(gates[:, 1 * H:2 * H])
        g = jnp.tanh(gates[:, 2 * H:3 * H])
        o = jax.nn.sigmoid(gates[:, 3 * H:4 * H])
        c = f * c + i * g
        h = o * jnp.tanh(c)
        return (h, c), h

    (hn, cn), ys = jax.lax.scan(step, (h0, c0), x)
    return ys, hn, cn


def _bidir_ref(inputs, params, h0, c0):
    layer_in = inputs
    hn_list, cn_list = [], []
    for l in range(len(params)):
        outs = []
        for d in range(2):
            p = params[l][d]
            x = layer_in if d == 0 else jnp.flip(layer_in, axis=0)
            y, hn, cn = _lstm_direction_ref(x, p["w_ih_t"], p["w_hh_t"], p["b"],
                                            h0[2 * l + d], c0[2 * l + d])
            if d == 1:
                y = jnp.flip(y, axis=0)
            outs.append(y)
            hn_list.append(hn)
            cn_list.append(cn)
        layer_in = jnp.concatenate(outs, axis=-1)
    return layer_in, jnp.stack(hn_list, 0), jnp.stack(cn_list, 0)


if __name__ == "__main__":
    # Module config: BidirectionalLSTM(layer_sizes=[32, 32], batch_size=2, vector_dim=64)
    layer_sizes = [32, 32]
    batch_size = 2
    vector_dim = 64
    seq_len = 8
    H = layer_sizes[0]
    L = len(layer_sizes)

    key = jax.random.PRNGKey(0)
    keys = jax.random.split(key, 64)
    ki = iter(keys)

    # Deterministic synthetic LSTM parameters (PyTorch nn.LSTM weight shapes).
    params = []
    for l in range(L):
        din = vector_dim if l == 0 else 2 * H
        layer_p = []
        for d in range(2):
            w_ih = 0.1 * jax.random.normal(next(ki), (4 * H, din), jnp.float32)
            w_hh = 0.1 * jax.random.normal(next(ki), (4 * H, H), jnp.float32)
            b_ih = 0.1 * jax.random.normal(next(ki), (4 * H,), jnp.float32)
            b_hh = 0.1 * jax.random.normal(next(ki), (4 * H,), jnp.float32)
            layer_p.append(dict(w_ih_t=jnp.transpose(w_ih),
                                w_hh_t=jnp.transpose(w_hh),
                                b=(b_ih + b_hh).reshape(1, 4 * H)))
        params.append(layer_p)

    inputs = jax.random.normal(next(ki), (seq_len, batch_size, vector_dim), jnp.float32)
    # forward() draws fresh torch.rand h0/c0 each call; deterministic stand-in here.
    h0 = jax.random.uniform(next(ki), (L * 2, batch_size, H), jnp.float32)
    c0 = jax.random.uniform(next(ki), (L * 2, batch_size, H), jnp.float32)

    output, hn, cn = bidirectional_lstm_forward(inputs, params, h0, c0)
    jax.block_until_ready((output, hn, cn))

    # Sanity check against a pure-JAX scan reference.
    out_r, hn_r, cn_r = _bidir_ref(inputs, params, h0, c0)
    assert output.shape == (seq_len, batch_size, 2 * H)
    assert hn.shape == (L * 2, batch_size, H) and cn.shape == (L * 2, batch_size, H)
    assert jnp.allclose(output, out_r, atol=2e-3, rtol=2e-3)
    assert jnp.allclose(hn, hn_r, atol=2e-3, rtol=2e-3)
    assert jnp.allclose(cn, cn_r, atol=2e-3, rtol=2e-3)

    print("KERNEL_OK")
</pallas_src>

<mosaic_0001>
module attributes {stable_mosaic.version = 11 : i64} {
  func.func @_bilstm_fused_kernel(%arg0: i32, %arg1: memref<64x64xf32, #tpu.memory_space<vmem>>, %arg2: memref<64x256xf32, #tpu.memory_space<vmem>>, %arg3: memref<1x64x256xf32, #tpu.memory_space<vmem>>, %arg4: memref<2x64x256xf32, #tpu.memory_space<vmem>>, %arg5: memref<2x1x256xf32, #tpu.memory_space<vmem>>, %arg6: memref<4x8x32xf32, #tpu.memory_space<vmem>>, %arg7: memref<4x8x32xf32, #tpu.memory_space<vmem>>, %arg8: memref<64x64xf32, #tpu.memory_space<vmem>>, %arg9: memref<4x8x32xf32, #tpu.memory_space<vmem>>, %arg10: memref<4x8x32xf32, #tpu.memory_space<vmem>>, %arg11: memref<64x64xf32, #tpu.memory_space<vmem>>, %arg12: memref<64x256xf32, #tpu.memory_space<vmem>>) attributes {dimension_semantics = [#tpu.dimension_semantics<arbitrary>], iteration_bounds = array<i64: 1>, scalar_prefetch = 0 : i64, scratch_operands = 2 : i64, tpu.core_type = #tpu.core_type<tc>, window_params = [{pipeline_mode = #tpu.pipeline_mode<synchronous>, transform_indices = @transform_0, window_bounds = array<i64: 64, 64>}, {pipeline_mode = #tpu.pipeline_mode<synchronous>, transform_indices = @transform_1, window_bounds = array<i64: 64, 256>}, {pipeline_mode = #tpu.pipeline_mode<synchronous>, transform_indices = @transform_2, window_bounds = array<i64: 1, 64, 256>}, {pipeline_mode = #tpu.pipeline_mode<synchronous>, transform_indices = @transform_3, window_bounds = array<i64: 2, 64, 256>}, {pipeline_mode = #tpu.pipeline_mode<synchronous>, transform_indices = @transform_4, window_bounds = array<i64: 2, 1, 256>}, {pipeline_mode = #tpu.pipeline_mode<synchronous>, transform_indices = @transform_5, window_bounds = array<i64: 4, 8, 32>}, {pipeline_mode = #tpu.pipeline_mode<synchronous>, transform_indices = @transform_6, window_bounds = array<i64: 4, 8, 32>}, {pipeline_mode = #tpu.pipeline_mode<synchronous>, transform_indices = @transform_7, window_bounds = array<i64: 64, 64>}, {pipeline_mode = #tpu.pipeline_mode<synchronous>, transform_indices = @transform_8, window_bounds = array<i64: 4, 8, 32>}, {pipeline_mode = #tpu.pipeline_mode<synchronous>, transform_indices = @transform_9, window_bounds = array<i64: 4, 8, 32>}]} {
    %c0 = arith.constant 0 : index
    %c0_0 = arith.constant 0 : index
    %0 = vector.load %arg1[%c0, %c0_0] : memref<64x64xf32, #tpu.memory_space<vmem>>, vector<64x64xf32>
    %c0_1 = arith.constant 0 : index
    %c0_2 = arith.constant 0 : index
    %1 = vector.load %arg2[%c0_1, %c0_2] : memref<64x256xf32, #tpu.memory_space<vmem>>, vector<64x256xf32>
    %cst = arith.constant dense<0.000000e+00> : vector<64x256xf32>
    %2 = tpu.matmul %0, %1, %cst {dimension_numbers = #tpu.dot_dimension_numbers<[1], [0], [0], [1], [0, 0, 1, 1], [], []>} : vector<64x64xf32>, vector<64x256xf32>, vector<64x256xf32> -> vector<64x256xf32>
    %c0_3 = arith.constant 0 : index
    %c0_4 = arith.constant 0 : index
    %c0_5 = arith.constant 0 : index
    %3 = vector.load %arg5[%c0_3, %c0_4, %c0_5] : memref<2x1x256xf32, #tpu.memory_space<vmem>>, vector<1x1x256xf32>
    %4 = vector.shape_cast %3 : vector<1x1x256xf32> to vector<1x256xf32>
    %5 = vector.broadcast %4 : vector<1x256xf32> to vector<64x256xf32>
    %6 = arith.addf %2, %5 : vector<64x256xf32>
    %c0_6 = arith.constant 0 : index
    %c0_7 = arith.constant 0 : index
    %7 = vector.load %arg12[%c0_6, %c0_7] : memref<64x256xf32, #tpu.memory_space<vmem>>, vector<64x256xf32>
    tpu.vector_store %arg12[%c0_6, %c0_7], %6 {strides = array<i32>} : memref<64x256xf32, #tpu.memory_space<vmem>>, vector<64x256xf32>,
    %c0_8 = arith.constant 0 : index
    %c0_9 = arith.constant 0 : index
    %c0_10 = arith.constant 0 : index
    %8 = vector.load %arg4[%c0_8, %c0_9, %c0_10] : memref<2x64x256xf32, #tpu.memory_space<vmem>>, vector<1x64x256xf32>
    %9 = vector.shape_cast %8 : vector<1x64x256xf32> to vector<64x256xf32>
    %c0_11 = arith.constant 0 : index
    %c0_12 = arith.constant 0 : index
    %c0_13 = arith.constant 0 : index
    %10 = vector.load %arg6[%c0_11, %c0_12, %c0_13] : memref<4x8x32xf32, #tpu.memory_space<vmem>>, vector<1x8x32xf32>
    %11 = vector.shape_cast %10 : vector<1x8x32xf32> to vector<8x32xf32>
    %c0_14 = arith.constant 0 : index
    %c0_15 = arith.constant 0 : index
    %c0_16 = arith.constant 0 : index
    %12 = vector.load %arg7[%c0_14, %c0_15, %c0_16] : memref<4x8x32xf32, #tpu.memory_space<vmem>>, vector<1x8x32xf32>
    %13 = vector.shape_cast %12 : vector<1x8x32xf32> to vector<8x32xf32>
    %c1 = arith.constant 1 : index
    %c0_17 = arith.constant 0 : index
    %c0_18 = arith.constant 0 : index
    %14 = vector.load %arg6[%c1, %c0_17, %c0_18] : memref<4x8x32xf32, #tpu.memory_space<vmem>>, vector<1x8x32xf32>
    %15 = vector.shape_cast %14 : vector<1x8x32xf32> to vector<8x32xf32>
    %c1_19 = arith.constant 1 : index
    %c0_20 = arith.constant 0 : index
    %c0_21 = arith.constant 0 : index
    %16 = vector.load %arg7[%c1_19, %c0_20, %c0_21] : memref<4x8x32xf32, #tpu.memory_space<vmem>>, vector<1x8x32xf32>
    %17 = vector.shape_cast %16 : vector<1x8x32xf32> to vector<8x32xf32>
    %c0_i32 = arith.constant 0 : i32
    %c8_i32 = arith.constant 8 : i32
    %18 = arith.muli %c0_i32, %c8_i32 : i32
    %19 = tpu.assume_multiple %18, 8 : i32
    %c7_i32 = arith.constant 7 : i32
    %20 = arith.subi %c7_i32, %c0_i32 : i32
    %c8_i32_22 = arith.constant 8 : i32
    %21 = arith.muli %20, %c8_i32_22 : i32
    %22 = tpu.assume_multiple %21, 8 : i32
    %23 = tpu.concatenate %11, %15 in 1 : vector<8x32xf32>, vector<8x32xf32> -> vector<8x64xf32>
    %cst_23 = arith.constant dense<0.000000e+00> : vector<8x256xf32>
    %24 = tpu.matmul %23, %9, %cst_23 {dimension_numbers = #tpu.dot_dimension_numbers<[1], [0], [0], [1], [0, 0, 1, 1], [], []>} : vector<8x64xf32>, vector<64x256xf32>, vector<8x256xf32> -> vector<8x256xf32>
    %25 = arith.index_cast %19 : i32 to index
    %c0_24 = arith.constant 0 : index
    %26 = vector.load %arg12[%25, %c0_24] : memref<64x256xf32, #tpu.memory_space<vmem>>, vector<8x128xf32>
    %27 = vector.extract_strided_slice %24 {offsets = [0, 0], sizes = [8, 128], strides = [1, 1]} : vector<8x256xf32> to vector<8x128xf32>
    %28 = arith.addf %26, %27 : vector<8x128xf32>
    %29 = arith.index_cast %22 : i32 to index
    %c128 = arith.constant 128 : index
    %30 = vector.load %arg12[%29, %c128] : memref<64x256xf32, #tpu.memory_space<vmem>>, vector<8x128xf32>
    %31 = vector.extract_strided_slice %24 {offsets = [0, 128], sizes = [8, 128], strides = [1, 1]} : vector<8x256xf32> to vector<8x128xf32>
    %32 = arith.addf %30, %31 : vector<8x128xf32>
    %33 = arith.negf %28 : vector<8x128xf32>
    %34 = math.exp %33 : vector<8x128xf32>
    %cst_25 = arith.constant 1.000000e+00 : f32
    %35 = vector.broadcast %cst_25 : f32 to vector<8x128xf32>
    %36 = arith.addf %35, %34 : vector<8x128xf32>
    %37 = arith.divf %35, %36 : vector<8x128xf32>
    %38 = vector.extract_strided_slice %28 {offsets = [0, 64], sizes = [8, 32], strides = [1, 1]} : vector<8x128xf32> to vector<8x32xf32>
    %39 = math.tanh %38 : vector<8x32xf32>
    %40 = vector.extract_strided_slice %37 {offsets = [0, 32], sizes = [8, 32], strides = [1, 1]} : vector<8x128xf32> to vector<8x32xf32>
    %41 = arith.mulf %40, %13 : vector<8x32xf32>
    %42 = vector.extract_strided_slice %37 {offsets = [0, 0], sizes = [8, 32], strides = [1, 1]} : vector<8x128xf32> to vector<8x32xf32>
    %43 = arith.mulf %42, %39 : vector<8x32xf32>
    %44 = arith.addf %41, %43 : vector<8x32xf32>
    %45 = vector.extract_strided_slice %37 {offsets = [0, 96], sizes = [8, 32], strides = [1, 1]} : vector<8x128xf32> to vector<8x32xf32>
    %46 = math.tanh %44 : vector<8x32xf32>
    %47 = arith.mulf %45, %46 : vector<8x32xf32>
    %48 = arith.index_cast %19 : i32 to index
    %c0_26 = arith.constant 0 : index
    %49 = vector.load %arg11[%48, %c0_26] : memref<64x64xf32, #tpu.memory_space<vmem>>, vector<8x32xf32>
    tpu.vector_store %arg11[%48, %c0_26], %47 {strides = array<i32>} : memref<64x64xf32, #tpu.memory_space<vmem>>, vector<8x32xf32>,
    %50 = arith.negf %32 : vector<8x128xf32>
    %51 = math.exp %50 : vector<8x128xf32>
    %cst_27 = arith.constant 1.000000e+00 : f32
    %52 = vector.broadcast %cst_27 : f32 to vector<8x128xf32>
    %53 = arith.addf %52, %51 : vector<8x128xf32>
    %54 = arith.divf %52, %53 : vector<8x128xf32>
    %55 = vector.extract_strided_slice %32 {offsets = [0, 64], sizes = [8, 32], strides = [1, 1]} : vector<8x128xf32> to vector<8x32xf32>
    %56 = math.tanh %55 : vector<8x32xf32>
    %57 = vector.extract_strided_slice %54 {offsets = [0, 32], sizes = [8, 32], strides = [1, 1]} : vector<8x128xf32> to vector<8x32xf32>
    %58 = arith.mulf %57, %17 : vector<8x32xf32>
    %59 = vector.extract_strided_slice %54 {offsets = [0, 0], sizes = [8, 32], strides = [1, 1]} : vector<8x128xf32> to vector<8x32xf32>
    %60 = arith.mulf %59, %56 : vector<8x32xf32>
    %61 = arith.addf %58, %60 : vector<8x32xf32>
    %62 = vector.extract_strided_slice %54 {offsets = [0, 96], sizes = [8, 32], strides = [1, 1]} : vector<8x128xf32> to vector<8x32xf32>
    %63 = math.tanh %61 : vector<8x32xf32>
    %64 = arith.mulf %62, %63 : vector<8x32xf32>
    %65 = arith.index_cast %22 : i32 to index
    %c32 = arith.constant 32 : index
    %66 = vector.load %arg11[%65, %c32] : memref<64x64xf32, #tpu.memory_space<vmem>>, vector<8x32xf32>
    tpu.vector_store %arg11[%65, %c32], %64 {strides = array<i32>} : memref<64x64xf32, #tpu.memory_space<vmem>>, vector<8x32xf32>,
    %c1_i32 = arith.constant 1 : i32
    %c8_i32_28 = arith.constant 8 : i32
    %67 = arith.muli %c1_i32, %c8_i32_28 : i32
    %68 = tpu.assume_multiple %67, 8 : i32
    %c7_i32_29 = arith.constant 7 : i32
    %69 = arith.subi %c7_i32_29, %c1_i32 : i32
    %c8_i32_30 = arith.constant 8 : i32
    %70 = arith.muli %69, %c8_i32_30 : i32
    %71 = tpu.assume_multiple %70, 8 : i32
    %72 = tpu.concatenate %47, %64 in 1 : vector<8x32xf32>, vector<8x32xf32> -> vector<8x64xf32>
    %cst_31 = arith.constant dense<0.000000e+00> : vector<8x256xf32>
    %73 = tpu.matmul %72, %9, %cst_31 {dimension_numbers = #tpu.dot_dimension_numbers<[1], [0], [0], [1], [0, 0, 1, 1], [], []>} : vector<8x64xf32>, vector<64x256xf32>, vector<8x256xf32> -> vector<8x256xf32>
    %74 = arith.index_cast %68 : i32 to index
    %c0_32 = arith.constant 0 : index
    %75 = vector.load %arg12[%74, %c0_32] : memref<64x256xf32, #tpu.memory_space<vmem>>, vector<8x128xf32>
    %76 = vector.extract_strided_slice %73 {offsets = [0, 0], sizes = [8, 128], strides = [1, 1]} : vector<8x256xf32> to vector<8x128xf32>
    %77 = arith.addf %75, %76 : vector<8x128xf32>
    %78 = arith.index_cast %71 : i32 to index
    %c128_33 = arith.constant 128 : index
    %79 = vector.load %arg12[%78, %c128_33] : memref<64x256xf32, #tpu.memory_space<vmem>>, vector<8x128xf32>
    %80 = vector.extract_strided_slice %73 {offsets = [0, 128], sizes = [8, 128], strides = [1, 1]} : vector<8x256xf32> to vector<8x128xf32>
    %81 = arith.addf %79, %80 : vector<8x128xf32>
    %82 = arith.negf %77 : vector<8x128xf32>
    %83 = math.exp %82 : vector<8x128xf32>
    %cst_34 = arith.constant 1.000000e+00 : f32
    %84 = vector.broadcast %cst_34 : f32 to vector<8x128xf32>
    %85 = arith.addf %84, %83 : vector<8x128xf32>
    %86 = arith.divf %84, %85 : vector<8x128xf32>
    %87 = vector.extract_strided_slice %77 {offsets = [0, 64], sizes = [8, 32], strides = [1, 1]} : vector<8x128xf32> to vector<8x32xf32>
    %88 = math.tanh %87 : vector<8x32xf32>
    %89 = vector.extract_strided_slice %86 {offsets = [0, 32], sizes = [8, 32], strides = [1, 1]} : vector<8x128xf32> to vector<8x32xf32>
    %90 = arith.mulf %89, %44 : vector<8x32xf32>
    %91 = vector.extract_strided_slice %86 {offsets = [0, 0], sizes = [8, 32], strides = [1, 1]} : vector<8x128xf32> to vector<8x32xf32>
    %92 = arith.mulf %91, %88 : vector<8x32xf32>
    %93 = arith.addf %90, %92 : vector<8x32xf32>
    %94 = vector.extract_strided_slice %86 {offsets = [0, 96], sizes = [8, 32], strides = [1, 1]} : vector<8x128xf32> to vector<8x32xf32>
    %95 = math.tanh %93 : vector<8x32xf32>
    %96 = arith.mulf %94, %95 : vector<8x32xf32>
    %97 = arith.index_cast %68 : i32 to index
    %c0_35 = arith.constant 0 : index
    %98 = vector.load %arg11[%97, %c0_35] : memref<64x64xf32, #tpu.memory_space<vmem>>, vector<8x32xf32>
    tpu.vector_store %arg11[%97, %c0_35], %96 {strides = array<i32>} : memref<64x64xf32, #tpu.memory_space<vmem>>, vector<8x32xf32>,
    %99 = arith.negf %81 : vector<8x128xf32>
    %100 = math.exp %99 : vector<8x128xf32>
    %cst_36 = arith.constant 1.000000e+00 : f32
    %101 = vector.broadcast %cst_36 : f32 to vector<8x128xf32>
    %102 = arith.addf %101, %100 : vector<8x128xf32>
    %103 = arith.divf %101, %102 : vector<8x128xf32>
    %104 = vector.extract_strided_slice %81 {offsets = [0, 64], sizes = [8, 32], strides = [1, 1]} : vector<8x128xf32> to vector<8x32xf32>
    %105 = math.tanh %104 : vector<8x32xf32>
    %106 = vector.extract_strided_slice %103 {offsets = [0, 32], sizes = [8, 32], strides = [1, 1]} : vector<8x128xf32> to vector<8x32xf32>
    %107 = arith.mulf %106, %61 : vector<8x32xf32>
    %108 = vector.extract_strided_slice %103 {offsets = [0, 0], sizes = [8, 32], strides = [1, 1]} : vector<8x128xf32> to vector<8x32xf32>
    %109 = arith.mulf %108, %105 : vector<8x32xf32>
    %110 = arith.addf %107, %109 : vector<8x32xf32>
    %111 = vector.extract_strided_slice %103 {offsets = [0, 96], sizes = [8, 32], strides = [1, 1]} : vector<8x128xf32> to vector<8x32xf32>
    %112 = math.tanh %110 : vector<8x32xf32>
    %113 = arith.mulf %111, %112 : vector<8x32xf32>
    %114 = arith.index_cast %71 : i32 to index
    %c32_37 = arith.constant 32 : index
    %115 = vector.load %arg11[%114, %c32_37] : memref<64x64xf32, #tpu.memory_space<vmem>>, vector<8x32xf32>
    tpu.vector_store %arg11[%114, %c32_37], %113 {strides = array<i32>} : memref<64x64xf32, #tpu.memory_space<vmem>>, vector<8x32xf32>,
    %c2_i32 = arith.constant 2 : i32
    %c8_i32_38 = arith.constant 8 : i32
    %116 = arith.muli %c2_i32, %c8_i32_38 : i32
    %117 = tpu.assume_multiple %116, 8 : i32
    %c7_i32_39 = arith.constant 7 : i32
    %118 = arith.subi %c7_i32_39, %c2_i32 : i32
    %c8_i32_40 = arith.constant 8 : i32
    %119 = arith.muli %118, %c8_i32_40 : i32
    %120 = tpu.assume_multiple %119, 8 : i32
    %121 = tpu.concatenate %96, %113 in 1 : vector<8x32xf32>, vector<8x32xf32> -> vector<8x64xf32>
    %cst_41 = arith.constant dense<0.000000e+00> : vector<8x256xf32>
    %122 = tpu.matmul %121, %9, %cst_41 {dimension_numbers = #tpu.dot_dimension_numbers<[1], [0], [0], [1], [0, 0, 1, 1], [], []>} : vector<8x64xf32>, vector<64x256xf32>, vector<8x256xf32> -> vector<8x256xf32>
    %123 = arith.index_cast %117 : i32 to index
    %c0_42 = arith.constant 0 : index
    %124 = vector.load %arg12[%123, %c0_42] : memref<64x256xf32, #tpu.memory_space<vmem>>, vector<8x128xf32>
    %125 = vector.extract_strided_slice %122 {offsets = [0, 0], sizes = [8, 128], strides = [1, 1]} : vector<8x256xf32> to vector<8x128xf32>
    %126 = arith.addf %124, %125 : vector<8x128xf32>
    %127 = arith.index_cast %120 : i32 to index
    %c128_43 = arith.constant 128 : index
    %128 = vector.load %arg12[%127, %c128_43] : memref<64x256xf32, #tpu.memory_space<vmem>>, vector<8x128xf32>
    %129 = vector.extract_strided_slice %122 {offsets = [0, 128], sizes = [8, 128], strides = [1, 1]} : vector<8x256xf32> to vector<8x128xf32>
    %130 = arith.addf %128, %129 : vector<8x128xf32>
    %131 = arith.negf %126 : vector<8x128xf32>
    %132 = math.exp %131 : vector<8x128xf32>
    %cst_44 = arith.constant 1.000000e+00 : f32
    %133 = vector.broadcast %cst_44 : f32 to vector<8x128xf32>
    %134 = arith.addf %133, %132 : vector<8x128xf32>
    %135 = arith.divf %133, %134 : vector<8x128xf32>
    %136 = vector.extract_strided_slice %126 {offsets = [0, 64], sizes = [8, 32], strides = [1, 1]} : vector<8x128xf32> to vector<8x32xf32>
    %137 = math.tanh %136 : vector<8x32xf32>
    %138 = vector.extract_strided_slice %135 {offsets = [0, 32], sizes = [8, 32], strides = [1, 1]} : vector<8x128xf32> to vector<8x32xf32>
    %139 = arith.mulf %138, %93 : vector<8x32xf32>
    %140 = vector.extract_strided_slice %135 {offsets = [0, 0], sizes = [8, 32], strides = [1, 1]} : vector<8x128xf32> to vector<8x32xf32>
    %141 = arith.mulf %140, %137 : vector<8x32xf32>
    %142 = arith.addf %139, %141 : vector<8x32xf32>
    %143 = vector.extract_strided_slice %135 {offsets = [0, 96], sizes = [8, 32], strides = [1, 1]} : vector<8x128xf32> to vector<8x32xf32>
    %144 = math.tanh %142 : vector<8x32xf32>
    %145 = arith.mulf %143, %144 : vector<8x32xf32>
    %146 = arith.index_cast %117 : i32 to index
    %c0_45 = arith.constant 0 : index
    %147 = vector.load %arg11[%146, %c0_45] : memref<64x64xf32, #tpu.memory_space<vmem>>, vector<8x32xf32>
    tpu.vector_store %arg11[%146, %c0_45], %145 {strides = array<i32>} : memref<64x64xf32, #tpu.memory_space<vmem>>, vector<8x32xf32>,
    %148 = arith.negf %130 : vector<8x128xf32>
    %149 = math.exp %148 : vector<8x128xf32>
    %cst_46 = arith.constant 1.000000e+00 : f32
    %150 = vector.broadcast %cst_46 : f32 to vector<8x128xf32>
    %151 = arith.addf %150, %149 : vector<8x128xf32>
    %152 = arith.divf %150, %151 : vector<8x128xf32>
    %153 = vector.extract_strided_slice %130 {offsets = [0, 64], sizes = [8, 32], strides = [1, 1]} : vector<8x128xf32> to vector<8x32xf32>
    %154 = math.tanh %153 : vector<8x32xf32>
    %155 = vector.extract_strided_slice %152 {offsets = [0, 32], sizes = [8, 32], strides = [1, 1]} : vector<8x128xf32> to vector<8x32xf32>
    %156 = arith.mulf %155, %110 : vector<8x32xf32>
    %157 = vector.extract_strided_slice %152 {offsets = [0, 0], sizes = [8, 32], strides = [1, 1]} : vector<8x128xf32> to vector<8x32xf32>
    %158 = arith.mulf %157, %154 : vector<8x32xf32>
    %159 = arith.addf %156, %158 : vector<8x32xf32>
    %160 = vector.extract_strided_slice %152 {offsets = [0, 96], sizes = [8, 32], strides = [1, 1]} : vector<8x128xf32> to vector<8x32xf32>
    %161 = math.tanh %159 : vector<8x32xf32>
    %162 = arith.mulf %160, %161 : vector<8x32xf32>
    %163 = arith.index_cast %120 : i32 to index
    %c32_47 = arith.constant 32 : index
    %164 = vector.load %arg11[%163, %c32_47] : memref<64x64xf32, #tpu.memory_space<vmem>>, vector<8x32xf32>
    tpu.vector_store %arg11[%163, %c32_47], %162 {strides = array<i32>} : memref<64x64xf32, #tpu.memory_space<vmem>>, vector<8x32xf32>,
    %c3_i32 = arith.constant 3 : i32
    %c8_i32_48 = arith.constant 8 : i32
    %165 = arith.muli %c3_i32, %c8_i32_48 : i32
    %166 = tpu.assume_multiple %165, 8 : i32
    %c7_i32_49 = arith.constant 7 : i32
    %167 = arith.subi %c7_i32_49, %c3_i32 : i32
    %c8_i32_50 = arith.constant 8 : i32
    %168 = arith.muli %167, %c8_i32_50 : i32
    %169 = tpu.assume_multiple %168, 8 : i32
    %170 = tpu.concatenate %145, %162 in 1 : vector<8x32xf32>, vector<8x32xf32> -> vector<8x64xf32>
    %cst_51 = arith.constant dense<0.000000e+00> : vector<8x256xf32>
    %171 = tpu.matmul %170, %9, %cst_51 {dimension_numbers = #tpu.dot_dimension_numbers<[1], [0], [0], [1], [0, 0, 1, 1], [], []>} : vector<8x64xf32>, vector<64x256xf32>, vector<8x256xf32> -> vector<8x256xf32>
    %172 = arith.index_cast %166 : i32 to index
    %c0_52 = arith.constant 0 : index
    %173 = vector.load %arg12[%172, %c0_52] : memref<64x256xf32, #tpu.memory_space<vmem>>, vector<8x128xf32>
    %174 = vector.extract_strided_slice %171 {offsets = [0, 0], sizes = [8, 128], strides = [1, 1]} : vector<8x256xf32> to vector<8x128xf32>
    %175 = arith.addf %173, %174 : vector<8x128xf32>
    %176 = arith.index_cast %169 : i32 to index
    %c128_53 = arith.constant 128 : index
    %177 = vector.load %arg12[%176, %c128_53] : memref<64x256xf32, #tpu.memory_space<vmem>>, vector<8x128xf32>
    %178 = vector.extract_strided_slice %171 {offsets = [0, 128], sizes = [8, 128], strides = [1, 1]} : vector<8x256xf32> to vector<8x128xf32>
    %179 = arith.addf %177, %178 : vector<8x128xf32>
    %180 = arith.negf %175 : vector<8x128xf32>
    %181 = math.exp %180 : vector<8x128xf32>
    %cst_54 = arith.constant 1.000000e+00 : f32
    %182 = vector.broadcast %cst_54 : f32 to vector<8x128xf32>
    %183 = arith.addf %182, %181 : vector<8x128xf32>
    %184 = arith.divf %182, %183 : vector<8x128xf32>
    %185 = vector.extract_strided_slice %175 {offsets = [0, 64], sizes = [8, 32], strides = [1, 1]} : vector<8x128xf32> to vector<8x32xf32>
    %186 = math.tanh %185 : vector<8x32xf32>
    %187 = vector.extract_strided_slice %184 {offsets = [0, 32], sizes = [8, 32], strides = [1, 1]} : vector<8x128xf32> to vector<8x32xf32>
    %188 = arith.mulf %187, %142 : vector<8x32xf32>
    %189 = vector.extract_strided_slice %184 {offsets = [0, 0], sizes = [8, 32], strides = [1, 1]} : vector<8x128xf32> to vector<8x32xf32>
    %190 = arith.mulf %189, %186 : vector<8x32xf32>
    %191 = arith.addf %188, %190 : vector<8x32xf32>
    %192 = vector.extract_strided_slice %184 {offsets = [0, 96], sizes = [8, 32], strides = [1, 1]} : vector<8x128xf32> to vector<8x32xf32>
    %193 = math.tanh %191 : vector<8x32xf32>
    %194 = arith.mulf %192, %193 : vector<8x32xf32>
    %195 = arith.index_cast %166 : i32 to index
    %c0_55 = arith.constant 0 : index
    %196 = vector.load %arg11[%195, %c0_55] : memref<64x64xf32, #tpu.memory_space<vmem>>, vector<8x32xf32>
    tpu.vector_store %arg11[%195, %c0_55], %194 {strides = array<i32>} : memref<64x64xf32, #tpu.memory_space<vmem>>, vector<8x32xf32>,
    %197 = arith.negf %179 : vector<8x128xf32>
    %198 = math.exp %197 : vector<8x128xf32>
    %cst_56 = arith.constant 1.000000e+00 : f32
    %199 = vector.broadcast %cst_56 : f32 to vector<8x128xf32>
    %200 = arith.addf %199, %198 : vector<8x128xf32>
    %201 = arith.divf %199, %200 : vector<8x128xf32>
    %202 = vector.extract_strided_slice %179 {offsets = [0, 64], sizes = [8, 32], strides = [1, 1]} : vector<8x128xf32> to vector<8x32xf32>
    %203 = math.tanh %202 : vector<8x32xf32>
    %204 = vector.extract_strided_slice %201 {offsets = [0, 32], sizes = [8, 32], strides = [1, 1]} : vector<8x128xf32> to vector<8x32xf32>
    %205 = arith.mulf %204, %159 : vector<8x32xf32>
    %206 = vector.extract_strided_slice %201 {offsets = [0, 0], sizes = [8, 32], strides = [1, 1]} : vector<8x128xf32> to vector<8x32xf32>
    %207 = arith.mulf %206, %203 : vector<8x32xf32>
    %208 = arith.addf %205, %207 : vector<8x32xf32>
    %209 = vector.extract_strided_slice %201 {offsets = [0, 96], sizes = [8, 32], strides = [1, 1]} : vector<8x128xf32> to vector<8x32xf32>
    %210 = math.tanh %208 : vector<8x32xf32>
    %211 = arith.mulf %209, %210 : vector<8x32xf32>
    %212 = arith.index_cast %169 : i32 to index
    %c32_57 = arith.constant 32 : index
    %213 = vector.load %arg11[%212, %c32_57] : memref<64x64xf32, #tpu.memory_space<vmem>>, vector<8x32xf32>
    tpu.vector_store %arg11[%212, %c32_57], %211 {strides = array<i32>} : memref<64x64xf32, #tpu.memory_space<vmem>>, vector<8x32xf32>,
    %c4_i32 = arith.constant 4 : i32
    %c8_i32_58 = arith.constant 8 : i32
    %214 = arith.muli %c4_i32, %c8_i32_58 : i32
    %215 = tpu.assume_multiple %214, 8 : i32
    %c7_i32_59 = arith.constant 7 : i32
    %216 = arith.subi %c7_i32_59, %c4_i32 : i32
    %c8_i32_60 = arith.constant 8 : i32
    %217 = arith.muli %216, %c8_i32_60 : i32
    %218 = tpu.assume_multiple %217, 8 : i32
    %219 = tpu.concatenate %194, %211 in 1 : vector<8x32xf32>, vector<8x32xf32> -> vector<8x64xf32>
    %cst_61 = arith.constant dense<0.000000e+00> : vector<8x256xf32>
    %220 = tpu.matmul %219, %9, %cst_61 {dimension_numbers = #tpu.dot_dimension_numbers<[1], [0], [0], [1], [0, 0, 1, 1], [], []>} : vector<8x64xf32>, vector<64x256xf32>, vector<8x256xf32> -> vector<8x256xf32>
    %221 = arith.index_cast %215 : i32 to index
    %c0_62 = arith.constant 0 : index
    %222 = vector.load %arg12[%221, %c0_62] : memref<64x256xf32, #tpu.memory_space<vmem>>, vector<8x128xf32>
    %223 = vector.extract_strided_slice %220 {offsets = [0, 0], sizes = [8, 128], strides = [1, 1]} : vector<8x256xf32> to vector<8x128xf32>
    %224 = arith.addf %222, %223 : vector<8x128xf32>
    %225 = arith.index_cast %218 : i32 to index
    %c128_63 = arith.constant 128 : index
    %226 = vector.load %arg12[%225, %c128_63] : memref<64x256xf32, #tpu.memory_space<vmem>>, vector<8x128xf32>
    %227 = vector.extract_strided_slice %220 {offsets = [0, 128], sizes = [8, 128], strides = [1, 1]} : vector<8x256xf32> to vector<8x128xf32>
    %228 = arith.addf %226, %227 : vector<8x128xf32>
    %229 = arith.negf %224 : vector<8x128xf32>
    %230 = math.exp %229 : vector<8x128xf32>
    %cst_64 = arith.constant 1.000000e+00 : f32
    %231 = vector.broadcast %cst_64 : f32 to vector<8x128xf32>
    %232 = arith.addf %231, %230 : vector<8x128xf32>
    %233 = arith.divf %231, %232 : vector<8x128xf32>
    %234 = vector.extract_strided_slice %224 {offsets = [0, 64], sizes = [8, 32], strides = [1, 1]} : vector<8x128xf32> to vector<8x32xf32>
    %235 = math.tanh %234 : vector<8x32xf32>
    %236 = vector.extract_strided_slice %233 {offsets = [0, 32], sizes = [8, 32], strides = [1, 1]} : vector<8x128xf32> to vector<8x32xf32>
    %237 = arith.mulf %236, %191 : vector<8x32xf32>
    %238 = vector.extract_strided_slice %233 {offsets = [0, 0], sizes = [8, 32], strides = [1, 1]} : vector<8x128xf32> to vector<8x32xf32>
    %239 = arith.mulf %238, %235 : vector<8x32xf32>
    %240 = arith.addf %237, %239 : vector<8x32xf32>
    %241 = vector.extract_strided_slice %233 {offsets = [0, 96], sizes = [8, 32], strides = [1, 1]} : vector<8x128xf32> to vector<8x32xf32>
    %242 = math.tanh %240 : vector<8x32xf32>
    %243 = arith.mulf %241, %242 : vector<8x32xf32>
    %244 = arith.index_cast %215 : i32 to index
    %c0_65 = arith.constant 0 : index
    %245 = vector.load %arg11[%244, %c0_65] : memref<64x64xf32, #tpu.memory_space<vmem>>, vector<8x32xf32>
    tpu.vector_store %arg11[%244, %c0_65], %243 {strides = array<i32>} : memref<64x64xf32, #tpu.memory_space<vmem>>, vector<8x32xf32>,
    %246 = arith.negf %228 : vector<8x128xf32>
    %247 = math.exp %246 : vector<8x128xf32>
    %cst_66 = arith.constant 1.000000e+00 : f32
    %248 = vector.broadcast %cst_66 : f32 to vector<8x128xf32>
    %249 = arith.addf %248, %247 : vector<8x128xf32>
    %250 = arith.divf %248, %249 : vector<8x128xf32>
    %251 = vector.extract_strided_slice %228 {offsets = [0, 64], sizes = [8, 32], strides = [1, 1]} : vector<8x128xf32> to vector<8x32xf32>
    %252 = math.tanh %251 : vector<8x32xf32>
    %253 = vector.extract_strided_slice %250 {offsets = [0, 32], sizes = [8, 32], strides = [1, 1]} : vector<8x128xf32> to vector<8x32xf32>
    %254 = arith.mulf %253, %208 : vector<8x32xf32>
    %255 = vector.extract_strided_slice %250 {offsets = [0, 0], sizes = [8, 32], strides = [1, 1]} : vector<8x128xf32> to vector<8x32xf32>
    %256 = arith.mulf %255, %252 : vector<8x32xf32>
    %257 = arith.addf %254, %256 : vector<8x32xf32>
    %258 = vector.extract_strided_slice %250 {offsets = [0, 96], sizes = [8, 32], strides = [1, 1]} : vector<8x128xf32> to vector<8x32xf32>
    %259 = math.tanh %257 : vector<8x32xf32>
    %260 = arith.mulf %258, %259 : vector<8x32xf32>
    %261 = arith.index_cast %218 : i32 to index
    %c32_67 = arith.constant 32 : index
    %262 = vector.load %arg11[%261, %c32_67] : memref<64x64xf32, #tpu.memory_space<vmem>>, vector<8x32xf32>
    tpu.vector_store %arg11[%261, %c32_67], %260 {strides = array<i32>} : memref<64x64xf32, #tpu.memory_space<vmem>>, vector<8x32xf32>,
    %c5_i32 = arith.constant 5 : i32
    %c8_i32_68 = arith.constant 8 : i32
    %263 = arith.muli %c5_i32, %c8_i32_68 : i32
    %264 = tpu.assume_multiple %263, 8 : i32
    %c7_i32_69 = arith.constant 7 : i32
    %265 = arith.subi %c7_i32_69, %c5_i32 : i32
    %c8_i32_70 = arith.constant 8 : i32
    %266 = arith.muli %265, %c8_i32_70 : i32
    %267 = tpu.assume_multiple %266, 8 : i32
    %268 = tpu.concatenate %243, %260 in 1 : vector<8x32xf32>, vector<8x32xf32> -> vector<8x64xf32>
    %cst_71 = arith.constant dense<0.000000e+00> : vector<8x256xf32>
    %269 = tpu.matmul %268, %9, %cst_71 {dimension_numbers = #tpu.dot_dimension_numbers<[1], [0], [0], [1], [0, 0, 1, 1], [], []>} : vector<8x64xf32>, vector<64x256xf32>, vector<8x256xf32> -> vector<8x256xf32>
    %270 = arith.index_cast %264 : i32 to index
    %c0_72 = arith.constant 0 : index
    %271 = vector.load %arg12[%270, %c0_72] : memref<64x256xf32, #tpu.memory_space<vmem>>, vector<8x128xf32>
    %272 = vector.extract_strided_slice %269 {offsets = [0, 0], sizes = [8, 128], strides = [1, 1]} : vector<8x256xf32> to vector<8x128xf32>
    %273 = arith.addf %271, %272 : vector<8x128xf32>
    %274 = arith.index_cast %267 : i32 to index
    %c128_73 = arith.constant 128 : index
    %275 = vector.load %arg12[%274, %c128_73] : memref<64x256xf32, #tpu.memory_space<vmem>>, vector<8x128xf32>
    %276 = vector.extract_strided_slice %269 {offsets = [0, 128], sizes = [8, 128], strides = [1, 1]} : vector<8x256xf32> to vector<8x128xf32>
    %277 = arith.addf %275, %276 : vector<8x128xf32>
    %278 = arith.negf %273 : vector<8x128xf32>
    %279 = math.exp %278 : vector<8x128xf32>
    %cst_74 = arith.constant 1.000000e+00 : f32
    %280 = vector.broadcast %cst_74 : f32 to vector<8x128xf32>
    %281 = arith.addf %280, %279 : vector<8x128xf32>
    %282 = arith.divf %280, %281 : vector<8x128xf32>
    %283 = vector.extract_strided_slice %273 {offsets = [0, 64], sizes = [8, 32], strides = [1, 1]} : vector<8x128xf32> to vector<8x32xf32>
    %284 = math.tanh %283 : vector<8x32xf32>
    %285 = vector.extract_strided_slice %282 {offsets = [0, 32], sizes = [8, 32], strides = [1, 1]} : vector<8x128xf32> to vector<8x32xf32>
    %286 = arith.mulf %285, %240 : vector<8x32xf32>
    %287 = vector.extract_strided_slice %282 {offsets = [0, 0], sizes = [8, 32], strides = [1, 1]} : vector<8x128xf32> to vector<8x32xf32>
    %288 = arith.mulf %287, %284 : vector<8x32xf32>
    %289 = arith.addf %286, %288 : vector<8x32xf32>
    %290 = vector.extract_strided_slice %282 {offsets = [0, 96], sizes = [8, 32], strides = [1, 1]} : vector<8x128xf32> to vector<8x32xf32>
    %291 = math.tanh %289 : vector<8x32xf32>
    %292 = arith.mulf %290, %291 : vector<8x32xf32>
    %293 = arith.index_cast %264 : i32 to index
    %c0_75 = arith.constant 0 : index
    %294 = vector.load %arg11[%293, %c0_75] : memref<64x64xf32, #tpu.memory_space<vmem>>, vector<8x32xf32>
    tpu.vector_store %arg11[%293, %c0_75], %292 {strides = array<i32>} : memref<64x64xf32, #tpu.memory_space<vmem>>, vector<8x32xf32>,
    %295 = arith.negf %277 : vector<8x128xf32>
    %296 = math.exp %295 : vector<8x128xf32>
    %cst_76 = arith.constant 1.000000e+00 : f32
    %297 = vector.broadcast %cst_76 : f32 to vector<8x128xf32>
    %298 = arith.addf %297, %296 : vector<8x128xf32>
    %299 = arith.divf %297, %298 : vector<8x128xf32>
    %300 = vector.extract_strided_slice %277 {offsets = [0, 64], sizes = [8, 32], strides = [1, 1]} : vector<8x128xf32> to vector<8x32xf32>
    %301 = math.tanh %300 : vector<8x32xf32>
    %302 = vector.extract_strided_slice %299 {offsets = [0, 32], sizes = [8, 32], strides = [1, 1]} : vector<8x128xf32> to vector<8x32xf32>
    %303 = arith.mulf %302, %257 : vector<8x32xf32>
    %304 = vector.extract_strided_slice %299 {offsets = [0, 0], sizes = [8, 32], strides = [1, 1]} : vector<8x128xf32> to vector<8x32xf32>
    %305 = arith.mulf %304, %301 : vector<8x32xf32>
    %306 = arith.addf %303, %305 : vector<8x32xf32>
    %307 = vector.extract_strided_slice %299 {offsets = [0, 96], sizes = [8, 32], strides = [1, 1]} : vector<8x128xf32> to vector<8x32xf32>
    %308 = math.tanh %306 : vector<8x32xf32>
    %309 = arith.mulf %307, %308 : vector<8x32xf32>
    %310 = arith.index_cast %267 : i32 to index
    %c32_77 = arith.constant 32 : index
    %311 = vector.load %arg11[%310, %c32_77] : memref<64x64xf32, #tpu.memory_space<vmem>>, vector<8x32xf32>
    tpu.vector_store %arg11[%310, %c32_77], %309 {strides = array<i32>} : memref<64x64xf32, #tpu.memory_space<vmem>>, vector<8x32xf32>,
    %c6_i32 = arith.constant 6 : i32
    %c8_i32_78 = arith.constant 8 : i32
    %312 = arith.muli %c6_i32, %c8_i32_78 : i32
    %313 = tpu.assume_multiple %312, 8 : i32
    %c7_i32_79 = arith.constant 7 : i32
    %314 = arith.subi %c7_i32_79, %c6_i32 : i32
    %c8_i32_80 = arith.constant 8 : i32
    %315 = arith.muli %314, %c8_i32_80 : i32
    %316 = tpu.assume_multiple %315, 8 : i32
    %317 = tpu.concatenate %292, %309 in 1 : vector<8x32xf32>, vector<8x32xf32> -> vector<8x64xf32>
    %cst_81 = arith.constant dense<0.000000e+00> : vector<8x256xf32>
    %318 = tpu.matmul %317, %9, %cst_81 {dimension_numbers = #tpu.dot_dimension_numbers<[1], [0], [0], [1], [0, 0, 1, 1], [], []>} : vector<8x64xf32>, vector<64x256xf32>, vector<8x256xf32> -> vector<8x256xf32>
    %319 = arith.index_cast %313 : i32 to index
    %c0_82 = arith.constant 0 : index
    %320 = vector.load %arg12[%319, %c0_82] : memref<64x256xf32, #tpu.memory_space<vmem>>, vector<8x128xf32>
    %321 = vector.extract_strided_slice %318 {offsets = [0, 0], sizes = [8, 128], strides = [1, 1]} : vector<8x256xf32> to vector<8x128xf32>
    %322 = arith.addf %320, %321 : vector<8x128xf32>
    %323 = arith.index_cast %316 : i32 to index
    %c128_83 = arith.constant 128 : index
    %324 = vector.load %arg12[%323, %c128_83] : memref<64x256xf32, #tpu.memory_space<vmem>>, vector<8x128xf32>
    %325 = vector.extract_strided_slice %318 {offsets = [0, 128], sizes = [8, 128], strides = [1, 1]} : vector<8x256xf32> to vector<8x128xf32>
    %326 = arith.addf %324, %325 : vector<8x128xf32>
    %327 = arith.negf %322 : vector<8x128xf32>
    %328 = math.exp %327 : vector<8x128xf32>
    %cst_84 = arith.constant 1.000000e+00 : f32
    %329 = vector.broadcast %cst_84 : f32 to vector<8x128xf32>
    %330 = arith.addf %329, %328 : vector<8x128xf32>
    %331 = arith.divf %329, %330 : vector<8x128xf32>
    %332 = vector.extract_strided_slice %322 {offsets = [0, 64], sizes = [8, 32], strides = [1, 1]} : vector<8x128xf32> to vector<8x32xf32>
    %333 = math.tanh %332 : vector<8x32xf32>
    %334 = vector.extract_strided_slice %331 {offsets = [0, 32], sizes = [8, 32], strides = [1, 1]} : vector<8x128xf32> to vector<8x32xf32>
    %335 = arith.mulf %334, %289 : vector<8x32xf32>
    %336 = vector.extract_strided_slice %331 {offsets = [0, 0], sizes = [8, 32], strides = [1, 1]} : vector<8x128xf32> to vector<8x32xf32>
    %337 = arith.mulf %336, %333 : vector<8x32xf32>
    %338 = arith.addf %335, %337 : vector<8x32xf32>
    %339 = vector.extract_strided_slice %331 {offsets = [0, 96], sizes = [8, 32], strides = [1, 1]} : vector<8x128xf32> to vector<8x32xf32>
    %340 = math.tanh %338 : vector<8x32xf32>
    %341 = arith.mulf %339, %340 : vector<8x32xf32>
    %342 = arith.index_cast %313 : i32 to index
    %c0_85 = arith.constant 0 : index
    %343 = vector.load %arg11[%342, %c0_85] : memref<64x64xf32, #tpu.memory_space<vmem>>, vector<8x32xf32>
    tpu.vector_store %arg11[%342, %c0_85], %341 {strides = array<i32>} : memref<64x64xf32, #tpu.memory_space<vmem>>, vector<8x32xf32>,
    %344 = arith.negf %326 : vector<8x128xf32>
    %345 = math.exp %344 : vector<8x128xf32>
    %cst_86 = arith.constant 1.000000e+00 : f32
    %346 = vector.broadcast %cst_86 : f32 to vector<8x128xf32>
    %347 = arith.addf %346, %345 : vector<8x128xf32>
    %348 = arith.divf %346, %347 : vector<8x128xf32>
    %349 = vector.extract_strided_slice %326 {offsets = [0, 64], sizes = [8, 32], strides = [1, 1]} : vector<8x128xf32> to vector<8x32xf32>
    %350 = math.tanh %349 : vector<8x32xf32>
    %351 = vector.extract_strided_slice %348 {offsets = [0, 32], sizes = [8, 32], strides = [1, 1]} : vector<8x128xf32> to vector<8x32xf32>
    %352 = arith.mulf %351, %306 : vector<8x32xf32>
    %353 = vector.extract_strided_slice %348 {offsets = [0, 0], sizes = [8, 32], strides = [1, 1]} : vector<8x128xf32> to vector<8x32xf32>
    %354 = arith.mulf %353, %350 : vector<8x32xf32>
    %355 = arith.addf %352, %354 : vector<8x32xf32>
    %356 = vector.extract_strided_slice %348 {offsets = [0, 96], sizes = [8, 32], strides = [1, 1]} : vector<8x128xf32> to vector<8x32xf32>
    %357 = math.tanh %355 : vector<8x32xf32>
    %358 = arith.mulf %356, %357 : vector<8x32xf32>
    %359 = arith.index_cast %316 : i32 to index
    %c32_87 = arith.constant 32 : index
    %360 = vector.load %arg11[%359, %c32_87] : memref<64x64xf32, #tpu.memory_space<vmem>>, vector<8x32xf32>
    tpu.vector_store %arg11[%359, %c32_87], %358 {strides = array<i32>} : memref<64x64xf32, #tpu.memory_space<vmem>>, vector<8x32xf32>,
    %c7_i32_88 = arith.constant 7 : i32
    %c8_i32_89 = arith.constant 8 : i32
    %361 = arith.muli %c7_i32_88, %c8_i32_89 : i32
    %362 = tpu.assume_multiple %361, 8 : i32
    %c7_i32_90 = arith.constant 7 : i32
    %363 = arith.subi %c7_i32_90, %c7_i32_88 : i32
    %c8_i32_91 = arith.constant 8 : i32
    %364 = arith.muli %363, %c8_i32_91 : i32
    %365 = tpu.assume_multiple %364, 8 : i32
    %366 = tpu.concatenate %341, %358 in 1 : vector<8x32xf32>, vector<8x32xf32> -> vector<8x64xf32>
    %cst_92 = arith.constant dense<0.000000e+00> : vector<8x256xf32>
    %367 = tpu.matmul %366, %9, %cst_92 {dimension_numbers = #tpu.dot_dimension_numbers<[1], [0], [0], [1], [0, 0, 1, 1], [], []>} : vector<8x64xf32>, vector<64x256xf32>, vector<8x256xf32> -> vector<8x256xf32>
    %368 = arith.index_cast %362 : i32 to index
    %c0_93 = arith.constant 0 : index
    %369 = vector.load %arg12[%368, %c0_93] : memref<64x256xf32, #tpu.memory_space<vmem>>, vector<8x128xf32>
    %370 = vector.extract_strided_slice %367 {offsets = [0, 0], sizes = [8, 128], strides = [1, 1]} : vector<8x256xf32> to vector<8x128xf32>
    %371 = arith.addf %369, %370 : vector<8x128xf32>
    %372 = arith.index_cast %365 : i32 to index
    %c128_94 = arith.constant 128 : index
    %373 = vector.load %arg12[%372, %c128_94] : memref<64x256xf32, #tpu.memory_space<vmem>>, vector<8x128xf32>
    %374 = vector.extract_strided_slice %367 {offsets = [0, 128], sizes = [8, 128], strides = [1, 1]} : vector<8x256xf32> to vector<8x128xf32>
    %375 = arith.addf %373, %374 : vector<8x128xf32>
    %376 = arith.negf %371 : vector<8x128xf32>
    %377 = math.exp %376 : vector<8x128xf32>
    %cst_95 = arith.constant 1.000000e+00 : f32
    %378 = vector.broadcast %cst_95 : f32 to vector<8x128xf32>
    %379 = arith.addf %378, %377 : vector<8x128xf32>
    %380 = arith.divf %378, %379 : vector<8x128xf32>
    %381 = vector.extract_strided_slice %371 {offsets = [0, 64], sizes = [8, 32], strides = [1, 1]} : vector<8x128xf32> to vector<8x32xf32>
    %382 = math.tanh %381 : vector<8x32xf32>
    %383 = vector.extract_strided_slice %380 {offsets = [0, 32], sizes = [8, 32], strides = [1, 1]} : vector<8x128xf32> to vector<8x32xf32>
    %384 = arith.mulf %383, %338 : vector<8x32xf32>
    %385 = vector.extract_strided_slice %380 {offsets = [0, 0], sizes = [8, 32], strides = [1, 1]} : vector<8x128xf32> to vector<8x32xf32>
    %386 = arith.mulf %385, %382 : vector<8x32xf32>
    %387 = arith.addf %384, %386 : vector<8x32xf32>
    %388 = vector.extract_strided_slice %380 {offsets = [0, 96], sizes = [8, 32], strides = [1, 1]} : vector<8x128xf32> to vector<8x32xf32>
    %389 = math.tanh %387 : vector<8x32xf32>
    %390 = arith.mulf %388, %389 : vector<8x32xf32>
    %391 = arith.index_cast %362 : i32 to index
    %c0_96 = arith.constant 0 : index
    %392 = vector.load %arg11[%391, %c0_96] : memref<64x64xf32, #tpu.memory_space<vmem>>, vector<8x32xf32>
    tpu.vector_store %arg11[%391, %c0_96], %390 {strides = array<i32>} : memref<64x64xf32, #tpu.memory_space<vmem>>, vector<8x32xf32>,
    %393 = arith.negf %375 : vector<8x128xf32>
    %394 = math.exp %393 : vector<8x128xf32>
    %cst_97 = arith.constant 1.000000e+00 : f32
    %395 = vector.broadcast %cst_97 : f32 to vector<8x128xf32>
    %396 = arith.addf %395, %394 : vector<8x128xf32>
    %397 = arith.divf %395, %396 : vector<8x128xf32>
    %398 = vector.extract_strided_slice %375 {offsets = [0, 64], sizes = [8, 32], strides = [1, 1]} : vector<8x128xf32> to vector<8x32xf32>
    %399 = math.tanh %398 : vector<8x32xf32>
    %400 = vector.extract_strided_slice %397 {offsets = [0, 32], sizes = [8, 32], strides = [1, 1]} : vector<8x128xf32> to vector<8x32xf32>
    %401 = arith.mulf %400, %355 : vector<8x32xf32>
    %402 = vector.extract_strided_slice %397 {offsets = [0, 0], sizes = [8, 32], strides = [1, 1]} : vector<8x128xf32> to vector<8x32xf32>
    %403 = arith.mulf %402, %399 : vector<8x32xf32>
    %404 = arith.addf %401, %403 : vector<8x32xf32>
    %405 = vector.extract_strided_slice %397 {offsets = [0, 96], sizes = [8, 32], strides = [1, 1]} : vector<8x128xf32> to vector<8x32xf32>
    %406 = math.tanh %404 : vector<8x32xf32>
    %407 = arith.mulf %405, %406 : vector<8x32xf32>
    %408 = arith.index_cast %365 : i32 to index
    %c32_98 = arith.constant 32 : index
    %409 = vector.load %arg11[%408, %c32_98] : memref<64x64xf32, #tpu.memory_space<vmem>>, vector<8x32xf32>
    tpu.vector_store %arg11[%408, %c32_98], %407 {strides = array<i32>} : memref<64x64xf32, #tpu.memory_space<vmem>>, vector<8x32xf32>,
    %c8_i32_99 = arith.constant 8 : i32
    %c0_100 = arith.constant 0 : index
    %c0_101 = arith.constant 0 : index
    %c0_102 = arith.constant 0 : index
    %410 = vector.load %arg9[%c0_100, %c0_101, %c0_102] : memref<4x8x32xf32, #tpu.memory_space<vmem>>, vector<1x8x32xf32>
    %411 = vector.shape_cast %410 : vector<1x8x32xf32> to vector<8x32xf32>
    %412 = vector.shape_cast %390 : vector<8x32xf32> to vector<1x8x32xf32>
    tpu.vector_store %arg9[%c0_100, %c0_101, %c0_102], %412 {strides = array<i32>} : memref<4x8x32xf32, #tpu.memory_space<vmem>>, vector<1x8x32xf32>,
    %c0_103 = arith.constant 0 : index
    %c0_104 = arith.constant 0 : index
    %c0_105 = arith.constant 0 : index
    %413 = vector.load %arg10[%c0_103, %c0_104, %c0_105] : memref<4x8x32xf32, #tpu.memory_space<vmem>>, vector<1x8x32xf32>
    %414 = vector.shape_cast %413 : vector<1x8x32xf32> to vector<8x32xf32>
    %415 = vector.shape_cast %387 : vector<8x32xf32> to vector<1x8x32xf32>
    tpu.vector_store %arg10[%c0_103, %c0_104, %c0_105], %415 {strides = array<i32>} : memref<4x8x32xf32, #tpu.memory_space<vmem>>, vector<1x8x32xf32>,
    %c1_106 = arith.constant 1 : index
    %c0_107 = arith.constant 0 : index
    %c0_108 = arith.constant 0 : index
    %416 = vector.load %arg9[%c1_106, %c0_107, %c0_108] : memref<4x8x32xf32, #tpu.memory_space<vmem>>, vector<1x8x32xf32>
    %417 = vector.shape_cast %416 : vector<1x8x32xf32> to vector<8x32xf32>
    %418 = vector.shape_cast %407 : vector<8x32xf32> to vector<1x8x32xf32>
    tpu.vector_store %arg9[%c1_106, %c0_107, %c0_108], %418 {strides = array<i32>} : memref<4x8x32xf32, #tpu.memory_space<vmem>>, vector<1x8x32xf32>,
    %c1_109 = arith.constant 1 : index
    %c0_110 = arith.constant 0 : index
    %c0_111 = arith.constant 0 : index
    %419 = vector.load %arg10[%c1_109, %c0_110, %c0_111] : memref<4x8x32xf32, #tpu.memory_space<vmem>>, vector<1x8x32xf32>
    %420 = vector.shape_cast %419 : vector<1x8x32xf32> to vector<8x32xf32>
    %421 = vector.shape_cast %404 : vector<8x32xf32> to vector<1x8x32xf32>
    tpu.vector_store %arg10[%c1_109, %c0_110, %c0_111], %421 {strides = array<i32>} : memref<4x8x32xf32, #tpu.memory_space<vmem>>, vector<1x8x32xf32>,
    %c0_112 = arith.constant 0 : index
    %c0_113 = arith.constant 0 : index
    %422 = vector.load %arg11[%c0_112, %c0_113] : memref<64x64xf32, #tpu.memory_space<vmem>>, vector<64x64xf32>
    %c0_114 = arith.constant 0 : index
    %c0_115 = arith.constant 0 : index
    %c0_116 = arith.constant 0 : index
    %423 = vector.load %arg3[%c0_114, %c0_115, %c0_116] : memref<1x64x256xf32, #tpu.memory_space<vmem>>, vector<1x64x256xf32>
    %424 = vector.shape_cast %423 : vector<1x64x256xf32> to vector<64x256xf32>
    %cst_117 = arith.constant dense<0.000000e+00> : vector<64x256xf32>
    %425 = tpu.matmul %422, %424, %cst_117 {dimension_numbers = #tpu.dot_dimension_numbers<[1], [0], [0], [1], [0, 0, 1, 1], [], []>} : vector<64x64xf32>, vector<64x256xf32>, vector<64x256xf32> -> vector<64x256xf32>
    %c1_118 = arith.constant 1 : index
    %c0_119 = arith.constant 0 : index
    %c0_120 = arith.constant 0 : index
    %426 = vector.load %arg5[%c1_118, %c0_119, %c0_120] : memref<2x1x256xf32, #tpu.memory_space<vmem>>, vector<1x1x256xf32>
    %427 = vector.shape_cast %426 : vector<1x1x256xf32> to vector<1x256xf32>
    %428 = vector.broadcast %427 : vector<1x256xf32> to vector<64x256xf32>
    %429 = arith.addf %425, %428 : vector<64x256xf32>
    %c0_121 = arith.constant 0 : index
    %c0_122 = arith.constant 0 : index
    %430 = vector.load %arg12[%c0_121, %c0_122] : memref<64x256xf32, #tpu.memory_space<vmem>>, vector<64x256xf32>
    tpu.vector_store %arg12[%c0_121, %c0_122], %429 {strides = array<i32>} : memref<64x256xf32, #tpu.memory_space<vmem>>, vector<64x256xf32>,
    %c1_123 = arith.constant 1 : index
    %c0_124 = arith.constant 0 : index
    %c0_125 = arith.constant 0 : index
    %431 = vector.load %arg4[%c1_123, %c0_124, %c0_125] : memref<2x64x256xf32, #tpu.memory_space<vmem>>, vector<1x64x256xf32>
    %432 = vector.shape_cast %431 : vector<1x64x256xf32> to vector<64x256xf32>
    %c2 = arith.constant 2 : index
    %c0_126 = arith.constant 0 : index
    %c0_127 = arith.constant 0 : index
    %433 = vector.load %arg6[%c2, %c0_126, %c0_127] : memref<4x8x32xf32, #tpu.memory_space<vmem>>, vector<1x8x32xf32>
    %434 = vector.shape_cast %433 : vector<1x8x32xf32> to vector<8x32xf32>
    %c2_128 = arith.constant 2 : index
    %c0_129 = arith.constant 0 : index
    %c0_130 = arith.constant 0 : index
    %435 = vector.load %arg7[%c2_128, %c0_129, %c0_130] : memref<4x8x32xf32, #tpu.memory_space<vmem>>, vector<1x8x32xf32>
    %436 = vector.shape_cast %435 : vector<1x8x32xf32> to vector<8x32xf32>
    %c3 = arith.constant 3 : index
    %c0_131 = arith.constant 0 : index
    %c0_132 = arith.constant 0 : index
    %437 = vector.load %arg6[%c3, %c0_131, %c0_132] : memref<4x8x32xf32, #tpu.memory_space<vmem>>, vector<1x8x32xf32>
    %438 = vector.shape_cast %437 : vector<1x8x32xf32> to vector<8x32xf32>
    %c3_133 = arith.constant 3 : index
    %c0_134 = arith.constant 0 : index
    %c0_135 = arith.constant 0 : index
    %439 = vector.load %arg7[%c3_133, %c0_134, %c0_135] : memref<4x8x32xf32, #tpu.memory_space<vmem>>, vector<1x8x32xf32>
    %440 = vector.shape_cast %439 : vector<1x8x32xf32> to vector<8x32xf32>
    %c0_i32_136 = arith.constant 0 : i32
    %c8_i32_137 = arith.constant 8 : i32
    %441 = arith.muli %c0_i32_136, %c8_i32_137 : i32
    %442 = tpu.assume_multiple %441, 8 : i32
    %c7_i32_138 = arith.constant 7 : i32
    %443 = arith.subi %c7_i32_138, %c0_i32_136 : i32
    %c8_i32_139 = arith.constant 8 : i32
    %444 = arith.muli %443, %c8_i32_139 : i32
    %445 = tpu.assume_multiple %444, 8 : i32
    %446 = tpu.concatenate %434, %438 in 1 : vector<8x32xf32>, vector<8x32xf32> -> vector<8x64xf32>
    %cst_140 = arith.constant dense<0.000000e+00> : vector<8x256xf32>
    %447 = tpu.matmul %446, %432, %cst_140 {dimension_numbers = #tpu.dot_dimension_numbers<[1], [0], [0], [1], [0, 0, 1, 1], [], []>} : vector<8x64xf32>, vector<64x256xf32>, vector<8x256xf32> -> vector<8x256xf32>
    %448 = arith.index_cast %442 : i32 to index
    %c0_141 = arith.constant 0 : index
    %449 = vector.load %arg12[%448, %c0_141] : memref<64x256xf32, #tpu.memory_space<vmem>>, vector<8x128xf32>
    %450 = vector.extract_strided_slice %447 {offsets = [0, 0], sizes = [8, 128], strides = [1, 1]} : vector<8x256xf32> to vector<8x128xf32>
    %451 = arith.addf %449, %450 : vector<8x128xf32>
    %452 = arith.index_cast %445 : i32 to index
    %c128_142 = arith.constant 128 : index
    %453 = vector.load %arg12[%452, %c128_142] : memref<64x256xf32, #tpu.memory_space<vmem>>, vector<8x128xf32>
    %454 = vector.extract_strided_slice %447 {offsets = [0, 128], sizes = [8, 128], strides = [1, 1]} : vector<8x256xf32> to vector<8x128xf32>
    %455 = arith.addf %453, %454 : vector<8x128xf32>
    %456 = arith.negf %451 : vector<8x128xf32>
    %457 = math.exp %456 : vector<8x128xf32>
    %cst_143 = arith.constant 1.000000e+00 : f32
    %458 = vector.broadcast %cst_143 : f32 to vector<8x128xf32>
    %459 = arith.addf %458, %457 : vector<8x128xf32>
    %460 = arith.divf %458, %459 : vector<8x128xf32>
    %461 = vector.extract_strided_slice %451 {offsets = [0, 64], sizes = [8, 32], strides = [1, 1]} : vector<8x128xf32> to vector<8x32xf32>
    %462 = math.tanh %461 : vector<8x32xf32>
    %463 = vector.extract_strided_slice %460 {offsets = [0, 32], sizes = [8, 32], strides = [1, 1]} : vector<8x128xf32> to vector<8x32xf32>
    %464 = arith.mulf %463, %436 : vector<8x32xf32>
    %465 = vector.extract_strided_slice %460 {offsets = [0, 0], sizes = [8, 32], strides = [1, 1]} : vector<8x128xf32> to vector<8x32xf32>
    %466 = arith.mulf %465, %462 : vector<8x32xf32>
    %467 = arith.addf %464, %466 : vector<8x32xf32>
    %468 = vector.extract_strided_slice %460 {offsets = [0, 96], sizes = [8, 32], strides = [1, 1]} : vector<8x128xf32> to vector<8x32xf32>
    %469 = math.tanh %467 : vector<8x32xf32>
    %470 = arith.mulf %468, %469 : vector<8x32xf32>
    %471 = arith.index_cast %442 : i32 to index
    %c0_144 = arith.constant 0 : index
    %472 = vector.load %arg8[%471, %c0_144] : memref<64x64xf32, #tpu.memory_space<vmem>>, vector<8x32xf32>
    tpu.vector_store %arg8[%471, %c0_144], %470 {strides = array<i32>} : memref<64x64xf32, #tpu.memory_space<vmem>>, vector<8x32xf32>,
    %473 = arith.negf %455 : vector<8x128xf32>
    %474 = math.exp %473 : vector<8x128xf32>
    %cst_145 = arith.constant 1.000000e+00 : f32
    %475 = vector.broadcast %cst_145 : f32 to vector<8x128xf32>
    %476 = arith.addf %475, %474 : vector<8x128xf32>
    %477 = arith.divf %475, %476 : vector<8x128xf32>
    %478 = vector.extract_strided_slice %455 {offsets = [0, 64], sizes = [8, 32], strides = [1, 1]} : vector<8x128xf32> to vector<8x32xf32>
    %479 = math.tanh %478 : vector<8x32xf32>
    %480 = vector.extract_strided_slice %477 {offsets = [0, 32], sizes = [8, 32], strides = [1, 1]} : vector<8x128xf32> to vector<8x32xf32>
    %481 = arith.mulf %480, %440 : vector<8x32xf32>
    %482 = vector.extract_strided_slice %477 {offsets = [0, 0], sizes = [8, 32], strides = [1, 1]} : vector<8x128xf32> to vector<8x32xf32>
    %483 = arith.mulf %482, %479 : vector<8x32xf32>
    %484 = arith.addf %481, %483 : vector<8x32xf32>
    %485 = vector.extract_strided_slice %477 {offsets = [0, 96], sizes = [8, 32], strides = [1, 1]} : vector<8x128xf32> to vector<8x32xf32>
    %486 = math.tanh %484 : vector<8x32xf32>
    %487 = arith.mulf %485, %486 : vector<8x32xf32>
    %488 = arith.index_cast %445 : i32 to index
    %c32_146 = arith.constant 32 : index
    %489 = vector.load %arg8[%488, %c32_146] : memref<64x64xf32, #tpu.memory_space<vmem>>, vector<8x32xf32>
    tpu.vector_store %arg8[%488, %c32_146], %487 {strides = array<i32>} : memref<64x64xf32, #tpu.memory_space<vmem>>, vector<8x32xf32>,
    %c1_i32_147 = arith.constant 1 : i32
    %c8_i32_148 = arith.constant 8 : i32
    %490 = arith.muli %c1_i32_147, %c8_i32_148 : i32
    %491 = tpu.assume_multiple %490, 8 : i32
    %c7_i32_149 = arith.constant 7 : i32
    %492 = arith.subi %c7_i32_149, %c1_i32_147 : i32
    %c8_i32_150 = arith.constant 8 : i32
    %493 = arith.muli %492, %c8_i32_150 : i32
    %494 = tpu.assume_multiple %493, 8 : i32
    %495 = tpu.concatenate %470, %487 in 1 : vector<8x32xf32>, vector<8x32xf32> -> vector<8x64xf32>
    %cst_151 = arith.constant dense<0.000000e+00> : vector<8x256xf32>
    %496 = tpu.matmul %495, %432, %cst_151 {dimension_numbers = #tpu.dot_dimension_numbers<[1], [0], [0], [1], [0, 0, 1, 1], [], []>} : vector<8x64xf32>, vector<64x256xf32>, vector<8x256xf32> -> vector<8x256xf32>
    %497 = arith.index_cast %491 : i32 to index
    %c0_152 = arith.constant 0 : index
    %498 = vector.load %arg12[%497, %c0_152] : memref<64x256xf32, #tpu.memory_space<vmem>>, vector<8x128xf32>
    %499 = vector.extract_strided_slice %496 {offsets = [0, 0], sizes = [8, 128], strides = [1, 1]} : vector<8x256xf32> to vector<8x128xf32>
    %500 = arith.addf %498, %499 : vector<8x128xf32>
    %501 = arith.index_cast %494 : i32 to index
    %c128_153 = arith.constant 128 : index
    %502 = vector.load %arg12[%501, %c128_153] : memref<64x256xf32, #tpu.memory_space<vmem>>, vector<8x128xf32>
    %503 = vector.extract_strided_slice %496 {offsets = [0, 128], sizes = [8, 128], strides = [1, 1]} : vector<8x256xf32> to vector<8x128xf32>
    %504 = arith.addf %502, %503 : vector<8x128xf32>
    %505 = arith.negf %500 : vector<8x128xf32>
    %506 = math.exp %505 : vector<8x128xf32>
    %cst_154 = arith.constant 1.000000e+00 : f32
    %507 = vector.broadcast %cst_154 : f32 to vector<8x128xf32>
    %508 = arith.addf %507, %506 : vector<8x128xf32>
    %509 = arith.divf %507, %508 : vector<8x128xf32>
    %510 = vector.extract_strided_slice %500 {offsets = [0, 64], sizes = [8, 32], strides = [1, 1]} : vector<8x128xf32> to vector<8x32xf32>
    %511 = math.tanh %510 : vector<8x32xf32>
    %512 = vector.extract_strided_slice %509 {offsets = [0, 32], sizes = [8, 32], strides = [1, 1]} : vector<8x128xf32> to vector<8x32xf32>
    %513 = arith.mulf %512, %467 : vector<8x32xf32>
    %514 = vector.extract_strided_slice %509 {offsets = [0, 0], sizes = [8, 32], strides = [1, 1]} : vector<8x128xf32> to vector<8x32xf32>
    %515 = arith.mulf %514, %511 : vector<8x32xf32>
    %516 = arith.addf %513, %515 : vector<8x32xf32>
    %517 = vector.extract_strided_slice %509 {offsets = [0, 96], sizes = [8, 32], strides = [1, 1]} : vector<8x128xf32> to vector<8x32xf32>
    %518 = math.tanh %516 : vector<8x32xf32>
    %519 = arith.mulf %517, %518 : vector<8x32xf32>
    %520 = arith.index_cast %491 : i32 to index
    %c0_155 = arith.constant 0 : index
    %521 = vector.load %arg8[%520, %c0_155] : memref<64x64xf32, #tpu.memory_space<vmem>>, vector<8x32xf32>
    tpu.vector_store %arg8[%520, %c0_155], %519 {strides = array<i32>} : memref<64x64xf32, #tpu.memory_space<vmem>>, vector<8x32xf32>,
    %522 = arith.negf %504 : vector<8x128xf32>
    %523 = math.exp %522 : vector<8x128xf32>
    %cst_156 = arith.constant 1.000000e+00 : f32
    %524 = vector.broadcast %cst_156 : f32 to vector<8x128xf32>
    %525 = arith.addf %524, %523 : vector<8x128xf32>
    %526 = arith.divf %524, %525 : vector<8x128xf32>
    %527 = vector.extract_strided_slice %504 {offsets = [0, 64], sizes = [8, 32], strides = [1, 1]} : vector<8x128xf32> to vector<8x32xf32>
    %528 = math.tanh %527 : vector<8x32xf32>
    %529 = vector.extract_strided_slice %526 {offsets = [0, 32], sizes = [8, 32], strides = [1, 1]} : vector<8x128xf32> to vector<8x32xf32>
    %530 = arith.mulf %529, %484 : vector<8x32xf32>
    %531 = vector.extract_strided_slice %526 {offsets = [0, 0], sizes = [8, 32], strides = [1, 1]} : vector<8x128xf32> to vector<8x32xf32>
    %532 = arith.mulf %531, %528 : vector<8x32xf32>
    %533 = arith.addf %530, %532 : vector<8x32xf32>
    %534 = vector.extract_strided_slice %526 {offsets = [0, 96], sizes = [8, 32], strides = [1, 1]} : vector<8x128xf32> to vector<8x32xf32>
    %535 = math.tanh %533 : vector<8x32xf32>
    %536 = arith.mulf %534, %535 : vector<8x32xf32>
    %537 = arith.index_cast %494 : i32 to index
    %c32_157 = arith.constant 32 : index
    %538 = vector.load %arg8[%537, %c32_157] : memref<64x64xf32, #tpu.memory_space<vmem>>, vector<8x32xf32>
    tpu.vector_store %arg8[%537, %c32_157], %536 {strides = array<i32>} : memref<64x64xf32, #tpu.memory_space<vmem>>, vector<8x32xf32>,
    %c2_i32_158 = arith.constant 2 : i32
    %c8_i32_159 = arith.constant 8 : i32
    %539 = arith.muli %c2_i32_158, %c8_i32_159 : i32
    %540 = tpu.assume_multiple %539, 8 : i32
    %c7_i32_160 = arith.constant 7 : i32
    %541 = arith.subi %c7_i32_160, %c2_i32_158 : i32
    %c8_i32_161 = arith.constant 8 : i32
    %542 = arith.muli %541, %c8_i32_161 : i32
    %543 = tpu.assume_multiple %542, 8 : i32
    %544 = tpu.concatenate %519, %536 in 1 : vector<8x32xf32>, vector<8x32xf32> -> vector<8x64xf32>
    %cst_162 = arith.constant dense<0.000000e+00> : vector<8x256xf32>
    %545 = tpu.matmul %544, %432, %cst_162 {dimension_numbers = #tpu.dot_dimension_numbers<[1], [0], [0], [1], [0, 0, 1, 1], [], []>} : vector<8x64xf32>, vector<64x256xf32>, vector<8x256xf32> -> vector<8x256xf32>
    %546 = arith.index_cast %540 : i32 to index
    %c0_163 = arith.constant 0 : index
    %547 = vector.load %arg12[%546, %c0_163] : memref<64x256xf32, #tpu.memory_space<vmem>>, vector<8x128xf32>
    %548 = vector.extract_strided_slice %545 {offsets = [0, 0], sizes = [8, 128], strides = [1, 1]} : vector<8x256xf32> to vector<8x128xf32>
    %549 = arith.addf %547, %548 : vector<8x128xf32>
    %550 = arith.index_cast %543 : i32 to index
    %c128_164 = arith.constant 128 : index
    %551 = vector.load %arg12[%550, %c128_164] : memref<64x256xf32, #tpu.memory_space<vmem>>, vector<8x128xf32>
    %552 = vector.extract_strided_slice %545 {offsets = [0, 128], sizes = [8, 128], strides = [1, 1]} : vector<8x256xf32> to vector<8x128xf32>
    %553 = arith.addf %551, %552 : vector<8x128xf32>
    %554 = arith.negf %549 : vector<8x128xf32>
    %555 = math.exp %554 : vector<8x128xf32>
    %cst_165 = arith.constant 1.000000e+00 : f32
    %556 = vector.broadcast %cst_165 : f32 to vector<8x128xf32>
    %557 = arith.addf %556, %555 : vector<8x128xf32>
    %558 = arith.divf %556, %557 : vector<8x128xf32>
    %559 = vector.extract_strided_slice %549 {offsets = [0, 64], sizes = [8, 32], strides = [1, 1]} : vector<8x128xf32> to vector<8x32xf32>
    %560 = math.tanh %559 : vector<8x32xf32>
    %561 = vector.extract_strided_slice %558 {offsets = [0, 32], sizes = [8, 32], strides = [1, 1]} : vector<8x128xf32> to vector<8x32xf32>
    %562 = arith.mulf %561, %516 : vector<8x32xf32>
    %563 = vector.extract_strided_slice %558 {offsets = [0, 0], sizes = [8, 32], strides = [1, 1]} : vector<8x128xf32> to vector<8x32xf32>
    %564 = arith.mulf %563, %560 : vector<8x32xf32>
    %565 = arith.addf %562, %564 : vector<8x32xf32>
    %566 = vector.extract_strided_slice %558 {offsets = [0, 96], sizes = [8, 32], strides = [1, 1]} : vector<8x128xf32> to vector<8x32xf32>
    %567 = math.tanh %565 : vector<8x32xf32>
    %568 = arith.mulf %566, %567 : vector<8x32xf32>
    %569 = arith.index_cast %540 : i32 to index
    %c0_166 = arith.constant 0 : index
    %570 = vector.load %arg8[%569, %c0_166] : memref<64x64xf32, #tpu.memory_space<vmem>>, vector<8x32xf32>
    tpu.vector_store %arg8[%569, %c0_166], %568 {strides = array<i32>} : memref<64x64xf32, #tpu.memory_space<vmem>>, vector<8x32xf32>,
    %571 = arith.negf %553 : vector<8x128xf32>
    %572 = math.exp %571 : vector<8x128xf32>
    %cst_167 = arith.constant 1.000000e+00 : f32
    %573 = vector.broadcast %cst_167 : f32 to vector<8x128xf32>
    %574 = arith.addf %573, %572 : vector<8x128xf32>
    %575 = arith.divf %573, %574 : vector<8x128xf32>
    %576 = vector.extract_strided_slice %553 {offsets = [0, 64], sizes = [8, 32], strides = [1, 1]} : vector<8x128xf32> to vector<8x32xf32>
    %577 = math.tanh %576 : vector<8x32xf32>
    %578 = vector.extract_strided_slice %575 {offsets = [0, 32], sizes = [8, 32], strides = [1, 1]} : vector<8x128xf32> to vector<8x32xf32>
    %579 = arith.mulf %578, %533 : vector<8x32xf32>
    %580 = vector.extract_strided_slice %575 {offsets = [0, 0], sizes = [8, 32], strides = [1, 1]} : vector<8x128xf32> to vector<8x32xf32>
    %581 = arith.mulf %580, %577 : vector<8x32xf32>
    %582 = arith.addf %579, %581 : vector<8x32xf32>
    %583 = vector.extract_strided_slice %575 {offsets = [0, 96], sizes = [8, 32], strides = [1, 1]} : vector<8x128xf32> to vector<8x32xf32>
    %584 = math.tanh %582 : vector<8x32xf32>
    %585 = arith.mulf %583, %584 : vector<8x32xf32>
    %586 = arith.index_cast %543 : i32 to index
    %c32_168 = arith.constant 32 : index
    %587 = vector.load %arg8[%586, %c32_168] : memref<64x64xf32, #tpu.memory_space<vmem>>, vector<8x32xf32>
    tpu.vector_store %arg8[%586, %c32_168], %585 {strides = array<i32>} : memref<64x64xf32, #tpu.memory_space<vmem>>, vector<8x32xf32>,
    %c3_i32_169 = arith.constant 3 : i32
    %c8_i32_170 = arith.constant 8 : i32
    %588 = arith.muli %c3_i32_169, %c8_i32_170 : i32
    %589 = tpu.assume_multiple %588, 8 : i32
    %c7_i32_171 = arith.constant 7 : i32
    %590 = arith.subi %c7_i32_171, %c3_i32_169 : i32
    %c8_i32_172 = arith.constant 8 : i32
    %591 = arith.muli %590, %c8_i32_172 : i32
    %592 = tpu.assume_multiple %591, 8 : i32
    %593 = tpu.concatenate %568, %585 in 1 : vector<8x32xf32>, vector<8x32xf32> -> vector<8x64xf32>
    %cst_173 = arith.constant dense<0.000000e+00> : vector<8x256xf32>
    %594 = tpu.matmul %593, %432, %cst_173 {dimension_numbers = #tpu.dot_dimension_numbers<[1], [0], [0], [1], [0, 0, 1, 1], [], []>} : vector<8x64xf32>, vector<64x256xf32>, vector<8x256xf32> -> vector<8x256xf32>
    %595 = arith.index_cast %589 : i32 to index
    %c0_174 = arith.constant 0 : index
    %596 = vector.load %arg12[%595, %c0_174] : memref<64x256xf32, #tpu.memory_space<vmem>>, vector<8x128xf32>
    %597 = vector.extract_strided_slice %594 {offsets = [0, 0], sizes = [8, 128], strides = [1, 1]} : vector<8x256xf32> to vector<8x128xf32>
    %598 = arith.addf %596, %597 : vector<8x128xf32>
    %599 = arith.index_cast %592 : i32 to index
    %c128_175 = arith.constant 128 : index
    %600 = vector.load %arg12[%599, %c128_175] : memref<64x256xf32, #tpu.memory_space<vmem>>, vector<8x128xf32>
    %601 = vector.extract_strided_slice %594 {offsets = [0, 128], sizes = [8, 128], strides = [1, 1]} : vector<8x256xf32> to vector<8x128xf32>
    %602 = arith.addf %600, %601 : vector<8x128xf32>
    %603 = arith.negf %598 : vector<8x128xf32>
    %604 = math.exp %603 : vector<8x128xf32>
    %cst_176 = arith.constant 1.000000e+00 : f32
    %605 = vector.broadcast %cst_176 : f32 to vector<8x128xf32>
    %606 = arith.addf %605, %604 : vector<8x128xf32>
    %607 = arith.divf %605, %606 : vector<8x128xf32>
    %608 = vector.extract_strided_slice %598 {offsets = [0, 64], sizes = [8, 32], strides = [1, 1]} : vector<8x128xf32> to vector<8x32xf32>
    %609 = math.tanh %608 : vector<8x32xf32>
    %610 = vector.extract_strided_slice %607 {offsets = [0, 32], sizes = [8, 32], strides = [1, 1]} : vector<8x128xf32> to vector<8x32xf32>
    %611 = arith.mulf %610, %565 : vector<8x32xf32>
    %612 = vector.extract_strided_slice %607 {offsets = [0, 0], sizes = [8, 32], strides = [1, 1]} : vector<8x128xf32> to vector<8x32xf32>
    %613 = arith.mulf %612, %609 : vector<8x32xf32>
    %614 = arith.addf %611, %613 : vector<8x32xf32>
    %615 = vector.extract_strided_slice %607 {offsets = [0, 96], sizes = [8, 32], strides = [1, 1]} : vector<8x128xf32> to vector<8x32xf32>
    %616 = math.tanh %614 : vector<8x32xf32>
    %617 = arith.mulf %615, %616 : vector<8x32xf32>
    %618 = arith.index_cast %589 : i32 to index
    %c0_177 = arith.constant 0 : index
    %619 = vector.load %arg8[%618, %c0_177] : memref<64x64xf32, #tpu.memory_space<vmem>>, vector<8x32xf32>
    tpu.vector_store %arg8[%618, %c0_177], %617 {strides = array<i32>} : memref<64x64xf32, #tpu.memory_space<vmem>>, vector<8x32xf32>,
    %620 = arith.negf %602 : vector<8x128xf32>
    %621 = math.exp %620 : vector<8x128xf32>
    %cst_178 = arith.constant 1.000000e+00 : f32
    %622 = vector.broadcast %cst_178 : f32 to vector<8x128xf32>
    %623 = arith.addf %622, %621 : vector<8x128xf32>
    %624 = arith.divf %622, %623 : vector<8x128xf32>
    %625 = vector.extract_strided_slice %602 {offsets = [0, 64], sizes = [8, 32], strides = [1, 1]} : vector<8x128xf32> to vector<8x32xf32>
    %626 = math.tanh %625 : vector<8x32xf32>
    %627 = vector.extract_strided_slice %624 {offsets = [0, 32], sizes = [8, 32], strides = [1, 1]} : vector<8x128xf32> to vector<8x32xf32>
    %628 = arith.mulf %627, %582 : vector<8x32xf32>
    %629 = vector.extract_strided_slice %624 {offsets = [0, 0], sizes = [8, 32], strides = [1, 1]} : vector<8x128xf32> to vector<8x32xf32>
    %630 = arith.mulf %629, %626 : vector<8x32xf32>
    %631 = arith.addf %628, %630 : vector<8x32xf32>
    %632 = vector.extract_strided_slice %624 {offsets = [0, 96], sizes = [8, 32], strides = [1, 1]} : vector<8x128xf32> to vector<8x32xf32>
    %633 = math.tanh %631 : vector<8x32xf32>
    %634 = arith.mulf %632, %633 : vector<8x32xf32>
    %635 = arith.index_cast %592 : i32 to index
    %c32_179 = arith.constant 32 : index
    %636 = vector.load %arg8[%635, %c32_179] : memref<64x64xf32, #tpu.memory_space<vmem>>, vector<8x32xf32>
    tpu.vector_store %arg8[%635, %c32_179], %634 {strides = array<i32>} : memref<64x64xf32, #tpu.memory_space<vmem>>, vector<8x32xf32>,
    %c4_i32_180 = arith.constant 4 : i32
    %c8_i32_181 = arith.constant 8 : i32
    %637 = arith.muli %c4_i32_180, %c8_i32_181 : i32
    %638 = tpu.assume_multiple %637, 8 : i32
    %c7_i32_182 = arith.constant 7 : i32
    %639 = arith.subi %c7_i32_182, %c4_i32_180 : i32
    %c8_i32_183 = arith.constant 8 : i32
    %640 = arith.muli %639, %c8_i32_183 : i32
    %641 = tpu.assume_multiple %640, 8 : i32
    %642 = tpu.concatenate %617, %634 in 1 : vector<8x32xf32>, vector<8x32xf32> -> vector<8x64xf32>
    %cst_184 = arith.constant dense<0.000000e+00> : vector<8x256xf32>
    %643 = tpu.matmul %642, %432, %cst_184 {dimension_numbers = #tpu.dot_dimension_numbers<[1], [0], [0], [1], [0, 0, 1, 1], [], []>} : vector<8x64xf32>, vector<64x256xf32>, vector<8x256xf32> -> vector<8x256xf32>
    %644 = arith.index_cast %638 : i32 to index
    %c0_185 = arith.constant 0 : index
    %645 = vector.load %arg12[%644, %c0_185] : memref<64x256xf32, #tpu.memory_space<vmem>>, vector<8x128xf32>
    %646 = vector.extract_strided_slice %643 {offsets = [0, 0], sizes = [8, 128], strides = [1, 1]} : vector<8x256xf32> to vector<8x128xf32>
    %647 = arith.addf %645, %646 : vector<8x128xf32>
    %648 = arith.index_cast %641 : i32 to index
    %c128_186 = arith.constant 128 : index
    %649 = vector.load %arg12[%648, %c128_186] : memref<64x256xf32, #tpu.memory_space<vmem>>, vector<8x128xf32>
    %650 = vector.extract_strided_slice %643 {offsets = [0, 128], sizes = [8, 128], strides = [1, 1]} : vector<8x256xf32> to vector<8x128xf32>
    %651 = arith.addf %649, %650 : vector<8x128xf32>
    %652 = arith.negf %647 : vector<8x128xf32>
    %653 = math.exp %652 : vector<8x128xf32>
    %cst_187 = arith.constant 1.000000e+00 : f32
    %654 = vector.broadcast %cst_187 : f32 to vector<8x128xf32>
    %655 = arith.addf %654, %653 : vector<8x128xf32>
    %656 = arith.divf %654, %655 : vector<8x128xf32>
    %657 = vector.extract_strided_slice %647 {offsets = [0, 64], sizes = [8, 32], strides = [1, 1]} : vector<8x128xf32> to vector<8x32xf32>
    %658 = math.tanh %657 : vector<8x32xf32>
    %659 = vector.extract_strided_slice %656 {offsets = [0, 32], sizes = [8, 32], strides = [1, 1]} : vector<8x128xf32> to vector<8x32xf32>
    %660 = arith.mulf %659, %614 : vector<8x32xf32>
    %661 = vector.extract_strided_slice %656 {offsets = [0, 0], sizes = [8, 32], strides = [1, 1]} : vector<8x128xf32> to vector<8x32xf32>
    %662 = arith.mulf %661, %658 : vector<8x32xf32>
    %663 = arith.addf %660, %662 : vector<8x32xf32>
    %664 = vector.extract_strided_slice %656 {offsets = [0, 96], sizes = [8, 32], strides = [1, 1]} : vector<8x128xf32> to vector<8x32xf32>
    %665 = math.tanh %663 : vector<8x32xf32>
    %666 = arith.mulf %664, %665 : vector<8x32xf32>
    %667 = arith.index_cast %638 : i32 to index
    %c0_188 = arith.constant 0 : index
    %668 = vector.load %arg8[%667, %c0_188] : memref<64x64xf32, #tpu.memory_space<vmem>>, vector<8x32xf32>
    tpu.vector_store %arg8[%667, %c0_188], %666 {strides = array<i32>} : memref<64x64xf32, #tpu.memory_space<vmem>>, vector<8x32xf32>,
    %669 = arith.negf %651 : vector<8x128xf32>
    %670 = math.exp %669 : vector<8x128xf32>
    %cst_189 = arith.constant 1.000000e+00 : f32
    %671 = vector.broadcast %cst_189 : f32 to vector<8x128xf32>
    %672 = arith.addf %671, %670 : vector<8x128xf32>
    %673 = arith.divf %671, %672 : vector<8x128xf32>
    %674 = vector.extract_strided_slice %651 {offsets = [0, 64], sizes = [8, 32], strides = [1, 1]} : vector<8x128xf32> to vector<8x32xf32>
    %675 = math.tanh %674 : vector<8x32xf32>
    %676 = vector.extract_strided_slice %673 {offsets = [0, 32], sizes = [8, 32], strides = [1, 1]} : vector<8x128xf32> to vector<8x32xf32>
    %677 = arith.mulf %676, %631 : vector<8x32xf32>
    %678 = vector.extract_strided_slice %673 {offsets = [0, 0], sizes = [8, 32], strides = [1, 1]} : vector<8x128xf32> to vector<8x32xf32>
    %679 = arith.mulf %678, %675 : vector<8x32xf32>
    %680 = arith.addf %677, %679 : vector<8x32xf32>
    %681 = vector.extract_strided_slice %673 {offsets = [0, 96], sizes = [8, 32], strides = [1, 1]} : vector<8x128xf32> to vector<8x32xf32>
    %682 = math.tanh %680 : vector<8x32xf32>
    %683 = arith.mulf %681, %682 : vector<8x32xf32>
    %684 = arith.index_cast %641 : i32 to index
    %c32_190 = arith.constant 32 : index
    %685 = vector.load %arg8[%684, %c32_190] : memref<64x64xf32, #tpu.memory_space<vmem>>, vector<8x32xf32>
    tpu.vector_store %arg8[%684, %c32_190], %683 {strides = array<i32>} : memref<64x64xf32, #tpu.memory_space<vmem>>, vector<8x32xf32>,
    %c5_i32_191 = arith.constant 5 : i32
    %c8_i32_192 = arith.constant 8 : i32
    %686 = arith.muli %c5_i32_191, %c8_i32_192 : i32
    %687 = tpu.assume_multiple %686, 8 : i32
    %c7_i32_193 = arith.constant 7 : i32
    %688 = arith.subi %c7_i32_193, %c5_i32_191 : i32
    %c8_i32_194 = arith.constant 8 : i32
    %689 = arith.muli %688, %c8_i32_194 : i32
    %690 = tpu.assume_multiple %689, 8 : i32
    %691 = tpu.concatenate %666, %683 in 1 : vector<8x32xf32>, vector<8x32xf32> -> vector<8x64xf32>
    %cst_195 = arith.constant dense<0.000000e+00> : vector<8x256xf32>
    %692 = tpu.matmul %691, %432, %cst_195 {dimension_numbers = #tpu.dot_dimension_numbers<[1], [0], [0], [1], [0, 0, 1, 1], [], []>} : vector<8x64xf32>, vector<64x256xf32>, vector<8x256xf32> -> vector<8x256xf32>
    %693 = arith.index_cast %687 : i32 to index
    %c0_196 = arith.constant 0 : index
    %694 = vector.load %arg12[%693, %c0_196] : memref<64x256xf32, #tpu.memory_space<vmem>>, vector<8x128xf32>
    %695 = vector.extract_strided_slice %692 {offsets = [0, 0], sizes = [8, 128], strides = [1, 1]} : vector<8x256xf32> to vector<8x128xf32>
    %696 = arith.addf %694, %695 : vector<8x128xf32>
    %697 = arith.index_cast %690 : i32 to index
    %c128_197 = arith.constant 128 : index
    %698 = vector.load %arg12[%697, %c128_197] : memref<64x256xf32, #tpu.memory_space<vmem>>, vector<8x128xf32>
    %699 = vector.extract_strided_slice %692 {offsets = [0, 128], sizes = [8, 128], strides = [1, 1]} : vector<8x256xf32> to vector<8x128xf32>
    %700 = arith.addf %698, %699 : vector<8x128xf32>
    %701 = arith.negf %696 : vector<8x128xf32>
    %702 = math.exp %701 : vector<8x128xf32>
    %cst_198 = arith.constant 1.000000e+00 : f32
    %703 = vector.broadcast %cst_198 : f32 to vector<8x128xf32>
    %704 = arith.addf %703, %702 : vector<8x128xf32>
    %705 = arith.divf %703, %704 : vector<8x128xf32>
    %706 = vector.extract_strided_slice %696 {offsets = [0, 64], sizes = [8, 32], strides = [1, 1]} : vector<8x128xf32> to vector<8x32xf32>
    %707 = math.tanh %706 : vector<8x32xf32>
    %708 = vector.extract_strided_slice %705 {offsets = [0, 32], sizes = [8, 32], strides = [1, 1]} : vector<8x128xf32> to vector<8x32xf32>
    %709 = arith.mulf %708, %663 : vector<8x32xf32>
    %710 = vector.extract_strided_slice %705 {offsets = [0, 0], sizes = [8, 32], strides = [1, 1]} : vector<8x128xf32> to vector<8x32xf32>
    %711 = arith.mulf %710, %707 : vector<8x32xf32>
    %712 = arith.addf %709, %711 : vector<8x32xf32>
    %713 = vector.extract_strided_slice %705 {offsets = [0, 96], sizes = [8, 32], strides = [1, 1]} : vector<8x128xf32> to vector<8x32xf32>
    %714 = math.tanh %712 : vector<8x32xf32>
    %715 = arith.mulf %713, %714 : vector<8x32xf32>
    %716 = arith.index_cast %687 : i32 to index
    %c0_199 = arith.constant 0 : index
    %717 = vector.load %arg8[%716, %c0_199] : memref<64x64xf32, #tpu.memory_space<vmem>>, vector<8x32xf32>
    tpu.vector_store %arg8[%716, %c0_199], %715 {strides = array<i32>} : memref<64x64xf32, #tpu.memory_space<vmem>>, vector<8x32xf32>,
    %718 = arith.negf %700 : vector<8x128xf32>
    %719 = math.exp %718 : vector<8x128xf32>
    %cst_200 = arith.constant 1.000000e+00 : f32
    %720 = vector.broadcast %cst_200 : f32 to vector<8x128xf32>
    %721 = arith.addf %720, %719 : vector<8x128xf32>
    %722 = arith.divf %720, %721 : vector<8x128xf32>
    %723 = vector.extract_strided_slice %700 {offsets = [0, 64], sizes = [8, 32], strides = [1, 1]} : vector<8x128xf32> to vector<8x32xf32>
    %724 = math.tanh %723 : vector<8x32xf32>
    %725 = vector.extract_strided_slice %722 {offsets = [0, 32], sizes = [8, 32], strides = [1, 1]} : vector<8x128xf32> to vector<8x32xf32>
    %726 = arith.mulf %725, %680 : vector<8x32xf32>
    %727 = vector.extract_strided_slice %722 {offsets = [0, 0], sizes = [8, 32], strides = [1, 1]} : vector<8x128xf32> to vector<8x32xf32>
    %728 = arith.mulf %727, %724 : vector<8x32xf32>
    %729 = arith.addf %726, %728 : vector<8x32xf32>
    %730 = vector.extract_strided_slice %722 {offsets = [0, 96], sizes = [8, 32], strides = [1, 1]} : vector<8x128xf32> to vector<8x32xf32>
    %731 = math.tanh %729 : vector<8x32xf32>
    %732 = arith.mulf %730, %731 : vector<8x32xf32>
    %733 = arith.index_cast %690 : i32 to index
    %c32_201 = arith.constant 32 : index
    %734 = vector.load %arg8[%733, %c32_201] : memref<64x64xf32, #tpu.memory_space<vmem>>, vector<8x32xf32>
    tpu.vector_store %arg8[%733, %c32_201], %732 {strides = array<i32>} : memref<64x64xf32, #tpu.memory_space<vmem>>, vector<8x32xf32>,
    %c6_i32_202 = arith.constant 6 : i32
    %c8_i32_203 = arith.constant 8 : i32
    %735 = arith.muli %c6_i32_202, %c8_i32_203 : i32
    %736 = tpu.assume_multiple %735, 8 : i32
    %c7_i32_204 = arith.constant 7 : i32
    %737 = arith.subi %c7_i32_204, %c6_i32_202 : i32
    %c8_i32_205 = arith.constant 8 : i32
    %738 = arith.muli %737, %c8_i32_205 : i32
    %739 = tpu.assume_multiple %738, 8 : i32
    %740 = tpu.concatenate %715, %732 in 1 : vector<8x32xf32>, vector<8x32xf32> -> vector<8x64xf32>
    %cst_206 = arith.constant dense<0.000000e+00> : vector<8x256xf32>
    %741 = tpu.matmul %740, %432, %cst_206 {dimension_numbers = #tpu.dot_dimension_numbers<[1], [0], [0], [1], [0, 0, 1, 1], [], []>} : vector<8x64xf32>, vector<64x256xf32>, vector<8x256xf32> -> vector<8x256xf32>
    %742 = arith.index_cast %736 : i32 to index
    %c0_207 = arith.constant 0 : index
    %743 = vector.load %arg12[%742, %c0_207] : memref<64x256xf32, #tpu.memory_space<vmem>>, vector<8x128xf32>
    %744 = vector.extract_strided_slice %741 {offsets = [0, 0], sizes = [8, 128], strides = [1, 1]} : vector<8x256xf32> to vector<8x128xf32>
    %745 = arith.addf %743, %744 : vector<8x128xf32>
    %746 = arith.index_cast %739 : i32 to index
    %c128_208 = arith.constant 128 : index
    %747 = vector.load %arg12[%746, %c128_208] : memref<64x256xf32, #tpu.memory_space<vmem>>, vector<8x128xf32>
    %748 = vector.extract_strided_slice %741 {offsets = [0, 128], sizes = [8, 128], strides = [1, 1]} : vector<8x256xf32> to vector<8x128xf32>
    %749 = arith.addf %747, %748 : vector<8x128xf32>
    %750 = arith.negf %745 : vector<8x128xf32>
    %751 = math.exp %750 : vector<8x128xf32>
    %cst_209 = arith.constant 1.000000e+00 : f32
    %752 = vector.broadcast %cst_209 : f32 to vector<8x128xf32>
    %753 = arith.addf %752, %751 : vector<8x128xf32>
    %754 = arith.divf %752, %753 : vector<8x128xf32>
    %755 = vector.extract_strided_slice %745 {offsets = [0, 64], sizes = [8, 32], strides = [1, 1]} : vector<8x128xf32> to vector<8x32xf32>
    %756 = math.tanh %755 : vector<8x32xf32>
    %757 = vector.extract_strided_slice %754 {offsets = [0, 32], sizes = [8, 32], strides = [1, 1]} : vector<8x128xf32> to vector<8x32xf32>
    %758 = arith.mulf %757, %712 : vector<8x32xf32>
    %759 = vector.extract_strided_slice %754 {offsets = [0, 0], sizes = [8, 32], strides = [1, 1]} : vector<8x128xf32> to vector<8x32xf32>
    %760 = arith.mulf %759, %756 : vector<8x32xf32>
    %761 = arith.addf %758, %760 : vector<8x32xf32>
    %762 = vector.extract_strided_slice %754 {offsets = [0, 96], sizes = [8, 32], strides = [1, 1]} : vector<8x128xf32> to vector<8x32xf32>
    %763 = math.tanh %761 : vector<8x32xf32>
    %764 = arith.mulf %762, %763 : vector<8x32xf32>
    %765 = arith.index_cast %736 : i32 to index
    %c0_210 = arith.constant 0 : index
    %766 = vector.load %arg8[%765, %c0_210] : memref<64x64xf32, #tpu.memory_space<vmem>>, vector<8x32xf32>
    tpu.vector_store %arg8[%765, %c0_210], %764 {strides = array<i32>} : memref<64x64xf32, #tpu.memory_space<vmem>>, vector<8x32xf32>,
    %767 = arith.negf %749 : vector<8x128xf32>
    %768 = math.exp %767 : vector<8x128xf32>
    %cst_211 = arith.constant 1.000000e+00 : f32
    %769 = vector.broadcast %cst_211 : f32 to vector<8x128xf32>
    %770 = arith.addf %769, %768 : vector<8x128xf32>
    %771 = arith.divf %769, %770 : vector<8x128xf32>
    %772 = vector.extract_strided_slice %749 {offsets = [0, 64], sizes = [8, 32], strides = [1, 1]} : vector<8x128xf32> to vector<8x32xf32>
    %773 = math.tanh %772 : vector<8x32xf32>
    %774 = vector.extract_strided_slice %771 {offsets = [0, 32], sizes = [8, 32], strides = [1, 1]} : vector<8x128xf32> to vector<8x32xf32>
    %775 = arith.mulf %774, %729 : vector<8x32xf32>
    %776 = vector.extract_strided_slice %771 {offsets = [0, 0], sizes = [8, 32], strides = [1, 1]} : vector<8x128xf32> to vector<8x32xf32>
    %777 = arith.mulf %776, %773 : vector<8x32xf32>
    %778 = arith.addf %775, %777 : vector<8x32xf32>
    %779 = vector.extract_strided_slice %771 {offsets = [0, 96], sizes = [8, 32], strides = [1, 1]} : vector<8x128xf32> to vector<8x32xf32>
    %780 = math.tanh %778 : vector<8x32xf32>
    %781 = arith.mulf %779, %780 : vector<8x32xf32>
    %782 = arith.index_cast %739 : i32 to index
    %c32_212 = arith.constant 32 : index
    %783 = vector.load %arg8[%782, %c32_212] : memref<64x64xf32, #tpu.memory_space<vmem>>, vector<8x32xf32>
    tpu.vector_store %arg8[%782, %c32_212], %781 {strides = array<i32>} : memref<64x64xf32, #tpu.memory_space<vmem>>, vector<8x32xf32>,
    %c7_i32_213 = arith.constant 7 : i32
    %c8_i32_214 = arith.constant 8 : i32
    %784 = arith.muli %c7_i32_213, %c8_i32_214 : i32
    %785 = tpu.assume_multiple %784, 8 : i32
    %c7_i32_215 = arith.constant 7 : i32
    %786 = arith.subi %c7_i32_215, %c7_i32_213 : i32
    %c8_i32_216 = arith.constant 8 : i32
    %787 = arith.muli %786, %c8_i32_216 : i32
    %788 = tpu.assume_multiple %787, 8 : i32
    %789 = tpu.concatenate %764, %781 in 1 : vector<8x32xf32>, vector<8x32xf32> -> vector<8x64xf32>
    %cst_217 = arith.constant dense<0.000000e+00> : vector<8x256xf32>
    %790 = tpu.matmul %789, %432, %cst_217 {dimension_numbers = #tpu.dot_dimension_numbers<[1], [0], [0], [1], [0, 0, 1, 1], [], []>} : vector<8x64xf32>, vector<64x256xf32>, vector<8x256xf32> -> vector<8x256xf32>
    %791 = arith.index_cast %785 : i32 to index
    %c0_218 = arith.constant 0 : index
    %792 = vector.load %arg12[%791, %c0_218] : memref<64x256xf32, #tpu.memory_space<vmem>>, vector<8x128xf32>
    %793 = vector.extract_strided_slice %790 {offsets = [0, 0], sizes = [8, 128], strides = [1, 1]} : vector<8x256xf32> to vector<8x128xf32>
    %794 = arith.addf %792, %793 : vector<8x128xf32>
    %795 = arith.index_cast %788 : i32 to index
    %c128_219 = arith.constant 128 : index
    %796 = vector.load %arg12[%795, %c128_219] : memref<64x256xf32, #tpu.memory_space<vmem>>, vector<8x128xf32>
    %797 = vector.extract_strided_slice %790 {offsets = [0, 128], sizes = [8, 128], strides = [1, 1]} : vector<8x256xf32> to vector<8x128xf32>
    %798 = arith.addf %796, %797 : vector<8x128xf32>
    %799 = arith.negf %794 : vector<8x128xf32>
    %800 = math.exp %799 : vector<8x128xf32>
    %cst_220 = arith.constant 1.000000e+00 : f32
    %801 = vector.broadcast %cst_220 : f32 to vector<8x128xf32>
    %802 = arith.addf %801, %800 : vector<8x128xf32>
    %803 = arith.divf %801, %802 : vector<8x128xf32>
    %804 = vector.extract_strided_slice %794 {offsets = [0, 64], sizes = [8, 32], strides = [1, 1]} : vector<8x128xf32> to vector<8x32xf32>
    %805 = math.tanh %804 : vector<8x32xf32>
    %806 = vector.extract_strided_slice %803 {offsets = [0, 32], sizes = [8, 32], strides = [1, 1]} : vector<8x128xf32> to vector<8x32xf32>
    %807 = arith.mulf %806, %761 : vector<8x32xf32>
    %808 = vector.extract_strided_slice %803 {offsets = [0, 0], sizes = [8, 32], strides = [1, 1]} : vector<8x128xf32> to vector<8x32xf32>
    %809 = arith.mulf %808, %805 : vector<8x32xf32>
    %810 = arith.addf %807, %809 : vector<8x32xf32>
    %811 = vector.extract_strided_slice %803 {offsets = [0, 96], sizes = [8, 32], strides = [1, 1]} : vector<8x128xf32> to vector<8x32xf32>
    %812 = math.tanh %810 : vector<8x32xf32>
    %813 = arith.mulf %811, %812 : vector<8x32xf32>
    %814 = arith.index_cast %785 : i32 to index
    %c0_221 = arith.constant 0 : index
    %815 = vector.load %arg8[%814, %c0_221] : memref<64x64xf32, #tpu.memory_space<vmem>>, vector<8x32xf32>
    tpu.vector_store %arg8[%814, %c0_221], %813 {strides = array<i32>} : memref<64x64xf32, #tpu.memory_space<vmem>>, vector<8x32xf32>,
    %816 = arith.negf %798 : vector<8x128xf32>
    %817 = math.exp %816 : vector<8x128xf32>
    %cst_222 = arith.constant 1.000000e+00 : f32
    %818 = vector.broadcast %cst_222 : f32 to vector<8x128xf32>
    %819 = arith.addf %818, %817 : vector<8x128xf32>
    %820 = arith.divf %818, %819 : vector<8x128xf32>
    %821 = vector.extract_strided_slice %798 {offsets = [0, 64], sizes = [8, 32], strides = [1, 1]} : vector<8x128xf32> to vector<8x32xf32>
    %822 = math.tanh %821 : vector<8x32xf32>
    %823 = vector.extract_strided_slice %820 {offsets = [0, 32], sizes = [8, 32], strides = [1, 1]} : vector<8x128xf32> to vector<8x32xf32>
    %824 = arith.mulf %823, %778 : vector<8x32xf32>
    %825 = vector.extract_strided_slice %820 {offsets = [0, 0], sizes = [8, 32], strides = [1, 1]} : vector<8x128xf32> to vector<8x32xf32>
    %826 = arith.mulf %825, %822 : vector<8x32xf32>
    %827 = arith.addf %824, %826 : vector<8x32xf32>
    %828 = vector.extract_strided_slice %820 {offsets = [0, 96], sizes = [8, 32], strides = [1, 1]} : vector<8x128xf32> to vector<8x32xf32>
    %829 = math.tanh %827 : vector<8x32xf32>
    %830 = arith.mulf %828, %829 : vector<8x32xf32>
    %831 = arith.index_cast %788 : i32 to index
    %c32_223 = arith.constant 32 : index
    %832 = vector.load %arg8[%831, %c32_223] : memref<64x64xf32, #tpu.memory_space<vmem>>, vector<8x32xf32>
    tpu.vector_store %arg8[%831, %c32_223], %830 {strides = array<i32>} : memref<64x64xf32, #tpu.memory_space<vmem>>, vector<8x32xf32>,
    %c8_i32_224 = arith.constant 8 : i32
    %c2_225 = arith.constant 2 : index
    %c0_226 = arith.constant 0 : index
    %c0_227 = arith.constant 0 : index
    %833 = vector.load %arg9[%c2_225, %c0_226, %c0_227] : memref<4x8x32xf32, #tpu.memory_space<vmem>>, vector<1x8x32xf32>
    %834 = vector.shape_cast %833 : vector<1x8x32xf32> to vector<8x32xf32>
    %835 = vector.shape_cast %813 : vector<8x32xf32> to vector<1x8x32xf32>
    tpu.vector_store %arg9[%c2_225, %c0_226, %c0_227], %835 {strides = array<i32>} : memref<4x8x32xf32, #tpu.memory_space<vmem>>, vector<1x8x32xf32>,
    %c2_228 = arith.constant 2 : index
    %c0_229 = arith.constant 0 : index
    %c0_230 = arith.constant 0 : index
    %836 = vector.load %arg10[%c2_228, %c0_229, %c0_230] : memref<4x8x32xf32, #tpu.memory_space<vmem>>, vector<1x8x32xf32>
    %837 = vector.shape_cast %836 : vector<1x8x32xf32> to vector<8x32xf32>
    %838 = vector.shape_cast %810 : vector<8x32xf32> to vector<1x8x32xf32>
    tpu.vector_store %arg10[%c2_228, %c0_229, %c0_230], %838 {strides = array<i32>} : memref<4x8x32xf32, #tpu.memory_space<vmem>>, vector<1x8x32xf32>,
    %c3_231 = arith.constant 3 : index
    %c0_232 = arith.constant 0 : index
    %c0_233 = arith.constant 0 : index
    %839 = vector.load %arg9[%c3_231, %c0_232, %c0_233] : memref<4x8x32xf32, #tpu.memory_space<vmem>>, vector<1x8x32xf32>
    %840 = vector.shape_cast %839 : vector<1x8x32xf32> to vector<8x32xf32>
    %841 = vector.shape_cast %830 : vector<8x32xf32> to vector<1x8x32xf32>
    tpu.vector_store %arg9[%c3_231, %c0_232, %c0_233], %841 {strides = array<i32>} : memref<4x8x32xf32, #tpu.memory_space<vmem>>, vector<1x8x32xf32>,
    %c3_234 = arith.constant 3 : index
    %c0_235 = arith.constant 0 : index
    %c0_236 = arith.constant 0 : index
    %842 = vector.load %arg10[%c3_234, %c0_235, %c0_236] : memref<4x8x32xf32, #tpu.memory_space<vmem>>, vector<1x8x32xf32>
    %843 = vector.shape_cast %842 : vector<1x8x32xf32> to vector<8x32xf32>
    %844 = vector.shape_cast %827 : vector<8x32xf32> to vector<1x8x32xf32>
    tpu.vector_store %arg10[%c3_234, %c0_235, %c0_236], %844 {strides = array<i32>} : memref<4x8x32xf32, #tpu.memory_space<vmem>>, vector<1x8x32xf32>,
    return
  }
  func.func @transform_0(%arg0: i32) -> (i32, i32) {
    %c0_i32 = arith.constant 0 : i32
    %c0_i32_0 = arith.constant 0 : i32
    %c0_i32_1 = arith.constant 0 : i32
    return %c0_i32, %c0_i32_0 : i32, i32
  }
  func.func @transform_1(%arg0: i32) -> (i32, i32) {
    %c0_i32 = arith.constant 0 : i32
    %c0_i32_0 = arith.constant 0 : i32
    %c0_i32_1 = arith.constant 0 : i32
    return %c0_i32, %c0_i32_0 : i32, i32
  }
  func.func @transform_2(%arg0: i32) -> (i32, i32, i32) {
    %c0_i32 = arith.constant 0 : i32
    %c0_i32_0 = arith.constant 0 : i32
    %c0_i32_1 = arith.constant 0 : i32
    %c0_i32_2 = arith.constant 0 : i32
    return %c0_i32, %c0_i32_0, %c0_i32_1 : i32, i32, i32
  }
  func.func @transform_3(%arg0: i32) -> (i32, i32, i32) {
    %c0_i32 = arith.constant 0 : i32
    %c0_i32_0 = arith.constant 0 : i32
    %c0_i32_1 = arith.constant 0 : i32
    %c0_i32_2 = arith.constant 0 : i32
    return %c0_i32, %c0_i32_0, %c0_i32_1 : i32, i32, i32
  }
  func.func @transform_4(%arg0: i32) -> (i32, i32, i32) {
    %c0_i32 = arith.constant 0 : i32
    %c0_i32_0 = arith.constant 0 : i32
    %c0_i32_1 = arith.constant 0 : i32
    %c0_i32_2 = arith.constant 0 : i32
    return %c0_i32, %c0_i32_0, %c0_i32_1 : i32, i32, i32
  }
  func.func @transform_5(%arg0: i32) -> (i32, i32, i32) {
    %c0_i32 = arith.constant 0 : i32
    %c0_i32_0 = arith.constant 0 : i32
    %c0_i32_1 = arith.constant 0 : i32
    %c0_i32_2 = arith.constant 0 : i32
    return %c0_i32, %c0_i32_0, %c0_i32_1 : i32, i32, i32
  }
  func.func @transform_6(%arg0: i32) -> (i32, i32, i32) {
    %c0_i32 = arith.constant 0 : i32
    %c0_i32_0 = arith.constant 0 : i32
    %c0_i32_1 = arith.constant 0 : i32
    %c0_i32_2 = arith.constant 0 : i32
    return %c0_i32, %c0_i32_0, %c0_i32_1 : i32, i32, i32
  }
  func.func @transform_7(%arg0: i32) -> (i32, i32) {
    %c0_i32 = arith.constant 0 : i32
    %c0_i32_0 = arith.constant 0 : i32
    %c0_i32_1 = arith.constant 0 : i32
    return %c0_i32, %c0_i32_0 : i32, i32
  }
  func.func @transform_8(%arg0: i32) -> (i32, i32, i32) {
    %c0_i32 = arith.constant 0 : i32
    %c0_i32_0 = arith.constant 0 : i32
    %c0_i32_1 = arith.constant 0 : i32
    %c0_i32_2 = arith.constant 0 : i32
    return %c0_i32, %c0_i32_0, %c0_i32_1 : i32, i32, i32
  }
  func.func @transform_9(%arg0: i32) -> (i32, i32, i32) {
    %c0_i32 = arith.constant 0 : i32
    %c0_i32_0 = arith.constant 0 : i32
    %c0_i32_1 = arith.constant 0 : i32
    %c0_i32_2 = arith.constant 0 : i32
    return %c0_i32, %c0_i32_0, %c0_i32_1 : i32, i32, i32
  }
}

</mosaic_0001>

<bundles_post_ra>
// kernel: tpu_custom_call.1
= control target key start
LH: loop header
LB: loop body
LE: loop exit
PB: predicated region body
PF: predicated region fallthrough
CT: control target
= control target key end

     0   :  { %15 = vsyncpa [#allocation5], 0  ;;  %s4352_s0 = inlined_call_operand.hbm [shape: f32[64,64], index: 0, kind: input, shape index: {}]   ;;  %s4353_s1 = inlined_call_operand.hbm [shape: f32[64,256], index: 1, kind: input, shape index: {}]   ;;  %s4354_s2 = inlined_call_operand.hbm [shape: f32[1,64,256], index: 2, kind: input, shape index: {}]   ;;  %s4355_s3 = inlined_call_operand.hbm [shape: f32[2,64,256], index: 3, kind: input, shape index: {}]   ;;  %s4356_s4 = inlined_call_operand.hbm [shape: f32[2,1,256], index: 4, kind: input, shape index: {}]   ;;  %s4357_s5 = inlined_call_operand.hbm [shape: f32[4,8,32], index: 5, kind: input, shape index: {}]   ;;  %s4358_s6 = inlined_call_operand.hbm [shape: f32[4,8,32], index: 6, kind: input, shape index: {}]   ;;  %s4359_s7 = inlined_call_operand.hbm [shape: f32[64,64], index: 7, kind: output, shape index: {0}]   ;;  %s4360_s8 = inlined_call_operand.hbm [shape: f32[4,8,32], index: 8, kind: output, shape index: {1}]   ;;  %s4361_s9 = inlined_call_operand.hbm [shape: f32[4,8,32], index: 9, kind: output, shape index: {2}]  }
   0x1   :  { %16 = vsyncpa [#allocation8], 0 }
   0x2   :  { %17 = vsyncpa [#allocation11], 0 }
   0x3   :  { %18 = vsyncpa [#allocation14], 0 }
   0x4   :  { %19 = vsyncpa [#allocation6], 0  ;;  %s38_s11 = sshll.u32 %s4353_s1, 4  ;;  %s39_s11 = int_to_ptr.hbm [resolvable:$true] %s38_s11 }
   0x5   :  { %20 = vsyncpa [#allocation18], 0  ;;  %s3391_s12 = smov [#allocation7]   ;;  %s64_s16 = sshll.u32 %s4355_s3, 4  ;;  %s65_s16 = int_to_ptr.hbm [resolvable:$true] %s64_s16 }
   0x6   :  { %s40_s13 = sshll.u32 %s3391_s12, 4  ;;  %s3392_s17 = smov 256   ;;  %s41_s13 = int_to_ptr.vmem [resolvable:$true] %s40_s13 }
   0x7   :  { %s3393_s18 = smov 16   ;;  %s3394_s19 = smov [#allocation10]  }
   0x8   :  { %46 = dma.hbm_to_vmem [thread:$0]  %s39_s11, 2048, %s41_s13, [#allocation8], %s3392_s17, %s3392_s17, %s3393_s18  }
   0x9   :  { %s66_s20 = sshll.u32 %s3394_s19, 4  ;;  %s90_s22 = sshll.u32 %s4357_s5, 4  ;;  %s67_s20 = int_to_ptr.vmem [resolvable:$true] %s66_s20  ;;  %s91_s22 = int_to_ptr.hbm [resolvable:$true] %s90_s22 }
   0xa   :  { %72 = dma.hbm_to_vmem [thread:$0]  %s65_s16, 4096, %s67_s20, [#allocation11], %s3392_s17, %s3392_s17, %s3393_s18  }
   0xb   :  { %s3395_s3 = smov [#allocation13]   ;;  %s25_s26 = sshll.u32 %s4352_s0, 4  ;;  %s26_s26 = int_to_ptr.hbm [resolvable:$true] %s25_s26 }
   0xc   :  { %s92_s23 = sshll.u32 %s3395_s3, 4  ;;  %s3396_s27 = smov 128   ;;  %s93_s23 = int_to_ptr.vmem [resolvable:$true] %s92_s23 }
   0xd   :  { %s3397_s28 = smov 8   ;;  %s3398_s29 = smov [#allocation4]  }
   0xe   :  { %98 = dma.hbm_to_vmem [thread:$0]  %s91_s22, 512, %s93_s23, [#allocation14], %s3396_s27, %s3396_s27, %s3397_s28  }
   0xf   :  { %s27_s30 = sshll.u32 %s3398_s29, 4  ;;  %s51_s5 = sshll.u32 %s4354_s2, 4  ;;  %s28_s30 = int_to_ptr.vmem [resolvable:$true] %s27_s30  ;;  %s52_s5 = int_to_ptr.hbm [resolvable:$true] %s51_s5 }
  0x10   :  { %33 = dma.hbm_to_vmem [thread:$0]  %s26_s26, 1024, %s28_s30, [#allocation5], %s3396_s27, %s3396_s27, %s3397_s28  }
  0x11   :  { %s77_s13 = sshll.u32 %s4356_s4, 4  ;;  %s3399_s14 = smov [#allocation9]   ;;  %s78_s13 = int_to_ptr.hbm [resolvable:$true] %s77_s13 }
  0x12   :  { %s53_s15 = sshll.u32 %s3399_s14, 4  ;;  %s3400_s16 = smov [#allocation12]   ;;  %s54_s15 = int_to_ptr.vmem [resolvable:$true] %s53_s15 }
  0x13   :  { %59 = dma.hbm_to_vmem [thread:$0]  %s52_s5, 2048, %s54_s15, [#allocation8], %s3392_s17, %s3392_s17, %s3393_s18  }
  0x14   :  { %s79_s2 = sshll.u32 %s3400_s16, 4  ;;  %s3401_s19 = smov 32   ;;  %s80_s2 = int_to_ptr.vmem [resolvable:$true] %s79_s2 }
  0x15   :  { %s3402_s20 = smov 2   ;;  %s103_s4 = sshll.u32 %s4358_s6, 4  ;;  %s104_s4 = int_to_ptr.hbm [resolvable:$true] %s103_s4 }
  0x16   :  { %85 = dma.hbm_to_vmem [thread:$0]  %s78_s13, 64, %s80_s2, [#allocation11], %s3401_s19, %s3401_s19, %s3402_s20  }
  0x17   :  { %s3403_s22 = smov [#allocation15]  }
  0x18   :  { %s105_s3 = sshll.u32 %s3403_s22, 4  ;;  %s106_s3 = int_to_ptr.vmem [resolvable:$true] %s105_s3 }
  0x19   :  { %111 = dma.hbm_to_vmem [thread:$0]  %s104_s4, 512, %s106_s3, [#allocation14], %s3396_s27, %s3396_s27, %s3397_s28  }
  0x1a   :  { %3379 = dma.done.wait [#allocation5], 1024  }
  0x1b   :  { %3380 = vsyncadd [#allocation5], 4294966272 }
  0x1c   :  { %3381 = dma.done.wait [#allocation8], 4096  }
  0x1d   :  { %3382 = vsyncadd [#allocation8], 4294963200 }
  0x1e   :  { %3383 = dma.done.wait [#allocation11], 4160  }
  0x1f   :  { %3384 = vsyncadd [#allocation11], 4294963136 }
  0x20   :  { %3385 = dma.done.wait [#allocation14], 1024  }
  0x21   :  { %3386 = vsyncadd [#allocation14], 4294966272  ;;  %v312_v0 = vld [vmem:[#allocation13 + $0x8] sm:$0xff]  ;;  %v163_v1 = vld [vmem:[#allocation7 + $0x78] sm:$0xff]  ;;  %vm170_vm0 = vcmask 523264   ;;  %vm319_vm1 = vcmask 261120  }
  0x22   :  { %v161_v2 = vld [vmem:[#allocation7 + $0x68] sm:$0xff]  ;;  %316 = vrot.lane.b32.xlu0 %v312_v0, %s3401_s19  ;;  %244 = vmatpush.msra.mxu1 %v163_v1  ;;  %v159_v3 = vld [vmem:[#allocation7 + $0x58] sm:$0xff]  ;;  %v3501_v9 = vld [vmem:[#allocation4] sm:$0xff]  ;;  %s3404_s6 = smov 64   ;;  %vm466_vm10 = vcmask 523520   ;;  %s3405_s17 = smov 96  }
  0x23   :  { %v157_v4 = vld [vmem:[#allocation7 + $0x48] sm:$0xff]  ;;  %v155_v5 = vld [vmem:[#allocation7 + $0x38] sm:$0xff]  ;;  %v3505_v10 = vld [vmem:[#allocation10 + $0x70] sm:$0xff]  ;;  %s3406_s18 = smov [#allocation16]   ;;  %s2711_s26 = sshll.u32 %s4359_s7, 4  ;;  %s2712_s26 = int_to_ptr.hbm [resolvable:$true] %s2711_s26 }
  0x24   :  { %245 = vmatpush.msra.mxu1 %v161_v2  ;;  %v153_v6 = vld [vmem:[#allocation7 + $0x28] sm:$0xff]  ;;  %v151_v7 = vld [vmem:[#allocation7 + $0x18] sm:$0xff]  ;;  %v3509_v12 = vld [vmem:[#allocation10 + $0x60] sm:$0xff]  ;;  %332 = vmatpush.msra.mxu2 %v3505_v10  ;;  %s2709_s23 = sshll.u32 %s3406_s18, 4  ;;  %s3407_s29 = smov [#allocation17]   ;;  %s2710_s23 = int_to_ptr.vmem [resolvable:$true] %s2709_s23 }
  0x25   :  { %v149_v8 = vld [vmem:[#allocation7 + $0x8] sm:$0xff]  ;;  %v3507_v11 = vld [vmem:[#allocation10 + $0x78] sm:$0xff]  ;;  %v162_v15 = vld [vmem:[#allocation7 + $0x70] sm:$0xff]  ;;  %s2722_s30 = sshll.u32 %s3407_s29, 4  ;;  %s2724_s5 = sshll.u32 %s4360_s8, 4  ;;  %s2723_s30 = int_to_ptr.vmem [resolvable:$true] %s2722_s30  ;;  %s2725_s5 = int_to_ptr.hbm [resolvable:$true] %s2724_s5 }
  0x26   :  { %246 = vmatpush.msra.mxu1 %v159_v3  ;;  %352 = vmatpush.msra.mxu3 %v3507_v11  ;;  %v3513_v13 = vld [vmem:[#allocation10 + $0x68] sm:$0xff]  ;;  %v3523_v16 = vld [vmem:[#allocation10 + $0x50] sm:$0xff]  ;;  %v3525_v17 = vld [vmem:[#allocation10 + $0x58] sm:$0xff]  ;;  %s3408_s7 = smov [#allocation19]   ;;  %s2737_s13 = sshll.u32 %s4361_s9, 4  ;;  %s2738_s13 = int_to_ptr.hbm [resolvable:$true] %s2737_s13 }
  0x27   :  { %333 = vmatpush.msra.mxu2 %v3509_v12  ;;  %v3519_v14 = vld [vmem:[#allocation4 + $0x8] sm:$0xff]  ;;  %203 = vmatpush.msra.mxu0 %v162_v15  ;;  %v160_v18 = vld [vmem:[#allocation7 + $0x60] sm:$0xff]  ;;  %v158_v21 = vld [vmem:[#allocation7 + $0x50] sm:$0xff]  ;;  %s2735_s0 = sshll.u32 %s3408_s7, 4  ;;  %s2736_s0 = int_to_ptr.vmem [resolvable:$true] %s2735_s0 }
  0x28   :  { %247 = vmatpush.msra.mxu1 %v157_v4  ;;  %353 = vmatpush.msra.mxu3 %v3513_v13  ;;  %v3528_v19 = vld [vmem:[#allocation10 + $0x40] sm:$0xff]  ;;  %v3530_v20 = vld [vmem:[#allocation10 + $0x48] sm:$0xff]  ;;  %v3533_v22 = vld [vmem:[#allocation10 + $0x30] sm:$0xff] }
  0x29   :  { %334 = vmatpush.msra.mxu2 %v3523_v16  ;;  %204 = vmatpush.msra.mxu0 %v160_v18  ;;  %v3537_v23 = vld [vmem:[#allocation10 + $0x38] sm:$0xff]  ;;  %v156_v24 = vld [vmem:[#allocation7 + $0x40] sm:$0xff]  ;;  %v3543_v26 = vld [vmem:[#allocation4 + $0x10] sm:$0xff] }
  0x2a   :  { %248 = vmatpush.msra.mxu1 %v155_v5  ;;  %354 = vmatpush.msra.mxu3 %v3525_v17  ;;  %v3540_v25 = vld [vmem:[#allocation10 + $0x20] sm:$0xff]  ;;  %v3546_v27 = vld [vmem:[#allocation10 + $0x28] sm:$0xff]  ;;  %v154_v28 = vld [vmem:[#allocation7 + $0x30] sm:$0xff] }
  0x2b   :  { %335 = vmatpush.msra.mxu2 %v3528_v19  ;;  %205 = vmatpush.msra.mxu0 %v158_v21  ;;  %v3554_v29 = vld [vmem:[#allocation10 + $0x10] sm:$0xff]  ;;  %v3556_v30 = vld [vmem:[#allocation10 + $0x18] sm:$0xff]  ;;  %v3566_v32 = vld [vmem:[#allocation4 + $0x20] sm:$0xff] }
  0x2c   :  { %249 = vmatpush.msra.mxu1 %v153_v6  ;;  %355 = vmatpush.msra.mxu3 %v3530_v20  ;;  %v3562_v31 = vld [vmem:[#allocation4 + $0x18] sm:$0xff]  ;;  %v3570_v33 = vld [vmem:[#allocation4 + $0x28] sm:$0xff]  ;;  %v3574_v34 = vld [vmem:[#allocation4 + $0x30] sm:$0xff] }
  0x2d   :  { %336 = vmatpush.msra.mxu2 %v3533_v22  ;;  %206 = vmatpush.msra.mxu0 %v156_v24  ;;  %v152_v35 = vld [vmem:[#allocation7 + $0x20] sm:$0xff]  ;;  %v3580_v37 = vld [vmem:[#allocation10 + $0x8] sm:$0xff]  ;;  %v150_v38 = vld [vmem:[#allocation7 + $0x10] sm:$0xff] }
  0x2e   :  { %250 = vmatpush.msra.mxu1 %v151_v7  ;;  %356 = vmatpush.msra.mxu3 %v3537_v23  ;;  %v3578_v36 = vld [vmem:[#allocation10] sm:$0xff]  ;;  %v3584_v40 = vld [vmem:[#allocation4 + $0x38] sm:$0xff]  ;;  %v314_v41 = vld [vmem:[#allocation15 + $0x8] sm:$0xff] }
  0x2f   :  { %337 = vmatpush.msra.mxu2 %v3540_v25  ;;  %207 = vmatpush.msra.mxu0 %v154_v28  ;;  %v148_v39 = vld [vmem:[#allocation7] sm:$0xff] }
  0x30   :  { %251 = vmatpush.msra.mxu1 %v149_v8  ;;  %357 = vmatpush.msra.mxu3 %v3546_v27  ;;  %v309_v42 = vld [vmem:[#allocation13] sm:$0xff]  ;;  %v164_v52 = vld [vmem:[#allocation12] sm:$0x3] }
  0x31   :  { %2777 = vmatmul.msk.f32.vlgmr.msra.gmra.mxu1 %vm170_vm0, %v3501_v9  ;;  %338 = vmatpush.msra.mxu2 %v3554_v29  ;;  %v3679_v53 = vperm.slane %v164_v52, 0  ;;  %v3681_v56 = vperm.slane %v164_v52, 1  ;;  %v310_v1 = vld [vmem:[#allocation15] sm:$0xff] }
  0x32   :  { %920 = vmatpush.msrb.mxu1 %v3507_v11  ;;  %358 = vmatpush.msra.mxu3 %v3556_v30 }
  0x33   :  { %208 = vmatpush.msra.mxu0 %v152_v35  ;;  %339 = vmatpush.msra.mxu2 %v3578_v36 }
  0x34   :  { %921 = vmatpush.msrb.mxu1 %v3513_v13  ;;  %359 = vmatpush.msra.mxu3 %v3580_v37 }
  0x35   :  { %480 = vmatpush.msrb.mxu2 %v3505_v10  ;;  %209 = vmatpush.msra.mxu0 %v150_v38 }
  0x36   :  { %922 = vmatpush.msrb.mxu1 %v3525_v17  ;;  %441 = vrot.lane.b32.xlu2 %v314_v41, %s3401_s19 }
  0x37   :  { %500 = vmatpush.msrb.mxu3 %v3507_v11  ;;  %210 = vmatpush.msra.mxu0 %v148_v39 }
  0x38   :  { %923 = vmatpush.msrb.mxu1 %v3530_v20  ;;  %481 = vmatpush.msrb.mxu2 %v3509_v12 }
  0x39   :  { %2778 = vmatmul.msk.f32.gmra.mxu1 %vm170_vm0, %v3519_v14  ;;  %2769 = vmatmul.msk.f32.vlgmr.msra.gmra.mxu0 %vm170_vm0, %v3501_v9 }
  0x3a   :  { %924 = vmatpush.msrb.mxu1 %v3537_v23  ;;  %501 = vmatpush.msrb.mxu3 %v3513_v13 }
  0x3b   :  { %482 = vmatpush.msrb.mxu2 %v3523_v16  ;;  %900 = vmatpush.msrb.mxu0 %v3505_v10 }
  0x3c   :  { %925 = vmatpush.msrb.mxu1 %v3546_v27  ;;  %502 = vmatpush.msrb.mxu3 %v3525_v17 }
  0x3d   :  { %483 = vmatpush.msrb.mxu2 %v3528_v19  ;;  %901 = vmatpush.msrb.mxu0 %v3509_v12 }
  0x3e   :  { %926 = vmatpush.msrb.mxu1 %v3556_v30  ;;  %503 = vmatpush.msrb.mxu3 %v3530_v20 }
  0x3f   :  { %484 = vmatpush.msrb.mxu2 %v3533_v22  ;;  %902 = vmatpush.msrb.mxu0 %v3523_v16 }
  0x40   :  { %927 = vmatpush.msrb.mxu1 %v3580_v37  ;;  %504 = vmatpush.msrb.mxu3 %v3537_v23 }
  0x41   :  { %2779 = vmatmul.msk.f32.gmra.mxu1 %vm170_vm0, %v3543_v26  ;;  %485 = vmatpush.msrb.mxu2 %v3540_v25 }
  0x42   :  { %1184 = vmatpush.msra.mxu1 %v3507_v11  ;;  %903 = vmatpush.msrb.mxu0 %v3528_v19 }
  0x43   :  { %505 = vmatpush.msrb.mxu3 %v3546_v27  ;;  %2770 = vmatmul.msk.f32.gmra.mxu0 %vm170_vm0, %v3519_v14 }
  0x44   :  { %1185 = vmatpush.msra.mxu1 %v3513_v13  ;;  %486 = vmatpush.msrb.mxu2 %v3554_v29 }
  0x45   :  { %904 = vmatpush.msrb.mxu0 %v3533_v22  ;;  %506 = vmatpush.msrb.mxu3 %v3556_v30 }
  0x46   :  { %1186 = vmatpush.msra.mxu1 %v3525_v17  ;;  %487 = vmatpush.msrb.mxu2 %v3578_v36 }
  0x47   :  { %905 = vmatpush.msrb.mxu0 %v3540_v25  ;;  %507 = vmatpush.msrb.mxu3 %v3580_v37 }
  0x48   :  { %1187 = vmatpush.msra.mxu1 %v3530_v20 }
  0x49   :  { %2780 = vmatmul.msk.f32.gmra.mxu1 %vm170_vm0, %v3562_v31  ;;  %906 = vmatpush.msrb.mxu0 %v3554_v29 }
  0x4a   :  { %1188 = vmatpush.msra.mxu1 %v3537_v23 }
  0x4b   :  { %907 = vmatpush.msrb.mxu0 %v3578_v36 }
  0x4c   :  { %2771 = vmatmul.msk.f32.gmra.mxu0 %vm170_vm0, %v3543_v26  ;;  %1189 = vmatpush.msra.mxu1 %v3546_v27 }
  0x4d   :  { %1164 = vmatpush.msra.mxu0 %v3505_v10 }
  0x4e   :  { %1190 = vmatpush.msra.mxu1 %v3556_v30 }
  0x4f   :  { %1165 = vmatpush.msra.mxu0 %v3509_v12 }
  0x50   :  { %1191 = vmatpush.msra.mxu1 %v3580_v37 }
  0x51   :  { %2781 = vmatmul.msk.f32.gmra.mxu1 %vm170_vm0, %v3566_v32  ;;  %1166 = vmatpush.msra.mxu0 %v3523_v16 }
  0x53   :  { %1167 = vmatpush.msra.mxu0 %v3528_v19 }
  0x54   :  { %2772 = vmatmul.msk.f32.gmra.mxu0 %vm170_vm0, %v3562_v31 }
  0x55   :  { %1168 = vmatpush.msra.mxu0 %v3533_v22 }
  0x57   :  { %1169 = vmatpush.msra.mxu0 %v3540_v25 }
  0x59   :  { %2782 = vmatmul.msk.f32.gmra.mxu1 %vm170_vm0, %v3570_v33  ;;  %1170 = vmatpush.msra.mxu0 %v3554_v29 }
  0x5b   :  { %1171 = vmatpush.msra.mxu0 %v3578_v36 }
  0x5c   :  { %2773 = vmatmul.msk.f32.gmra.mxu0 %vm170_vm0, %v3566_v32 }
  0x61   :  { %2783 = vmatmul.msk.f32.gmra.mxu1 %vm170_vm0, %v3574_v34 }
  0x64   :  { %2774 = vmatmul.msk.f32.gmra.mxu0 %vm170_vm0, %v3570_v33 }
  0x69   :  { %2784 = vmatmul.msk.f32.gmra.mxu1 %vm170_vm0, %v3584_v40 }
  0x6c   :  { %2775 = vmatmul.msk.f32.gmra.mxu0 %vm170_vm0, %v3574_v34 }
  0x74   :  { %2776 = vmatmul.msk.f32.gmra.mxu0 %vm170_vm0, %v3584_v40 }
  0x94   :  { %v317_v43 = vpop.permute.xlu0 %316 }
  0x95   :  { %v320_v44 = vsel %vm319_vm1, %v309_v42, %v317_v43 }
  0x96   :  { %2785 = vmatmul.msk.f32.vlgmr.msra.gmra.mxu2 %vm170_vm0, %v320_v44  ;;  %2786 = vmatmul.msk.f32.vlgmr.msra.gmra.mxu3 %vm170_vm0, %v320_v44 }
  0x97   :  { %620 = vmatpush.msra.mxu2 %v3505_v10  ;;  %640 = vmatpush.msra.mxu3 %v3507_v11 }
  0x99   :  { %621 = vmatpush.msra.mxu2 %v3509_v12  ;;  %641 = vmatpush.msra.mxu3 %v3513_v13 }
  0x9b   :  { %622 = vmatpush.msra.mxu2 %v3523_v16  ;;  %642 = vmatpush.msra.mxu3 %v3525_v17 }
  0x9d   :  { %623 = vmatpush.msra.mxu2 %v3528_v19  ;;  %643 = vmatpush.msra.mxu3 %v3530_v20 }
  0x9f   :  { %624 = vmatpush.msra.mxu2 %v3533_v22  ;;  %644 = vmatpush.msra.mxu3 %v3537_v23 }
  0xa1   :  { %625 = vmatpush.msra.mxu2 %v3540_v25  ;;  %645 = vmatpush.msra.mxu3 %v3546_v27 }
  0xa3   :  { %626 = vmatpush.msra.mxu2 %v3554_v29  ;;  %646 = vmatpush.msra.mxu3 %v3556_v30 }
  0xa5   :  { %627 = vmatpush.msra.mxu2 %v3578_v36  ;;  %647 = vmatpush.msra.mxu3 %v3580_v37 }
  0xae   :  { %v3665_v45 = vpop.f32.mrf.mxu1 }
  0xb6   :  { %v3667_v46 = vpop.f32.mrf.mxu1  ;;  %v212_v54 = vpop.f32.mrf.mxu0 }
  0xb7   :  { %v213_v57 = vadd.f32 %v212_v54, %v3679_v53 }
  0xbe   :  { %v3669_v47 = vpop.f32.mrf.mxu1 }
  0xc6   :  { %v3671_v48 = vpop.f32.mrf.mxu1 }
  0xce   :  { %v3673_v49 = vpop.f32.mrf.mxu1 }
  0xd6   :  { %v3675_v50 = vpop.f32.mrf.mxu1 }
  0xde   :  { %v3677_v51 = vpop.f32.mrf.mxu1 }
  0xe6   :  { %v274_v55 = vpop.f32.mrf.mxu1 }
  0xe7   :  { %v275_v58 = vadd.f32 %v274_v55, %v3681_v56 }
 0x119   :  { %v341_v59 = vpop.f32.mrf.mxu2  ;;  %v361_v60 = vpop.f32.mrf.mxu3 }
 0x11a   :  { %v368_v61 = vadd.f32 %v341_v59, %v213_v57  ;;  %v373_v62 = vadd.f32 %v361_v60, %v275_v58  ;;  %v442_v57 = vpop.permute.xlu2 %441 }
 0x11c   :  { %2883 = vtanh.f32 %v368_v61  ;;  %v2787_v2 = vmul.f32 -1.442695, %v368_v61  ;;  %v2788_v3 = vmul.f32 -1.442695, %v373_v62 }
 0x11d   :  { %2885 = vtanh.f32 %v373_v62 }
 0x11e   :  { %2887 = vpow2.f32 %v2787_v2 }
 0x11f   :  { %2889 = vpow2.f32 %v2788_v3 }
 0x122   :  { %v2884_v63 = vpop.eup %2883 }
 0x123   :  { %v2886_v0 = vpop.eup %2885  ;;  %400 = vrot.lane.b32.xlu0 %v2884_v63, %s3404_s6 }
 0x124   :  { %446 = vrot.lane.b32.xlu1 %v2886_v0, %s3404_s6  ;;  %v2888_v4 = vpop.eup %2887 }
 0x125   :  { %v2890_v5 = vpop.eup %2889  ;;  %v377_v6 = vadd.f32 1.0, %v2888_v4 }
 0x126   :  { %v423_v7 = vadd.f32 1.0, %v2890_v5 }
 0x127   :  { %2891 = vrcp.f32 %v377_v6  ;;  %v389_v32 = vand.u32 2147483648, %v377_v6  ;;  %vm383_vm4 = vweird.f32 %v377_v6  ;;  %v387_v34 = vand.u32 2147483647, %v377_v6 }
 0x128   :  { %2893 = vrcp.f32 %v423_v7  ;;  %v435_v33 = vand.u32 2147483648, %v423_v7  ;;  %vm429_vm5 = vweird.f32 %v423_v7  ;;  %v433_v35 = vand.u32 2147483647, %v423_v7 }
 0x129   :  { %v390_v40 = vor.u32 1.1754944e-38, %v389_v32  ;;  %vm388_vm8 = vcmp.eq.f32.partialorder %v387_v34, 8.507059e+37 }
 0x12a   :  { %v436_v41 = vor.u32 1.1754944e-38, %v435_v33  ;;  %vm434_vm9 = vcmp.eq.f32.partialorder %v433_v35, 8.507059e+37 }
 0x12c   :  { %395 = vrot.lane.b32.xlu1 %v310_v1, %s3401_s19 }
 0x12d   :  { %v2892_v8 = vpop.eup %2891 }
 0x12e   :  { %v2894_v9 = vpop.eup %2893  ;;  %v379_v14 = vmul.f32 %v2892_v8, %v377_v6  ;;  %vm384_vm2 = vweird.f32 %v2892_v8 }
 0x12f   :  { %v425_v15 = vmul.f32 %v2894_v9, %v423_v7  ;;  %vm430_vm3 = vweird.f32 %v2894_v9  ;;  %vm385_vm6 = vmor %vm383_vm4, %vm384_vm2 }
 0x130   :  { %v380_v18 = vsub.f32 1.0, %v379_v14  ;;  %vm431_vm7 = vmor %vm429_vm5, %vm430_vm3  ;;  %v215_v14 = vpop.f32.mrf.mxu0 }
 0x131   :  { %v426_v21 = vsub.f32 1.0, %v425_v15  ;;  %v216_v15 = vadd.f32 %v215_v14, %v3679_v53 }
 0x132   :  { %v381_v24 = vmul.f32 %v2892_v8, %v380_v18  ;;  %v272_v18 = vadd.f32 %v3677_v51, %v3681_v56 }
 0x133   :  { %v427_v26 = vmul.f32 %v2894_v9, %v426_v21 }
 0x134   :  { %v382_v28 = vadd.f32 %v2892_v8, %v381_v24 }
 0x135   :  { %v428_v31 = vadd.f32 %v2894_v9, %v427_v26 }
 0x136   :  { %v386_v38 = vsel %vm385_vm6, %v2892_v8, %v382_v28 }
 0x137   :  { %v432_v39 = vsel %vm431_vm7, %v2894_v9, %v428_v31  ;;  %v391_v43 = vsel %vm388_vm8, %v390_v40, %v386_v38 }
 0x138   :  { %v437_v44 = vsel %vm434_vm9, %v436_v41, %v432_v39 }
 0x139   :  { %v444_v63 = vmul.f32 %v442_v57, %v437_v44 }
 0x195   :  { %v401_v42 = vpop.permute.xlu0 %400 }
 0x196   :  { %v447_v52 = vpop.permute.xlu1 %446  ;;  %v403_v54 = vmul.f32 %v401_v42, %v391_v43 }
 0x197   :  { %v449_v55 = vmul.f32 %v447_v52, %v437_v44 }
 0x198   :  { %405 = vrot.lane.b32.xlu2 %v403_v54, %s3401_s19 }
 0x199   :  { %451 = vrot.lane.b32.xlu0 %v449_v55, %s3401_s19 }
 0x19e   :  { %v396_v58 = vpop.permute.xlu1 %395 }
 0x19f   :  { %v398_v59 = vmul.f32 %v396_v58, %v391_v43 }
 0x1f2   :  { %v406_v60 = vpop.permute.xlu2 %405 }
 0x1f3   :  { %v3690_v61 = vadd.f32 %v406_v60, %v398_v59 }
 0x1f5   :  { %2895 = vtanh.f32 %v3690_v61 }
 0x1fb   :  { %v2896_v62 = vpop.eup %2895 }
 0x1fc   :  { %411 = vrot.lane.b32.xlu1 %v2896_v62, %s3404_s6 }
 0x20b   :  { %v452_v0 = vpop.permute.xlu0 %451 }
 0x20c   :  { %v3694_v1 = vadd.f32 %v452_v0, %v444_v63 }
 0x20e   :  { %2897 = vtanh.f32 %v3694_v1 }
 0x214   :  { %v2898_v2 = vpop.eup %2897 }
 0x215   :  { %457 = vrot.lane.b32.xlu2 %v2898_v2, %s3404_s6 }
 0x26e   :  { %v412_v3 = vpop.permute.xlu1 %411 }
 0x26f   :  { %v458_v4 = vpop.permute.xlu2 %457  ;;  %v414_v5 = vmul.f32 %v412_v3, %v391_v43 }
 0x270   :  { %v460_v6 = vmul.f32 %v458_v4, %v437_v44 }
 0x271   :  { %416 = vrot.lane.b32.xlu0 %v414_v5, %s3401_s19 }
 0x272   :  { %462 = vrot.lane.b32.xlu1 %v460_v6, %s3404_s6 }
 0x2e3   :  { %v417_v7 = vpop.permute.xlu0 %416 }
 0x2e4   :  { %419 = vst.msk [vmem:[#allocation2] sm:$0xff] %vm319_vm1, %v417_v7  ;;  %v463_v8 = vpop.permute.xlu1 %462 }
 0x2e5   :  { %467 = vst.msk [vmem:[#allocation2 + $0x38] sm:$0xff] %vm466_vm10, %v463_v8  ;;  %v468_v9 = vsel %vm319_vm1, %v417_v7, %v463_v8 }
 0x2e6   :  { %2789 = vmatmul.msk.f32.vlgmr.msrb.gmra.mxu2 %vm170_vm0, %v468_v9  ;;  %2790 = vmatmul.msk.f32.vlgmr.msrb.gmra.mxu3 %vm170_vm0, %v468_v9 }
 0x2e7   :  { %760 = vmatpush.msrb.mxu2 %v3505_v10  ;;  %780 = vmatpush.msrb.mxu3 %v3507_v11 }
 0x2e9   :  { %761 = vmatpush.msrb.mxu2 %v3509_v12  ;;  %781 = vmatpush.msrb.mxu3 %v3513_v13 }
 0x2eb   :  { %762 = vmatpush.msrb.mxu2 %v3523_v16  ;;  %782 = vmatpush.msrb.mxu3 %v3525_v17 }
 0x2ed   :  { %763 = vmatpush.msrb.mxu2 %v3528_v19  ;;  %783 = vmatpush.msrb.mxu3 %v3530_v20 }
 0x2ef   :  { %764 = vmatpush.msrb.mxu2 %v3533_v22  ;;  %784 = vmatpush.msrb.mxu3 %v3537_v23 }
 0x2f1   :  { %765 = vmatpush.msrb.mxu2 %v3540_v25  ;;  %785 = vmatpush.msrb.mxu3 %v3546_v27 }
 0x2f3   :  { %766 = vmatpush.msrb.mxu2 %v3554_v29  ;;  %786 = vmatpush.msrb.mxu3 %v3556_v30 }
 0x2f5   :  { %767 = vmatpush.msrb.mxu2 %v3578_v36  ;;  %787 = vmatpush.msrb.mxu3 %v3580_v37 }
 0x369   :  { %v489_v21 = vpop.f32.mrf.mxu2  ;;  %v509_v24 = vpop.f32.mrf.mxu3 }
 0x36a   :  { %v516_v26 = vadd.f32 %v489_v21, %v216_v15  ;;  %v521_v28 = vadd.f32 %v509_v24, %v272_v18 }
 0x36c   :  { %2899 = vtanh.f32 %v516_v26  ;;  %v2791_v33 = vmul.f32 -1.442695, %v516_v26  ;;  %v2792_v39 = vmul.f32 -1.442695, %v521_v28 }
 0x36d   :  { %2901 = vtanh.f32 %v521_v28 }
 0x36e   :  { %2903 = vpow2.f32 %v2791_v33 }
 0x372   :  { %v2900_v31 = vpop.eup %2899 }
 0x373   :  { %v2902_v32 = vpop.eup %2901  ;;  %544 = vrot.lane.b32.xlu2 %v2900_v31, %s3404_s6 }
 0x374   :  { %587 = vrot.lane.b32.xlu0 %v2902_v32, %s3404_s6  ;;  %v2904_v34 = vpop.eup %2903 }
 0x375   :  { %v525_v35 = vadd.f32 1.0, %v2904_v34 }
 0x377   :  { %2905 = vrcp.f32 %v525_v35  ;;  %v537_v52 = vand.u32 2147483648, %v525_v35  ;;  %vm531_vm12 = vweird.f32 %v525_v35  ;;  %v535_v54 = vand.u32 2147483647, %v525_v35 }
 0x378   :  { %2907 = vpow2.f32 %v2792_v39 }
 0x379   :  { %v538_v57 = vor.u32 1.1754944e-38, %v537_v52  ;;  %vm536_vm14 = vcmp.eq.f32.partialorder %v535_v54, 8.507059e+37 }
 0x37d   :  { %v2906_v38 = vpop.eup %2905 }
 0x37e   :  { %v527_v51 = vmul.f32 %v2906_v38, %v525_v35  ;;  %v2908_v42 = vpop.eup %2907  ;;  %vm532_vm11 = vweird.f32 %v2906_v38 }
 0x37f   :  { %v568_v43 = vadd.f32 1.0, %v2908_v42  ;;  %vm533_vm13 = vmor %vm531_vm12, %vm532_vm11 }
 0x380   :  { %v528_v40 = vsub.f32 1.0, %v527_v51  ;;  %v218_v51 = vpop.f32.mrf.mxu0 }
 0x381   :  { %2909 = vrcp.f32 %v568_v43  ;;  %v580_v4 = vand.u32 2147483648, %v568_v43  ;;  %vm574_vm2 = vweird.f32 %v568_v43  ;;  %v578_v5 = vand.u32 2147483647, %v568_v43 }
 0x382   :  { %v529_v41 = vmul.f32 %v2906_v38, %v528_v40  ;;  %v219_v40 = vadd.f32 %v218_v51, %v3679_v53 }
 0x383   :  { %v581_v7 = vor.u32 1.1754944e-38, %v580_v4  ;;  %vm579_vm4 = vcmp.eq.f32.partialorder %v578_v5, 8.507059e+37 }
 0x384   :  { %v530_v44 = vadd.f32 %v2906_v38, %v529_v41  ;;  %v269_v41 = vadd.f32 %v3675_v50, %v3681_v56 }
 0x386   :  { %v534_v55 = vsel %vm533_vm13, %v2906_v38, %v530_v44 }
 0x387   :  { %v539_v59 = vsel %vm536_vm14, %v538_v57, %v534_v55  ;;  %v2910_v62 = vpop.eup %2909 }
 0x388   :  { %v570_v63 = vmul.f32 %v2910_v62, %v568_v43  ;;  %vm575_vm15 = vweird.f32 %v2910_v62  ;;  %v542_v15 = vmul.f32 %v539_v59, %v3690_v61 }
 0x389   :  { %vm576_vm3 = vmor %vm574_vm2, %vm575_vm15 }
 0x38a   :  { %v571_v0 = vsub.f32 1.0, %v570_v63 }
 0x38c   :  { %v572_v2 = vmul.f32 %v2910_v62, %v571_v0 }
 0x38e   :  { %v573_v3 = vadd.f32 %v2910_v62, %v572_v2 }
 0x390   :  { %v577_v6 = vsel %vm576_vm3, %v2910_v62, %v573_v3 }
 0x391   :  { %v582_v9 = vsel %vm579_vm4, %v581_v7, %v577_v6 }
 0x392   :  { %v585_v18 = vmul.f32 %v582_v9, %v3694_v1 }
 0x3cd   :  { %v545_v58 = vpop.permute.xlu2 %544 }
 0x3ce   :  { %v547_v60 = vmul.f32 %v545_v58, %v539_v59 }
 0x3d0   :  { %549 = vrot.lane.b32.xlu1 %v547_v60, %s3401_s19 }
 0x3e6   :  { %v588_v8 = vpop.permute.xlu0 %587 }
 0x3e7   :  { %v590_v14 = vmul.f32 %v588_v8, %v582_v9 }
 0x3e9   :  { %592 = vrot.lane.b32.xlu2 %v590_v14, %s3401_s19 }
 0x442   :  { %v550_v21 = vpop.permute.xlu1 %549 }
 0x443   :  { %v593_v24 = vpop.permute.xlu2 %592  ;;  %v3730_v26 = vadd.f32 %v550_v21, %v542_v15 }
 0x444   :  { %v3732_v28 = vadd.f32 %v593_v24, %v585_v18 }
 0x445   :  { %2911 = vtanh.f32 %v3730_v26 }
 0x446   :  { %2913 = vtanh.f32 %v3732_v28 }
 0x44b   :  { %v2912_v31 = vpop.eup %2911 }
 0x44c   :  { %v2914_v32 = vpop.eup %2913  ;;  %555 = vrot.lane.b32.xlu0 %v2912_v31, %s3404_s6 }
 0x44d   :  { %598 = vrot.lane.b32.xlu1 %v2914_v32, %s3404_s6 }
 0x4be   :  { %v556_v33 = vpop.permute.xlu0 %555 }
 0x4bf   :  { %v599_v61 = vpop.permute.xlu1 %598  ;;  %v558_v34 = vmul.f32 %v556_v33, %v539_v59 }
 0x4c0   :  { %v601_v1 = vmul.f32 %v599_v61, %v582_v9 }
 0x4c1   :  { %560 = vrot.lane.b32.xlu2 %v558_v34, %s3401_s19 }
 0x4c2   :  { %603 = vrot.lane.b32.xlu0 %v601_v1, %s3404_s6 }
 0x51b   :  { %v561_v35 = vpop.permute.xlu2 %560 }
 0x51c   :  { %564 = vst.msk [vmem:[#allocation2 + $0x8] sm:$0xff] %vm319_vm1, %v561_v35 }
 0x534   :  { %v604_v38 = vpop.permute.xlu0 %603 }
 0x535   :  { %607 = vst.msk [vmem:[#allocation2 + $0x30] sm:$0xff] %vm466_vm10, %v604_v38  ;;  %v608_v39 = vsel %vm319_vm1, %v561_v35, %v604_v38 }
 0x536   :  { %2793 = vmatmul.msk.f32.vlgmr.msra.gmra.mxu2 %vm170_vm0, %v608_v39  ;;  %2794 = vmatmul.msk.f32.vlgmr.msra.gmra.mxu3 %vm170_vm0, %v608_v39 }
 0x537   :  { %1032 = vmatpush.msra.mxu2 %v3505_v10  ;;  %1052 = vmatpush.msra.mxu3 %v3507_v11 }
 0x539   :  { %1033 = vmatpush.msra.mxu2 %v3509_v12  ;;  %1053 = vmatpush.msra.mxu3 %v3513_v13 }
 0x53b   :  { %1034 = vmatpush.msra.mxu2 %v3523_v16  ;;  %1054 = vmatpush.msra.mxu3 %v3525_v17 }
 0x53d   :  { %1035 = vmatpush.msra.mxu2 %v3528_v19  ;;  %1055 = vmatpush.msra.mxu3 %v3530_v20 }
 0x53f   :  { %1036 = vmatpush.msra.mxu2 %v3533_v22  ;;  %1056 = vmatpush.msra.mxu3 %v3537_v23 }
 0x541   :  { %1037 = vmatpush.msra.mxu2 %v3540_v25  ;;  %1057 = vmatpush.msra.mxu3 %v3546_v27 }
 0x543   :  { %1038 = vmatpush.msra.mxu2 %v3554_v29  ;;  %1058 = vmatpush.msra.mxu3 %v3556_v30 }
 0x545   :  { %1039 = vmatpush.msra.mxu2 %v3578_v36  ;;  %1059 = vmatpush.msra.mxu3 %v3580_v37 }
 0x5b9   :  { %v629_v42 = vpop.f32.mrf.mxu2  ;;  %v649_v43 = vpop.f32.mrf.mxu3 }
 0x5ba   :  { %v656_v44 = vadd.f32 %v629_v42, %v219_v40  ;;  %v661_v52 = vadd.f32 %v649_v43, %v269_v41 }
 0x5bc   :  { %2915 = vtanh.f32 %v656_v44  ;;  %v2796_v57 = vmul.f32 -1.442695, %v661_v52  ;;  %v2795_v62 = vmul.f32 -1.442695, %v656_v44 }
 0x5bd   :  { %2917 = vtanh.f32 %v661_v52 }
 0x5be   :  { %2919 = vpow2.f32 %v2796_v57 }
 0x5c2   :  { %v2916_v54 = vpop.eup %2915 }
 0x5c3   :  { %v2918_v55 = vpop.eup %2917  ;;  %684 = vrot.lane.b32.xlu1 %v2916_v54, %s3404_s6 }
 0x5c4   :  { %727 = vrot.lane.b32.xlu2 %v2918_v55, %s3404_s6  ;;  %v2920_v58 = vpop.eup %2919 }
 0x5c5   :  { %v708_v59 = vadd.f32 1.0, %v2920_v58 }
 0x5c7   :  { %2921 = vrcp.f32 %v708_v59  ;;  %v720_v5 = vand.u32 2147483648, %v708_v59  ;;  %vm714_vm6 = vweird.f32 %v708_v59  ;;  %v718_v6 = vand.u32 2147483647, %v708_v59 }
 0x5c8   :  { %2923 = vpow2.f32 %v2795_v62 }
 0x5c9   :  { %v721_v8 = vor.u32 1.1754944e-38, %v720_v5  ;;  %vm719_vm8 = vcmp.eq.f32.partialorder %v718_v6, 8.507059e+37 }
 0x5cd   :  { %v2922_v60 = vpop.eup %2921 }
 0x5ce   :  { %v710_v50 = vmul.f32 %v2922_v60, %v708_v59  ;;  %v2924_v0 = vpop.eup %2923  ;;  %vm715_vm5 = vweird.f32 %v2922_v60 }
 0x5cf   :  { %v665_v3 = vadd.f32 1.0, %v2924_v0  ;;  %vm716_vm7 = vmor %vm714_vm6, %vm715_vm5 }
 0x5d0   :  { %v711_v63 = vsub.f32 1.0, %v710_v50 }
 0x5d1   :  { %2925 = vrcp.f32 %v665_v3  ;;  %v677_v33 = vand.u32 2147483648, %v665_v3  ;;  %vm671_vm11 = vweird.f32 %v665_v3  ;;  %v675_v61 = vand.u32 2147483647, %v665_v3 }
 0x5d2   :  { %v712_v2 = vmul.f32 %v2922_v60, %v711_v63 }
 0x5d3   :  { %v678_v1 = vor.u32 1.1754944e-38, %v677_v33  ;;  %vm676_vm13 = vcmp.eq.f32.partialorder %v675_v61, 8.507059e+37 }
 0x5d4   :  { %v713_v4 = vadd.f32 %v2922_v60, %v712_v2 }
 0x5d6   :  { %v717_v7 = vsel %vm716_vm7, %v2922_v60, %v713_v4 }
 0x5d7   :  { %v722_v14 = vsel %vm719_vm8, %v721_v8, %v717_v7  ;;  %v2926_v15 = vpop.eup %2925 }
 0x5d8   :  { %v667_v21 = vmul.f32 %v2926_v15, %v665_v3  ;;  %vm672_vm9 = vweird.f32 %v2926_v15  ;;  %v725_v51 = vmul.f32 %v722_v14, %v3732_v28 }
 0x5d9   :  { %vm673_vm12 = vmor %vm671_vm11, %vm672_vm9 }
 0x5da   :  { %v668_v24 = vsub.f32 1.0, %v667_v21 }
 0x5dc   :  { %v669_v31 = vmul.f32 %v2926_v15, %v668_v24 }
 0x5de   :  { %v670_v32 = vadd.f32 %v2926_v15, %v669_v31 }
 0x5e0   :  { %v674_v34 = vsel %vm673_vm12, %v2926_v15, %v670_v32 }
 0x5e1   :  { %v679_v38 = vsel %vm676_vm13, %v678_v1, %v674_v34 }
 0x5e2   :  { %v682_v43 = vmul.f32 %v679_v38, %v3730_v26 }
 0x61e   :  { %v728_v9 = vpop.permute.xlu2 %727 }
 0x61f   :  { %v730_v18 = vmul.f32 %v728_v9, %v722_v14 }
 0x621   :  { %732 = vrot.lane.b32.xlu1 %v730_v18, %s3401_s19 }
 0x635   :  { %v685_v35 = vpop.permute.xlu1 %684 }
 0x636   :  { %v687_v39 = vmul.f32 %v685_v35, %v679_v38 }
 0x638   :  { %689 = vrot.lane.b32.xlu0 %v687_v39, %s3401_s19 }
 0x693   :  { %v733_v40 = vpop.permute.xlu1 %732 }
 0x694   :  { %v3769_v41 = vadd.f32 %v733_v40, %v725_v51 }
 0x696   :  { %2927 = vtanh.f32 %v3769_v41 }
 0x69c   :  { %v2928_v42 = vpop.eup %2927 }
 0x69d   :  { %738 = vrot.lane.b32.xlu0 %v2928_v42, %s3404_s6 }
 0x6aa   :  { %v690_v44 = vpop.permute.xlu0 %689 }
 0x6ab   :  { %v3774_v52 = vadd.f32 %v690_v44, %v682_v43 }
 0x6ad   :  { %2929 = vtanh.f32 %v3774_v52 }
 0x6b3   :  { %v2930_v54 = vpop.eup %2929 }
 0x6b4   :  { %695 = vrot.lane.b32.xlu2 %v2930_v54, %s3404_s6 }
 0x70e   :  { %v696_v55 = vpop.permute.xlu2 %695 }
 0x70f   :  { %v739_v28 = vpop.permute.xlu0 %738  ;;  %v698_v57 = vmul.f32 %v696_v55, %v679_v38 }
 0x710   :  { %v741_v58 = vmul.f32 %v739_v28, %v722_v14 }
 0x711   :  { %700 = vrot.lane.b32.xlu1 %v698_v57, %s3401_s19 }
 0x712   :  { %743 = vrot.lane.b32.xlu2 %v741_v58, %s3404_s6 }
 0x76c   :  { %v744_v59 = vpop.permute.xlu2 %743 }
 0x76d   :  { %747 = vst.msk [vmem:[#allocation2 + $0x28] sm:$0xff] %vm466_vm10, %v744_v59 }
 0x783   :  { %v701_v26 = vpop.permute.xlu1 %700 }
 0x784   :  { %704 = vst.msk [vmem:[#allocation2 + $0x10] sm:$0xff] %vm319_vm1, %v701_v26  ;;  %v748_v60 = vsel %vm319_vm1, %v701_v26, %v744_v59 }
 0x785   :  { %2797 = vmatmul.msk.f32.vlgmr.msrb.gmra.mxu2 %vm170_vm0, %v748_v60  ;;  %2798 = vmatmul.msk.f32.vlgmr.msrb.gmra.mxu3 %vm170_vm0, %v748_v60 }
 0x786   :  { %1296 = vmatpush.msrb.mxu2 %v3505_v10  ;;  %1316 = vmatpush.msrb.mxu3 %v3507_v11  ;;  %v221_v10 = vpop.f32.mrf.mxu0 }
 0x787   :  { %v222_v11 = vadd.f32 %v221_v10, %v3679_v53  ;;  %v263_v10 = vadd.f32 %v3671_v48, %v3681_v56 }
 0x788   :  { %1297 = vmatpush.msrb.mxu2 %v3509_v12  ;;  %1317 = vmatpush.msrb.mxu3 %v3513_v13  ;;  %v266_v12 = vadd.f32 %v3673_v49, %v3681_v56 }
 0x78a   :  { %1298 = vmatpush.msrb.mxu2 %v3523_v16  ;;  %1318 = vmatpush.msrb.mxu3 %v3525_v17 }
 0x78c   :  { %1299 = vmatpush.msrb.mxu2 %v3528_v19  ;;  %1319 = vmatpush.msrb.mxu3 %v3530_v20 }
 0x78e   :  { %1300 = vmatpush.msrb.mxu2 %v3533_v22  ;;  %1320 = vmatpush.msrb.mxu3 %v3537_v23  ;;  %v224_v58 = vpop.f32.mrf.mxu0 }
 0x790   :  { %1301 = vmatpush.msrb.mxu2 %v3540_v25  ;;  %1321 = vmatpush.msrb.mxu3 %v3546_v27 }
 0x792   :  { %1302 = vmatpush.msrb.mxu2 %v3554_v29  ;;  %1322 = vmatpush.msrb.mxu3 %v3556_v30 }
 0x794   :  { %1303 = vmatpush.msrb.mxu2 %v3578_v36  ;;  %1323 = vmatpush.msrb.mxu3 %v3580_v37 }
 0x796   :  { %v3825_v59 = vpop.f32.mrf.mxu0 }
 0x79e   :  { %v3827_v26 = vpop.f32.mrf.mxu0 }
 0x7a6   :  { %v3829_v60 = vpop.f32.mrf.mxu0 }
 0x808   :  { %v769_v13 = vpop.f32.mrf.mxu2  ;;  %v789_v16 = vpop.f32.mrf.mxu3 }
 0x809   :  { %v796_v17 = vadd.f32 %v769_v13, %v222_v11  ;;  %v801_v19 = vadd.f32 %v789_v16, %v266_v12  ;;  %v225_v11 = vadd.f32 %v224_v58, %v3679_v53 }
 0x80b   :  { %2931 = vtanh.f32 %v796_v17  ;;  %v2799_v23 = vmul.f32 -1.442695, %v796_v17  ;;  %v2800_v25 = vmul.f32 -1.442695, %v801_v19 }
 0x80c   :  { %2933 = vtanh.f32 %v801_v19 }
 0x80d   :  { %2935 = vpow2.f32 %v2799_v23 }
 0x80e   :  { %2937 = vpow2.f32 %v2800_v25 }
 0x811   :  { %v2932_v20 = vpop.eup %2931 }
 0x812   :  { %v2934_v22 = vpop.eup %2933  ;;  %824 = vrot.lane.b32.xlu0 %v2932_v20, %s3404_s6 }
 0x813   :  { %867 = vrot.lane.b32.xlu1 %v2934_v22, %s3404_s6  ;;  %v2936_v27 = vpop.eup %2935 }
 0x814   :  { %v2938_v29 = vpop.eup %2937  ;;  %v805_v30 = vadd.f32 1.0, %v2936_v27 }
 0x815   :  { %v848_v36 = vadd.f32 1.0, %v2938_v29 }
 0x816   :  { %2939 = vrcp.f32 %v805_v30  ;;  %v817_v6 = vand.u32 2147483648, %v805_v30  ;;  %vm811_vm2 = vweird.f32 %v805_v30  ;;  %v815_v8 = vand.u32 2147483647, %v805_v30 }
 0x817   :  { %2941 = vrcp.f32 %v848_v36  ;;  %v860_v7 = vand.u32 2147483648, %v848_v36  ;;  %vm854_vm3 = vweird.f32 %v848_v36  ;;  %v858_v9 = vand.u32 2147483647, %v848_v36 }
 0x818   :  { %v818_v18 = vor.u32 1.1754944e-38, %v817_v6  ;;  %vm816_vm6 = vcmp.eq.f32.partialorder %v815_v8, 8.507059e+37 }
 0x819   :  { %v861_v21 = vor.u32 1.1754944e-38, %v860_v7  ;;  %vm859_vm7 = vcmp.eq.f32.partialorder %v858_v9, 8.507059e+37 }
 0x81c   :  { %v2940_v37 = vpop.eup %2939 }
 0x81d   :  { %v2942_v49 = vpop.eup %2941  ;;  %v807_v62 = vmul.f32 %v2940_v37, %v805_v30  ;;  %vm812_vm14 = vweird.f32 %v2940_v37 }
 0x81e   :  { %v850_v50 = vmul.f32 %v2942_v49, %v848_v36  ;;  %vm855_vm15 = vweird.f32 %v2942_v49  ;;  %vm813_vm4 = vmor %vm811_vm2, %vm812_vm14 }
 0x81f   :  { %v808_v63 = vsub.f32 1.0, %v807_v62  ;;  %vm856_vm5 = vmor %vm854_vm3, %vm855_vm15 }
 0x820   :  { %v851_v0 = vsub.f32 1.0, %v850_v50 }
 0x821   :  { %v809_v2 = vmul.f32 %v2940_v37, %v808_v63 }
 0x822   :  { %v852_v3 = vmul.f32 %v2942_v49, %v851_v0 }
 0x823   :  { %v810_v4 = vadd.f32 %v2940_v37, %v809_v2 }
 0x824   :  { %v853_v5 = vadd.f32 %v2942_v49, %v852_v3 }
 0x825   :  { %v814_v14 = vsel %vm813_vm4, %v2940_v37, %v810_v4 }
 0x826   :  { %v857_v15 = vsel %vm856_vm5, %v2942_v49, %v853_v5  ;;  %v819_v31 = vsel %vm816_vm6, %v818_v18, %v814_v14 }
 0x827   :  { %v862_v33 = vsel %vm859_vm7, %v861_v21, %v857_v15  ;;  %v822_v1 = vmul.f32 %v819_v31, %v3774_v52 }
 0x828   :  { %v865_v51 = vmul.f32 %v862_v33, %v3769_v41 }
 0x884   :  { %v825_v24 = vpop.permute.xlu0 %824 }
 0x885   :  { %v868_v32 = vpop.permute.xlu1 %867  ;;  %v827_v61 = vmul.f32 %v825_v24, %v819_v31 }
 0x886   :  { %v870_v34 = vmul.f32 %v868_v32, %v862_v33 }
 0x887   :  { %829 = vrot.lane.b32.xlu2 %v827_v61, %s3401_s19 }
 0x888   :  { %872 = vrot.lane.b32.xlu0 %v870_v34, %s3401_s19 }
 0x8e1   :  { %v830_v35 = vpop.permute.xlu2 %829 }
 0x8e2   :  { %v3809_v38 = vadd.f32 %v830_v35, %v822_v1 }
 0x8e4   :  { %2943 = vtanh.f32 %v3809_v38 }
 0x8ea   :  { %v2944_v39 = vpop.eup %2943 }
 0x8eb   :  { %835 = vrot.lane.b32.xlu1 %v2944_v39, %s3404_s6 }
 0x8fa   :  { %v873_v40 = vpop.permute.xlu0 %872 }
 0x8fb   :  { %v3814_v42 = vadd.f32 %v873_v40, %v865_v51 }
 0x8fd   :  { %2945 = vtanh.f32 %v3814_v42 }
 0x903   :  { %v2946_v43 = vpop.eup %2945 }
 0x904   :  { %878 = vrot.lane.b32.xlu2 %v2946_v43, %s3404_s6 }
 0x95d   :  { %v836_v44 = vpop.permute.xlu1 %835 }
 0x95e   :  { %v879_v52 = vpop.permute.xlu2 %878  ;;  %v838_v54 = vmul.f32 %v836_v44, %v819_v31 }
 0x95f   :  { %v881_v55 = vmul.f32 %v879_v52, %v862_v33 }
 0x960   :  { %840 = vrot.lane.b32.xlu0 %v838_v54, %s3401_s19 }
 0x961   :  { %883 = vrot.lane.b32.xlu1 %v881_v55, %s3404_s6 }
 0x9d2   :  { %v841_v28 = vpop.permute.xlu0 %840 }
 0x9d3   :  { %844 = vst.msk [vmem:[#allocation2 + $0x18] sm:$0xff] %vm319_vm1, %v841_v28  ;;  %v884_v41 = vpop.permute.xlu1 %883 }
 0x9d4   :  { %887 = vst.msk [vmem:[#allocation2 + $0x20] sm:$0xff] %vm466_vm10, %v884_v41  ;;  %v888_v57 = vsel %vm319_vm1, %v841_v28, %v884_v41  ;;  %v260_v41 = vadd.f32 %v3669_v47, %v3681_v56 }
 0x9d5   :  { %2801 = vmatmul.msk.f32.vlgmr.msrb.gmra.mxu0 %vm170_vm0, %v888_v57  ;;  %2802 = vmatmul.msk.f32.vlgmr.msrb.gmra.mxu1 %vm170_vm0, %v888_v57  ;;  %v228_v57 = vadd.f32 %v3825_v59, %v3679_v53 }
 0xa52   :  { %v909_v12 = vpop.f32.mrf.mxu0  ;;  %v929_v13 = vpop.f32.mrf.mxu1 }
 0xa53   :  { %v933_v16 = vadd.f32 %v909_v12, %v225_v11  ;;  %v935_v17 = vadd.f32 %v929_v13, %v263_v10 }
 0xa55   :  { %2947 = vtanh.f32 %v933_v16  ;;  %v2803_v22 = vmul.f32 -1.442695, %v933_v16  ;;  %v2804_v27 = vmul.f32 -1.442695, %v935_v17 }
 0xa56   :  { %2949 = vtanh.f32 %v935_v17 }
 0xa57   :  { %2951 = vpow2.f32 %v2803_v22 }
 0xa5b   :  { %v2948_v19 = vpop.eup %2947 }
 0xa5c   :  { %v2950_v20 = vpop.eup %2949  ;;  %958 = vrot.lane.b32.xlu2 %v2948_v19, %s3404_s6 }
 0xa5d   :  { %1000 = vrot.lane.b32.xlu0 %v2950_v20, %s3404_s6  ;;  %v2952_v23 = vpop.eup %2951 }
 0xa5e   :  { %v939_v25 = vadd.f32 1.0, %v2952_v23 }
 0xa60   :  { %2953 = vrcp.f32 %v939_v25  ;;  %v951_v50 = vand.u32 2147483648, %v939_v25  ;;  %vm945_vm9 = vweird.f32 %v939_v25  ;;  %v949_v63 = vand.u32 2147483647, %v939_v25 }
 0xa61   :  { %2955 = vpow2.f32 %v2804_v27 }
 0xa62   :  { %v952_v2 = vor.u32 1.1754944e-38, %v951_v50  ;;  %vm950_vm12 = vcmp.eq.f32.partialorder %v949_v63, 8.507059e+37 }
 0xa66   :  { %v2954_v48 = vpop.eup %2953 }
 0xa67   :  { %v941_v29 = vmul.f32 %v2954_v48, %v939_v25  ;;  %v2956_v37 = vpop.eup %2955  ;;  %vm946_vm8 = vweird.f32 %v2954_v48 }
 0xa68   :  { %v981_v49 = vadd.f32 1.0, %v2956_v37  ;;  %vm947_vm11 = vmor %vm945_vm9, %vm946_vm8 }
 0xa69   :  { %v942_v30 = vsub.f32 1.0, %v941_v29 }
 0xa6a   :  { %2957 = vrcp.f32 %v981_v49  ;;  %v993_v15 = vand.u32 2147483648, %v981_v49  ;;  %vm987_vm14 = vweird.f32 %v981_v49  ;;  %v991_v18 = vand.u32 2147483647, %v981_v49 }
 0xa6b   :  { %v943_v36 = vmul.f32 %v2954_v48, %v942_v30 }
 0xa6c   :  { %v994_v24 = vor.u32 1.1754944e-38, %v993_v15  ;;  %vm992_vm2 = vcmp.eq.f32.partialorder %v991_v18, 8.507059e+37 }
 0xa6d   :  { %v944_v62 = vadd.f32 %v2954_v48, %v943_v36 }
 0xa6f   :  { %v948_v0 = vsel %vm947_vm11, %v2954_v48, %v944_v62 }
 0xa70   :  { %v953_v4 = vsel %vm950_vm12, %v952_v2, %v948_v0  ;;  %v2958_v6 = vpop.eup %2957 }
 0xa71   :  { %v983_v7 = vmul.f32 %v2958_v6, %v981_v49  ;;  %vm988_vm13 = vweird.f32 %v2958_v6  ;;  %v956_v61 = vmul.f32 %v953_v4, %v3809_v38 }
 0xa72   :  { %vm989_vm15 = vmor %vm987_vm14, %vm988_vm13 }
 0xa73   :  { %v984_v8 = vsub.f32 1.0, %v983_v7 }
 0xa75   :  { %v985_v9 = vmul.f32 %v2958_v6, %v984_v8 }
 0xa77   :  { %v986_v14 = vadd.f32 %v2958_v6, %v985_v9 }
 0xa79   :  { %v990_v21 = vsel %vm989_vm15, %v2958_v6, %v986_v14 }
 0xa7a   :  { %v995_v32 = vsel %vm992_vm2, %v994_v24, %v990_v21 }
 0xa7b   :  { %v998_v34 = vmul.f32 %v995_v32, %v3814_v42 }
 0xab6   :  { %v959_v3 = vpop.permute.xlu2 %958 }
 0xab7   :  { %v961_v5 = vmul.f32 %v959_v3, %v953_v4 }
 0xab9   :  { %963 = vrot.lane.b32.xlu1 %v961_v5, %s3401_s19 }
 0xacf   :  { %v1001_v31 = vpop.permute.xlu0 %1000 }
 0xad0   :  { %v1003_v33 = vmul.f32 %v1001_v31, %v995_v32 }
 0xad2   :  { %1005 = vrot.lane.b32.xlu2 %v1003_v33, %s3401_s19 }
 0xb2b   :  { %v964_v1 = vpop.permute.xlu1 %963 }
 0xb2c   :  { %v1006_v35 = vpop.permute.xlu2 %1005  ;;  %v3840_v39 = vadd.f32 %v964_v1, %v956_v61 }
 0xb2d   :  { %v3842_v51 = vadd.f32 %v1006_v35, %v998_v34 }
 0xb2e   :  { %2959 = vtanh.f32 %v3840_v39 }
 0xb2f   :  { %2961 = vtanh.f32 %v3842_v51 }
 0xb34   :  { %v2960_v40 = vpop.eup %2959 }
 0xb35   :  { %v2962_v43 = vpop.eup %2961  ;;  %969 = vrot.lane.b32.xlu0 %v2960_v40, %s3404_s6 }
 0xb36   :  { %1011 = vrot.lane.b32.xlu1 %v2962_v43, %s3404_s6 }
 0xba7   :  { %v970_v44 = vpop.permute.xlu0 %969 }
 0xba8   :  { %v1012_v38 = vpop.permute.xlu1 %1011  ;;  %v972_v52 = vmul.f32 %v970_v44, %v953_v4 }
 0xba9   :  { %v1014_v42 = vmul.f32 %v1012_v38, %v995_v32 }
 0xbaa   :  { %974 = vrot.lane.b32.xlu2 %v972_v52, %s3401_s19  ;;  %v257_v52 = vadd.f32 %v3667_v46, %v3681_v56 }
 0xbab   :  { %1016 = vrot.lane.b32.xlu0 %v1014_v42, %s3404_s6  ;;  %v231_v42 = vadd.f32 %v3827_v26, %v3679_v53 }
 0xc04   :  { %v975_v54 = vpop.permute.xlu2 %974 }
 0xc05   :  { %977 = vst.msk [vmem:[#allocation2 + $0x20] sm:$0xff] %vm319_vm1, %v975_v54 }
 0xc1d   :  { %v1017_v55 = vpop.permute.xlu0 %1016 }
 0xc1e   :  { %1019 = vst.msk [vmem:[#allocation2 + $0x18] sm:$0xff] %vm466_vm10, %v1017_v55  ;;  %v1020_v28 = vsel %vm319_vm1, %v975_v54, %v1017_v55 }
 0xc1f   :  { %2805 = vmatmul.msk.f32.vlgmr.msra.gmra.mxu2 %vm170_vm0, %v1020_v28  ;;  %2806 = vmatmul.msk.f32.vlgmr.msra.gmra.mxu3 %vm170_vm0, %v1020_v28 }
 0xca2   :  { %v1041_v58 = vpop.f32.mrf.mxu2  ;;  %v1061_v10 = vpop.f32.mrf.mxu3 }
 0xca3   :  { %v1065_v11 = vadd.f32 %v1041_v58, %v228_v57  ;;  %v1067_v12 = vadd.f32 %v1061_v10, %v260_v41 }
 0xca5   :  { %2963 = vtanh.f32 %v1065_v11  ;;  %v2808_v17 = vmul.f32 -1.442695, %v1067_v12  ;;  %v2807_v22 = vmul.f32 -1.442695, %v1065_v11 }
 0xca6   :  { %2965 = vtanh.f32 %v1067_v12 }
 0xca7   :  { %2967 = vpow2.f32 %v2808_v17 }
 0xcab   :  { %v2964_v13 = vpop.eup %2963 }
 0xcac   :  { %v2966_v16 = vpop.eup %2965  ;;  %1090 = vrot.lane.b32.xlu1 %v2964_v13, %s3404_s6 }
 0xcad   :  { %1132 = vrot.lane.b32.xlu2 %v2966_v16, %s3404_s6  ;;  %v2968_v19 = vpop.eup %2967 }
 0xcae   :  { %v1113_v20 = vadd.f32 1.0, %v2968_v19 }
 0xcb0   :  { %2969 = vrcp.f32 %v1113_v20  ;;  %v1125_v30 = vand.u32 2147483648, %v1113_v20  ;;  %vm1119_vm4 = vweird.f32 %v1113_v20  ;;  %v1123_v36 = vand.u32 2147483647, %v1113_v20 }
 0xcb1   :  { %2971 = vpow2.f32 %v2807_v22 }
 0xcb2   :  { %v1126_v49 = vor.u32 1.1754944e-38, %v1125_v30  ;;  %vm1124_vm6 = vcmp.eq.f32.partialorder %v1123_v36, 8.507059e+37 }
 0xcb6   :  { %v2970_v47 = vpop.eup %2969 }
 0xcb7   :  { %v1115_v59 = vmul.f32 %v2970_v47, %v1113_v20  ;;  %v2972_v25 = vpop.eup %2971  ;;  %vm1120_vm3 = vweird.f32 %v2970_v47 }
 0xcb8   :  { %v1071_v27 = vadd.f32 1.0, %v2972_v25  ;;  %vm1121_vm5 = vmor %vm1119_vm4, %vm1120_vm3 }
 0xcb9   :  { %v1116_v23 = vsub.f32 1.0, %v1115_v59 }
 0xcba   :  { %2973 = vrcp.f32 %v1071_v27  ;;  %v1083_v6 = vand.u32 2147483648, %v1071_v27  ;;  %vm1077_vm8 = vweird.f32 %v1071_v27  ;;  %v1081_v7 = vand.u32 2147483647, %v1071_v27 }
 0xcbb   :  { %v1117_v48 = vmul.f32 %v2970_v47, %v1116_v23 }
 0xcbc   :  { %v1084_v9 = vor.u32 1.1754944e-38, %v1083_v6  ;;  %vm1082_vm11 = vcmp.eq.f32.partialorder %v1081_v7, 8.507059e+37 }
 0xcbd   :  { %v1118_v29 = vadd.f32 %v2970_v47, %v1117_v48 }
 0xcbf   :  { %v1122_v37 = vsel %vm1121_vm5, %v2970_v47, %v1118_v29 }
 0xcc0   :  { %v1127_v50 = vsel %vm1124_vm6, %v1126_v49, %v1122_v37  ;;  %v2974_v63 = vpop.eup %2973 }
 0xcc1   :  { %v1073_v2 = vmul.f32 %v2974_v63, %v1071_v27  ;;  %vm1078_vm7 = vweird.f32 %v2974_v63  ;;  %v1130_v21 = vmul.f32 %v1127_v50, %v3842_v51 }
 0xcc2   :  { %vm1079_vm9 = vmor %vm1077_vm8, %vm1078_vm7 }
 0xcc3   :  { %v1074_v3 = vsub.f32 1.0, %v1073_v2 }
 0xcc5   :  { %v1075_v4 = vmul.f32 %v2974_v63, %v1074_v3 }
 0xcc7   :  { %v1076_v5 = vadd.f32 %v2974_v63, %v1075_v4 }
 0xcc9   :  { %v1080_v8 = vsel %vm1079_vm9, %v2974_v63, %v1076_v5 }
 0xcca   :  { %v1085_v15 = vsel %vm1082_vm11, %v1084_v9, %v1080_v8 }
 0xccb   :  { %v1088_v33 = vmul.f32 %v1085_v15, %v3840_v39 }
 0xd07   :  { %v1133_v62 = vpop.permute.xlu2 %1132 }
 0xd08   :  { %v1135_v0 = vmul.f32 %v1133_v62, %v1127_v50 }
 0xd0a   :  { %1137 = vrot.lane.b32.xlu1 %v1135_v0, %s3401_s19 }
 0xd1e   :  { %v1091_v14 = vpop.permute.xlu1 %1090 }
 0xd1f   :  { %v1093_v18 = vmul.f32 %v1091_v14, %v1085_v15 }
 0xd21   :  { %1095 = vrot.lane.b32.xlu0 %v1093_v18, %s3401_s19 }
 0xd7c   :  { %v1138_v24 = vpop.permute.xlu1 %1137 }
 0xd7d   :  { %v3864_v31 = vadd.f32 %v1138_v24, %v1130_v21 }
 0xd7f   :  { %2975 = vtanh.f32 %v3864_v31 }
 0xd85   :  { %v2976_v32 = vpop.eup %2975 }
 0xd86   :  { %1143 = vrot.lane.b32.xlu0 %v2976_v32, %s3404_s6 }
 0xd93   :  { %v1096_v61 = vpop.permute.xlu0 %1095 }
 0xd94   :  { %v3869_v34 = vadd.f32 %v1096_v61, %v1088_v33 }
 0xd96   :  { %2977 = vtanh.f32 %v3869_v34 }
 0xd9c   :  { %v2978_v1 = vpop.eup %2977 }
 0xd9d   :  { %1101 = vrot.lane.b32.xlu2 %v2978_v1, %s3404_s6 }
 0xdf7   :  { %v1102_v35 = vpop.permute.xlu2 %1101 }
 0xdf8   :  { %v1144_v51 = vpop.permute.xlu0 %1143  ;;  %v1104_v40 = vmul.f32 %v1102_v35, %v1085_v15  ;;  %v254_v35 = vadd.f32 %v3665_v45, %v3681_v56 }
 0xdf9   :  { %v1146_v43 = vmul.f32 %v1144_v51, %v1127_v50  ;;  %v234_v51 = vadd.f32 %v3829_v60, %v3679_v53 }
 0xdfa   :  { %1106 = vrot.lane.b32.xlu1 %v1104_v40, %s3401_s19 }
 0xdfb   :  { %1148 = vrot.lane.b32.xlu2 %v1146_v43, %s3404_s6 }
 0xe55   :  { %v1149_v44 = vpop.permute.xlu2 %1148 }
 0xe56   :  { %1151 = vst.msk [vmem:[#allocation2 + $0x10] sm:$0xff] %vm466_vm10, %v1149_v44 }
 0xe6c   :  { %v1107_v39 = vpop.permute.xlu1 %1106 }
 0xe6d   :  { %1109 = vst.msk [vmem:[#allocation2 + $0x28] sm:$0xff] %vm319_vm1, %v1107_v39  ;;  %v1152_v38 = vsel %vm319_vm1, %v1107_v39, %v1149_v44 }
 0xe6e   :  { %2809 = vmatmul.msk.f32.vlgmr.msra.gmra.mxu0 %vm170_vm0, %v1152_v38  ;;  %2810 = vmatmul.msk.f32.vlgmr.msra.gmra.mxu1 %vm170_vm0, %v1152_v38 }
 0xeeb   :  { %v1173_v54 = vpop.f32.mrf.mxu0  ;;  %v1193_v55 = vpop.f32.mrf.mxu1 }
 0xeec   :  { %v1197_v28 = vadd.f32 %v1173_v54, %v231_v42  ;;  %v1199_v41 = vadd.f32 %v1193_v55, %v257_v52 }
 0xeee   :  { %2979 = vtanh.f32 %v1197_v28  ;;  %v2811_v10 = vmul.f32 -1.442695, %v1197_v28  ;;  %v2812_v11 = vmul.f32 -1.442695, %v1199_v41 }
 0xeef   :  { %2981 = vtanh.f32 %v1199_v41 }
 0xef0   :  { %2983 = vpow2.f32 %v2811_v10 }
 0xef1   :  { %2985 = vpow2.f32 %v2812_v11 }
 0xef4   :  { %v2980_v57 = vpop.eup %2979 }
 0xef5   :  { %v2982_v58 = vpop.eup %2981  ;;  %1222 = vrot.lane.b32.xlu0 %v2980_v57, %s3404_s6 }
 0xef6   :  { %1264 = vrot.lane.b32.xlu1 %v2982_v58, %s3404_s6  ;;  %v2984_v46 = vpop.eup %2983 }
 0xef7   :  { %v2986_v12 = vpop.eup %2985  ;;  %v1203_v13 = vadd.f32 1.0, %v2984_v46 }
 0xef8   :  { %v1245_v26 = vadd.f32 1.0, %v2986_v12 }
 0xef9   :  { %2987 = vrcp.f32 %v1203_v13  ;;  %v1215_v27 = vand.u32 2147483648, %v1203_v13  ;;  %vm1209_vm14 = vweird.f32 %v1203_v13  ;;  %v1213_v30 = vand.u32 2147483647, %v1203_v13 }
 0xefa   :  { %2989 = vrcp.f32 %v1245_v26  ;;  %v1257_v29 = vand.u32 2147483648, %v1245_v26  ;;  %vm1251_vm15 = vweird.f32 %v1245_v26  ;;  %v1255_v36 = vand.u32 2147483647, %v1245_v26 }
 0xefb   :  { %v1216_v62 = vor.u32 1.1754944e-38, %v1215_v27  ;;  %vm1214_vm4 = vcmp.eq.f32.partialorder %v1213_v30, 8.507059e+37 }
 0xefc   :  { %v1258_v50 = vor.u32 1.1754944e-38, %v1257_v29  ;;  %vm1256_vm5 = vcmp.eq.f32.partialorder %v1255_v36, 8.507059e+37 }
 0xeff   :  { %v2988_v16 = vpop.eup %2987 }
 0xf00   :  { %v2990_v17 = vpop.eup %2989  ;;  %v1205_v19 = vmul.f32 %v2988_v16, %v1203_v13  ;;  %vm1210_vm12 = vweird.f32 %v2988_v16 }
 0xf01   :  { %v1247_v20 = vmul.f32 %v2990_v17, %v1245_v26  ;;  %vm1252_vm13 = vweird.f32 %v2990_v17  ;;  %vm1211_vm2 = vmor %vm1209_vm14, %vm1210_vm12 }
 0xf02   :  { %v1206_v47 = vsub.f32 1.0, %v1205_v19  ;;  %vm1253_vm3 = vmor %vm1251_vm15, %vm1252_vm13 }
 0xf03   :  { %v1248_v22 = vsub.f32 1.0, %v1247_v20 }
 0xf04   :  { %v1207_v59 = vmul.f32 %v2988_v16, %v1206_v47 }
 0xf05   :  { %v1249_v23 = vmul.f32 %v2990_v17, %v1248_v22 }
 0xf06   :  { %v1208_v25 = vadd.f32 %v2988_v16, %v1207_v59 }
 0xf07   :  { %v1250_v48 = vadd.f32 %v2990_v17, %v1249_v23 }
 0xf08   :  { %v1212_v37 = vsel %vm1211_vm2, %v2988_v16, %v1208_v25 }
 0xf09   :  { %v1254_v49 = vsel %vm1253_vm3, %v2990_v17, %v1250_v48  ;;  %v1217_v0 = vsel %vm1214_vm4, %v1216_v62, %v1212_v37 }
 0xf0a   :  { %v1259_v3 = vsel %vm1256_vm5, %v1258_v50, %v1254_v49  ;;  %v1220_v6 = vmul.f32 %v1217_v0, %v3869_v34 }
 0xf0b   :  { %v1262_v14 = vmul.f32 %v1259_v3, %v3864_v31 }
 0xf67   :  { %v1223_v63 = vpop.permute.xlu0 %1222 }
 0xf68   :  { %v1265_v2 = vpop.permute.xlu1 %1264  ;;  %v1225_v4 = vmul.f32 %v1223_v63, %v1217_v0 }
 0xf69   :  { %v1267_v5 = vmul.f32 %v1265_v2, %v1259_v3 }
 0xf6a   :  { %1227 = vrot.lane.b32.xlu2 %v1225_v4, %s3401_s19  ;;  %v1456_v4 = vld [vmem:[#allocation9 + $0x78] sm:$0xff] }
 0xf6b   :  { %1269 = vrot.lane.b32.xlu0 %v1267_v5, %s3401_s19  ;;  %v3923_v5 = vld [vmem:[#allocation10 + $0xf0] sm:$0xff]  ;;  %1537 = vmatpush.msrb.mxu1 %v1456_v4 }
 0xf6c   :  { %1627 = vmatpush.msra.mxu2 %v3923_v5 }
 0xfc4   :  { %v1228_v7 = vpop.permute.xlu2 %1227 }
 0xfc5   :  { %v3889_v8 = vadd.f32 %v1228_v7, %v1220_v6  ;;  %v1453_v6 = vld [vmem:[#allocation9 + $0x60] sm:$0xff]  ;;  %v1454_v7 = vld [vmem:[#allocation9 + $0x68] sm:$0xff] }
 0xfc6   :  { %1538 = vmatpush.msrb.mxu1 %v1454_v7 }
 0xfc7   :  { %2991 = vtanh.f32 %v3889_v8 }
 0xfcd   :  { %v2992_v9 = vpop.eup %2991 }
 0xfce   :  { %1233 = vrot.lane.b32.xlu1 %v2992_v9, %s3404_s6  ;;  %v3925_v9 = vld [vmem:[#allocation10 + $0xe0] sm:$0xff] }
 0xfcf   :  { %1628 = vmatpush.msra.mxu2 %v3925_v9 }
 0xfdd   :  { %v1270_v15 = vpop.permute.xlu0 %1269 }
 0xfde   :  { %v3894_v18 = vadd.f32 %v1270_v15, %v1262_v14  ;;  %v1452_v14 = vld [vmem:[#allocation9 + $0x58] sm:$0xff]  ;;  %v3928_v15 = vld [vmem:[#allocation10 + $0xd0] sm:$0xff] }
 0xfdf   :  { %1539 = vmatpush.msrb.mxu1 %v1452_v14  ;;  %1629 = vmatpush.msra.mxu2 %v3928_v15  ;;  %v1610_v14 = vld [vmem:[#allocation15 + $0x18] sm:$0xff] }
 0xfe0   :  { %2993 = vtanh.f32 %v3894_v18 }
 0xfe6   :  { %v2994_v21 = vpop.eup %2993 }
 0xfe7   :  { %1275 = vrot.lane.b32.xlu2 %v2994_v21, %s3404_s6  ;;  %v1450_v21 = vld [vmem:[#allocation9 + $0x48] sm:$0xff] }
 0xfe8   :  { %1540 = vmatpush.msrb.mxu1 %v1450_v21 }
0x1040   :  { %v1234_v24 = vpop.permute.xlu1 %1233 }
0x1041   :  { %v1276_v32 = vpop.permute.xlu2 %1275  ;;  %v1236_v33 = vmul.f32 %v1234_v24, %v1217_v0 }
0x1042   :  { %v1278_v61 = vmul.f32 %v1276_v32, %v1259_v3  ;;  %v1455_v3 = vld [vmem:[#allocation9 + $0x70] sm:$0xff] }
0x1043   :  { %1238 = vrot.lane.b32.xlu0 %v1236_v33, %s3401_s19  ;;  %1496 = vmatpush.msrb.mxu0 %v1455_v3  ;;  %v1608_v33 = vld [vmem:[#allocation13 + $0x18] sm:$0xff] }
0x1044   :  { %1280 = vrot.lane.b32.xlu1 %v1278_v61, %s3404_s6 }
0x1045   :  { %1497 = vmatpush.msrb.mxu0 %v1453_v6 }
0x10b5   :  { %v1239_v34 = vpop.permute.xlu0 %1238 }
0x10b6   :  { %1241 = vst.msk [vmem:[#allocation2 + $0x30] sm:$0xff] %vm319_vm1, %v1239_v34  ;;  %v1281_v31 = vpop.permute.xlu1 %1280 }
0x10b7   :  { %1283 = vst.msk [vmem:[#allocation2 + $0x8] sm:$0xff] %vm466_vm10, %v1281_v31  ;;  %v1284_v1 = vsel %vm319_vm1, %v1239_v34, %v1281_v31  ;;  %v3938_v31 = vld [vmem:[#allocation10 + $0xc0] sm:$0xff] }
0x10b8   :  { %2813 = vmatmul.msk.f32.vlgmr.msrb.gmra.mxu2 %vm170_vm0, %v1284_v1  ;;  %2814 = vmatmul.msk.f32.vlgmr.msrb.gmra.mxu3 %vm170_vm0, %v1284_v1  ;;  %v1447_v1 = vld [vmem:[#allocation9 + $0x30] sm:$0xff] }
0x10b9   :  { %1630 = vmatpush.msra.mxu2 %v3938_v31 }
0x113b   :  { %v1305_v40 = vpop.f32.mrf.mxu2  ;;  %v1325_v43 = vpop.f32.mrf.mxu3 }
0x113c   :  { %v1329_v44 = vadd.f32 %v1305_v40, %v234_v51  ;;  %v1331_v39 = vadd.f32 %v1325_v43, %v254_v35  ;;  %v1448_v35 = vld [vmem:[#allocation9 + $0x38] sm:$0xff]  ;;  %v3941_v51 = vld [vmem:[#allocation10 + $0xb0] sm:$0xff]  ;;  %v1445_v40 = vld [vmem:[#allocation9 + $0x20] sm:$0xff] }
0x113d   :  { %1541 = vmatpush.msrb.mxu1 %v1448_v35  ;;  %v1446_v43 = vld [vmem:[#allocation9 + $0x28] sm:$0xff]  ;;  %1631 = vmatpush.msra.mxu2 %v3941_v51 }
0x113e   :  { %2995 = vtanh.f32 %v1329_v44  ;;  %v2816_v42 = vmul.f32 -1.442695, %v1331_v39  ;;  %v2815_v56 = vmul.f32 -1.442695, %v1329_v44  ;;  %v3943_v44 = vld [vmem:[#allocation10 + $0xa0] sm:$0xff] }
0x113f   :  { %2997 = vtanh.f32 %v1331_v39  ;;  %v1443_v39 = vld [vmem:[#allocation9 + $0x10] sm:$0xff]  ;;  %1542 = vmatpush.msrb.mxu1 %v1446_v43  ;;  %1632 = vmatpush.msra.mxu2 %v3943_v44 }
0x1140   :  { %2999 = vpow2.f32 %v2816_v42  ;;  %v1441_v42 = vld [vmem:[#allocation9] sm:$0xff] }
0x1144   :  { %v2996_v38 = vpop.eup %2995 }
0x1145   :  { %v2998_v52 = vpop.eup %2997  ;;  %1354 = vrot.lane.b32.xlu1 %v2996_v38, %s3404_s6  ;;  %v1444_v38 = vld [vmem:[#allocation9 + $0x18] sm:$0xff] }
0x1146   :  { %1396 = vrot.lane.b32.xlu2 %v2998_v52, %s3404_s6  ;;  %v3000_v54 = vpop.eup %2999  ;;  %v3946_v52 = vld [vmem:[#allocation10 + $0x90] sm:$0xff]  ;;  %1543 = vmatpush.msrb.mxu1 %v1444_v38 }
0x1147   :  { %v1377_v55 = vadd.f32 1.0, %v3000_v54  ;;  %v1442_v54 = vld [vmem:[#allocation9 + $0x8] sm:$0xff]  ;;  %1633 = vmatpush.msra.mxu2 %v3946_v52 }
0x1148   :  { %1544 = vmatpush.msrb.mxu1 %v1442_v54 }
0x1149   :  { %3001 = vrcp.f32 %v1377_v55  ;;  %v1389_v10 = vand.u32 2147483648, %v1377_v55  ;;  %vm1383_vm7 = vweird.f32 %v1377_v55  ;;  %v1387_v11 = vand.u32 2147483647, %v1377_v55 }
0x114a   :  { %3003 = vpow2.f32 %v2815_v56  ;;  %v1604_v56 = vld [vmem:[#allocation13 + $0x10] sm:$0xff] }
0x114b   :  { %v1390_v12 = vor.u32 1.1754944e-38, %v1389_v10  ;;  %vm1388_vm9 = vcmp.eq.f32.partialorder %v1387_v11, 8.507059e+37  ;;  %v3990_v10 = vld [vmem:[#allocation10 + $0xd8] sm:$0xff]  ;;  %v3992_v11 = vld [vmem:[#allocation10 + $0xc8] sm:$0xff] }
0x114f   :  { %v3002_v45 = vpop.eup %3001 }
0x1150   :  { %v1379_v53 = vmul.f32 %v3002_v45, %v1377_v55  ;;  %v3004_v28 = vpop.eup %3003  ;;  %vm1384_vm6 = vweird.f32 %v3002_v45  ;;  %v3950_v55 = vld [vmem:[#allocation10 + $0x80] sm:$0xff] }
0x1151   :  { %v1335_v57 = vadd.f32 1.0, %v3004_v28  ;;  %vm1385_vm8 = vmor %vm1383_vm7, %vm1384_vm6  ;;  %1634 = vmatpush.msra.mxu2 %v3950_v55 }
0x1152   :  { %v1380_v60 = vsub.f32 1.0, %v1379_v53 }
0x1153   :  { %3005 = vrcp.f32 %v1335_v57  ;;  %v1347_v59 = vand.u32 2147483648, %v1335_v57  ;;  %vm1341_vm12 = vweird.f32 %v1335_v57  ;;  %v1345_v23 = vand.u32 2147483647, %v1335_v57  ;;  %1768 = vmatpush.msrb.mxu2 %v3923_v5 }
0x1154   :  { %v1381_v41 = vmul.f32 %v3002_v45, %v1380_v60 }
0x1155   :  { %v1348_v48 = vor.u32 1.1754944e-38, %v1347_v59  ;;  %vm1346_vm14 = vcmp.eq.f32.partialorder %v1345_v23, 8.507059e+37  ;;  %1769 = vmatpush.msrb.mxu2 %v3925_v9  ;;  %v1439_v59 = vld [vmem:[#allocation2 + $0x30] sm:$0xff] }
0x1156   :  { %v1382_v58 = vadd.f32 %v3002_v45, %v1381_v41  ;;  %v3973_v41 = vld [vmem:[#allocation10 + $0xf8] sm:$0xff] }
0x1157   :  { %1770 = vmatpush.msrb.mxu2 %v3928_v15  ;;  %1647 = vmatpush.msra.mxu3 %v3973_v41 }
0x1158   :  { %v1386_v46 = vsel %vm1385_vm8, %v3002_v45, %v1382_v58  ;;  %2190 = vmatpush.msra.mxu1 %v3973_v41  ;;  %v1434_v58 = vld [vmem:[#allocation2 + $0x8] sm:$0xff] }
0x1159   :  { %v1391_v26 = vsel %vm1388_vm9, %v1390_v12, %v1386_v46  ;;  %v3006_v16 = vpop.eup %3005  ;;  %1771 = vmatpush.msrb.mxu2 %v3938_v31  ;;  %v1606_v46 = vld [vmem:[#allocation15 + $0x10] sm:$0xff] }
0x115a   :  { %v1337_v19 = vmul.f32 %v3006_v16, %v1335_v57  ;;  %vm1342_vm11 = vweird.f32 %v3006_v16  ;;  %v1394_v36 = vmul.f32 %v1391_v26, %v3894_v18  ;;  %v1449_v18 = vld [vmem:[#allocation9 + $0x40] sm:$0xff]  ;;  %v3975_v57 = vld [vmem:[#allocation10 + $0xe8] sm:$0xff]  ;;  %v3996_v12 = vld [vmem:[#allocation10 + $0xb8] sm:$0xff] }
0x115b   :  { %vm1343_vm13 = vmor %vm1341_vm12, %vm1342_vm11  ;;  %1772 = vmatpush.msrb.mxu2 %v3941_v51  ;;  %1648 = vmatpush.msra.mxu3 %v3975_v57 }
0x115c   :  { %v1338_v20 = vsub.f32 1.0, %v1337_v19  ;;  %2191 = vmatpush.msra.mxu1 %v3975_v57  ;;  %v4018_v19 = vld [vmem:[#allocation10 + $0x88] sm:$0xff] }
0x115d   :  { %1773 = vmatpush.msrb.mxu2 %v3943_v44  ;;  %1649 = vmatpush.msra.mxu3 %v3990_v10 }
0x115e   :  { %v1339_v47 = vmul.f32 %v3006_v16, %v1338_v20  ;;  %2192 = vmatpush.msra.mxu1 %v3990_v10  ;;  %v1436_v20 = vld [vmem:[#allocation2 + $0x18] sm:$0xff] }
0x115f   :  { %1774 = vmatpush.msrb.mxu2 %v3946_v52  ;;  %1650 = vmatpush.msra.mxu3 %v3992_v11 }
0x1160   :  { %v1340_v22 = vadd.f32 %v3006_v16, %v1339_v47  ;;  %2193 = vmatpush.msra.mxu1 %v3992_v11  ;;  %v1437_v47 = vld [vmem:[#allocation2 + $0x20] sm:$0xff] }
0x1161   :  { %1775 = vmatpush.msrb.mxu2 %v3950_v55  ;;  %1651 = vmatpush.msra.mxu3 %v3996_v12 }
0x1162   :  { %v1344_v25 = vsel %vm1343_vm13, %v3006_v16, %v1340_v22  ;;  %2194 = vmatpush.msra.mxu1 %v3996_v12  ;;  %v1435_v16 = vld [vmem:[#allocation2 + $0x10] sm:$0xff]  ;;  %v1438_v22 = vld [vmem:[#allocation2 + $0x28] sm:$0xff] }
0x1163   :  { %v1349_v29 = vsel %vm1346_vm14, %v1348_v48, %v1344_v25  ;;  %v1458_v25 = vld [vmem:[#allocation12 + $0x2] sm:$0x3] }
0x1164   :  { %v1352_v50 = vmul.f32 %v1349_v29, %v3889_v8  ;;  %v1451_v8 = vld [vmem:[#allocation9 + $0x50] sm:$0xff]  ;;  %v1461_v48 = vperm.slane %v1458_v25, 1 }
0x1165   :  { %1498 = vmatpush.msrb.mxu0 %v1451_v8 }
0x1167   :  { %1499 = vmatpush.msrb.mxu0 %v1449_v18 }
0x1169   :  { %1500 = vmatpush.msrb.mxu0 %v1447_v1 }
0x116b   :  { %1501 = vmatpush.msrb.mxu0 %v1445_v40 }
0x116d   :  { %1502 = vmatpush.msrb.mxu0 %v1443_v39 }
0x116f   :  { %1503 = vmatpush.msrb.mxu0 %v1441_v42 }
0x1171   :  { %2170 = vmatpush.msra.mxu0 %v3923_v5 }
0x1173   :  { %2171 = vmatpush.msra.mxu0 %v3925_v9 }
0x1175   :  { %2172 = vmatpush.msra.mxu0 %v3928_v15 }
0x1177   :  { %2173 = vmatpush.msra.mxu0 %v3938_v31 }
0x1179   :  { %2174 = vmatpush.msra.mxu0 %v3941_v51 }
0x117b   :  { %2175 = vmatpush.msra.mxu0 %v3943_v44 }
0x117d   :  { %2176 = vmatpush.msra.mxu0 %v3946_v52 }
0x117f   :  { %2177 = vmatpush.msra.mxu0 %v3950_v55 }
0x11a0   :  { %v1397_v13 = vpop.permute.xlu2 %1396 }
0x11a1   :  { %v1399_v17 = vmul.f32 %v1397_v13, %v1391_v26  ;;  %v4002_v13 = vld [vmem:[#allocation10 + $0xa8] sm:$0xff] }
0x11a2   :  { %1652 = vmatpush.msra.mxu3 %v4002_v13  ;;  %2195 = vmatpush.msra.mxu1 %v4002_v13 }
0x11a3   :  { %1401 = vrot.lane.b32.xlu0 %v1399_v17, %s3401_s19  ;;  %v4016_v17 = vld [vmem:[#allocation10 + $0x98] sm:$0xff] }
0x11a4   :  { %1653 = vmatpush.msra.mxu3 %v4016_v17  ;;  %2196 = vmatpush.msra.mxu1 %v4016_v17 }
0x11a6   :  { %1654 = vmatpush.msra.mxu3 %v4018_v19  ;;  %2197 = vmatpush.msra.mxu1 %v4018_v19 }
0x11a8   :  { %1788 = vmatpush.msrb.mxu3 %v3973_v41 }
0x11aa   :  { %1789 = vmatpush.msrb.mxu3 %v3975_v57 }
0x11ac   :  { %1790 = vmatpush.msrb.mxu3 %v3990_v10 }
0x11ae   :  { %1791 = vmatpush.msrb.mxu3 %v3992_v11 }
0x11b0   :  { %1792 = vmatpush.msrb.mxu3 %v3996_v12 }
0x11b2   :  { %1793 = vmatpush.msrb.mxu3 %v4002_v13 }
0x11b4   :  { %1794 = vmatpush.msrb.mxu3 %v4016_v17 }
0x11b6   :  { %1795 = vmatpush.msrb.mxu3 %v4018_v19 }
0x11b7   :  { %v1355_v27 = vpop.permute.xlu1 %1354 }
0x11b8   :  { %v1357_v30 = vmul.f32 %v1355_v27, %v1349_v29 }
0x11ba   :  { %1359 = vrot.lane.b32.xlu0 %v1357_v30, %s3401_s19 }
0x1215   :  { %v1402_v37 = vpop.permute.xlu0 %1401 }
0x1216   :  { %v3914_v49 = vadd.f32 %v1402_v37, %v1394_v36  ;;  %v4066_v36 = vperm.slane %v1458_v25, 0 }
0x1218   :  { %3007 = vtanh.f32 %v3914_v49 }
0x121e   :  { %v3008_v62 = vpop.eup %3007 }
0x121f   :  { %1407 = vrot.lane.b32.xlu2 %v3008_v62, %s3404_s6 }
0x122c   :  { %v1360_v63 = vpop.permute.xlu0 %1359 }
0x122d   :  { %v3919_v0 = vadd.f32 %v1360_v63, %v1352_v50 }
0x122f   :  { %3009 = vtanh.f32 %v3919_v0 }
0x1235   :  { %v3010_v2 = vpop.eup %3009 }
0x1236   :  { %1365 = vrot.lane.b32.xlu2 %v3010_v2, %s3404_s6 }
0x1279   :  { %v1408_v24 = vpop.permute.xlu2 %1407 }
0x127a   :  { %v3932_v32 = vmul.f32 %v1408_v24, %v1391_v26 }
0x127c   :  { %1412 = vrot.lane.b32.xlu1 %v3932_v32, %s3404_s6 }
0x1284   :  { %1612 = vrot.lane.b32.xlu1 %v1608_v33, %s3401_s19 }
0x128c   :  { %1684 = vrot.lane.b32.xlu1 %v1606_v46, %s3401_s19 }
0x1290   :  { %v1366_v61 = vpop.permute.xlu2 %1365 }
0x1291   :  { %v1368_v34 = vmul.f32 %v1366_v61, %v1349_v29 }
0x1293   :  { %1370 = vrot.lane.b32.xlu0 %v1368_v34, %s3401_s19 }
0x12ee   :  { %v1413_v45 = vpop.permute.xlu1 %1412 }
0x12ef   :  { %1415 = vst.msk [vmem:[#allocation2] sm:$0xff] %vm466_vm10, %v1413_v45 }
0x12f6   :  { %v1613_v53 = vpop.permute.xlu1 %1612  ;;  %v1433_v60 = vld [vmem:[#allocation2] sm:$0xff] }
0x12f7   :  { %v1615_v28 = vsel %vm319_vm1, %v1604_v56, %v1613_v53  ;;  %2817 = vmatmul.msk.f32.vlgmr.msrb.gmra.mxu0 %vm170_vm0, %v1433_v60  ;;  %2825 = vmatmul.msk.f32.vlgmr.msrb.gmra.mxu1 %vm170_vm0, %v1433_v60 }
0x12f8   :  { %2833 = vmatmul.msk.f32.vlgmr.msra.gmra.mxu2 %vm170_vm0, %v1615_v28  ;;  %2434 = vmatpush.msrb.mxu0 %v3923_v5 }
0x12f9   :  { %1902 = vmatpush.msra.mxu2 %v3923_v5  ;;  %2834 = vmatmul.msk.f32.vlgmr.msra.gmra.mxu3 %vm170_vm0, %v1615_v28 }
0x12fa   :  { %2435 = vmatpush.msrb.mxu0 %v3925_v9  ;;  %2454 = vmatpush.msrb.mxu1 %v3973_v41 }
0x12fb   :  { %1903 = vmatpush.msra.mxu2 %v3925_v9  ;;  %1922 = vmatpush.msra.mxu3 %v3973_v41 }
0x12fc   :  { %2436 = vmatpush.msrb.mxu0 %v3928_v15  ;;  %2455 = vmatpush.msrb.mxu1 %v3975_v57 }
0x12fd   :  { %1904 = vmatpush.msra.mxu2 %v3928_v15  ;;  %1923 = vmatpush.msra.mxu3 %v3975_v57 }
0x12fe   :  { %2437 = vmatpush.msrb.mxu0 %v3938_v31  ;;  %2456 = vmatpush.msrb.mxu1 %v3990_v10 }
0x12ff   :  { %2818 = vmatmul.msk.f32.gmra.mxu0 %vm170_vm0, %v1434_v58  ;;  %2826 = vmatmul.msk.f32.gmra.mxu1 %vm170_vm0, %v1434_v58 }
0x1300   :  { %1905 = vmatpush.msra.mxu2 %v3938_v31  ;;  %2438 = vmatpush.msrb.mxu0 %v3941_v51 }
0x1301   :  { %2457 = vmatpush.msrb.mxu1 %v3992_v11  ;;  %1924 = vmatpush.msra.mxu3 %v3990_v10 }
0x1302   :  { %1906 = vmatpush.msra.mxu2 %v3941_v51  ;;  %2439 = vmatpush.msrb.mxu0 %v3943_v44 }
0x1303   :  { %2458 = vmatpush.msrb.mxu1 %v3996_v12  ;;  %1925 = vmatpush.msra.mxu3 %v3992_v11 }
0x1304   :  { %1907 = vmatpush.msra.mxu2 %v3943_v44  ;;  %2440 = vmatpush.msrb.mxu0 %v3946_v52 }
0x1305   :  { %v1371_v26 = vpop.permute.xlu0 %1370  ;;  %2459 = vmatpush.msrb.mxu1 %v4002_v13  ;;  %1926 = vmatpush.msra.mxu3 %v3996_v12 }
0x1306   :  { %1373 = vst.msk [vmem:[#allocation2 + $0x38] sm:$0xff] %vm319_vm1, %v1371_v26  ;;  %1908 = vmatpush.msra.mxu2 %v3946_v52  ;;  %2441 = vmatpush.msrb.mxu0 %v3950_v55 }
0x1307   :  { %1416 = vst.msk [vmem:[#allocation17] sm:$0xff] %vm319_vm1, %v1371_v26  ;;  %2819 = vmatmul.msk.f32.gmra.mxu0 %vm170_vm0, %v1435_v16  ;;  %2827 = vmatmul.msk.f32.gmra.mxu1 %vm170_vm0, %v1435_v16 }
0x1308   :  { %1909 = vmatpush.msra.mxu2 %v3950_v55  ;;  %2460 = vmatpush.msrb.mxu1 %v4016_v17 }
0x1309   :  { %1927 = vmatpush.msra.mxu3 %v4002_v13 }
0x130a   :  { %2461 = vmatpush.msrb.mxu1 %v4018_v19 }
0x130b   :  { %1928 = vmatpush.msra.mxu3 %v4016_v17 }
0x130d   :  { %1929 = vmatpush.msra.mxu3 %v4018_v19  ;;  %v1440_v23 = vld [vmem:[#allocation2 + $0x38] sm:$0xff] }
0x130f   :  { %2820 = vmatmul.msk.f32.gmra.mxu0 %vm170_vm0, %v1436_v20  ;;  %2828 = vmatmul.msk.f32.gmra.mxu1 %vm170_vm0, %v1436_v20 }
0x1317   :  { %2821 = vmatmul.msk.f32.gmra.mxu0 %vm170_vm0, %v1437_v47  ;;  %2829 = vmatmul.msk.f32.gmra.mxu1 %vm170_vm0, %v1437_v47 }
0x131f   :  { %2822 = vmatmul.msk.f32.gmra.mxu0 %vm170_vm0, %v1438_v22  ;;  %2830 = vmatmul.msk.f32.gmra.mxu1 %vm170_vm0, %v1438_v22 }
0x1327   :  { %2823 = vmatmul.msk.f32.gmra.mxu0 %vm170_vm0, %v1439_v59  ;;  %2831 = vmatmul.msk.f32.gmra.mxu1 %vm170_vm0, %v1439_v59 }
0x132f   :  { %2824 = vmatmul.msk.f32.gmra.mxu0 %vm170_vm0, %v1440_v23  ;;  %2832 = vmatmul.msk.f32.gmra.mxu1 %vm170_vm0, %v1440_v23 }
0x1374   :  { %v1505_v27 = vpop.f32.mrf.mxu0  ;;  %v1546_v29 = vpop.f32.mrf.mxu1 }
0x1375   :  { %v4064_v30 = vadd.f32 %v1546_v29, %v1461_v48  ;;  %v1506_v37 = vadd.f32 %v1505_v27, %v4066_v36 }
0x137b   :  { %v1636_v62 = vpop.f32.mrf.mxu2 }
0x137c   :  { %v1660_v50 = vadd.f32 %v1636_v62, %v1506_v37  ;;  %v4069_v63 = vpop.f32.mrf.mxu0  ;;  %v1549_v2 = vpop.f32.mrf.mxu1 }
0x137d   :  { %v4071_v3 = vadd.f32 %v1549_v2, %v1461_v48  ;;  %v1656_v56 = vpop.f32.mrf.mxu3 }
0x137e   :  { %3011 = vtanh.f32 %v1660_v50  ;;  %v2835_v28 = vmul.f32 -1.442695, %v1660_v50 }
0x1384   :  { %v3012_v4 = vpop.eup %3011  ;;  %v4073_v6 = vpop.f32.mrf.mxu0 }
0x1385   :  { %v1552_v7 = vpop.f32.mrf.mxu1  ;;  %1689 = vrot.lane.b32.xlu2 %v3012_v4, %s3404_s6 }
0x1386   :  { %v4075_v8 = vadd.f32 %v1552_v7, %v1461_v48 }
0x138c   :  { %v4078_v18 = vpop.f32.mrf.mxu0 }
0x138d   :  { %v1555_v21 = vpop.f32.mrf.mxu1  ;;  %1730 = vrot.lane.b32.xlu2 %v1610_v14, %s3401_s19 }
0x138e   :  { %v4080_v24 = vadd.f32 %v1555_v21, %v1461_v48 }
0x1394   :  { %v4083_v33 = vpop.f32.mrf.mxu0 }
0x1395   :  { %v1558_v61 = vpop.f32.mrf.mxu1 }
0x1396   :  { %v4085_v34 = vadd.f32 %v1558_v61, %v1461_v48 }
0x139c   :  { %v1520_v1 = vpop.f32.mrf.mxu0 }
0x139d   :  { %v1561_v35 = vpop.f32.mrf.mxu1  ;;  %v4088_v40 = vadd.f32 %v1520_v1, %v4066_v36 }
0x139e   :  { %v4090_v43 = vadd.f32 %v1561_v35, %v1461_v48 }
0x13a4   :  { %v1523_v39 = vpop.f32.mrf.mxu0 }
0x13a5   :  { %v1564_v38 = vpop.f32.mrf.mxu1  ;;  %v4093_v42 = vadd.f32 %v1523_v39, %v4066_v36 }
0x13a6   :  { %v4095_v54 = vadd.f32 %v1564_v38, %v1461_v48 }
0x13ad   :  { %v1567_v45 = vpop.f32.mrf.mxu1 }
0x13ae   :  { %v1568_v53 = vadd.f32 %v1567_v45, %v1461_v48 }
0x13b0   :  { %v1662_v60 = vadd.f32 %v1656_v56, %v1568_v53 }
0x13b2   :  { %3013 = vtanh.f32 %v1662_v60  ;;  %v2836_v50 = vmul.f32 -1.442695, %v1662_v60 }
0x13b3   :  { %3015 = vpow2.f32 %v2835_v28  ;;  %v1685_v28 = vpop.permute.xlu1 %1684 }
0x13b8   :  { %v3014_v58 = vpop.eup %3013 }
0x13b9   :  { %1735 = vrot.lane.b32.xlu0 %v3014_v58, %s3404_s6  ;;  %v3016_v46 = vpop.eup %3015 }
0x13ba   :  { %v1666_v26 = vadd.f32 1.0, %v3016_v46 }
0x13bc   :  { %3017 = vrcp.f32 %v1666_v26  ;;  %v1678_v23 = vand.u32 2147483648, %v1666_v26  ;;  %vm1672_vm2 = vweird.f32 %v1666_v26  ;;  %v1676_v25 = vand.u32 2147483647, %v1666_v26 }
0x13bd   :  { %3019 = vpow2.f32 %v2836_v50 }
0x13be   :  { %v1679_v27 = vor.u32 1.1754944e-38, %v1678_v23  ;;  %vm1677_vm4 = vcmp.eq.f32.partialorder %v1676_v25, 8.507059e+37 }
0x13c2   :  { %v3018_v16 = vpop.eup %3017 }
0x13c3   :  { %v1668_v20 = vmul.f32 %v3018_v16, %v1666_v26  ;;  %vm1673_vm15 = vweird.f32 %v3018_v16  ;;  %v3020_v2 = vpop.eup %3019 }
0x13c4   :  { %vm1674_vm3 = vmor %vm1672_vm2, %vm1673_vm15  ;;  %v1712_v4 = vadd.f32 1.0, %v3020_v2 }
0x13c5   :  { %v1669_v47 = vsub.f32 1.0, %v1668_v20 }
0x13c6   :  { %3021 = vrcp.f32 %v1712_v4  ;;  %v1724_v35 = vand.u32 2147483648, %v1712_v4  ;;  %vm1718_vm6 = vweird.f32 %v1712_v4  ;;  %v1722_v39 = vand.u32 2147483647, %v1712_v4 }
0x13c7   :  { %v1670_v22 = vmul.f32 %v3018_v16, %v1669_v47 }
0x13c8   :  { %v1725_v45 = vor.u32 1.1754944e-38, %v1724_v35  ;;  %vm1723_vm8 = vcmp.eq.f32.partialorder %v1722_v39, 8.507059e+37 }
0x13c9   :  { %v1671_v59 = vadd.f32 %v3018_v16, %v1670_v22 }
0x13cb   :  { %v1675_v48 = vsel %vm1674_vm3, %v3018_v16, %v1671_v59 }
0x13cc   :  { %v1680_v29 = vsel %vm1677_vm4, %v1679_v27, %v1675_v48  ;;  %v3022_v7 = vpop.eup %3021 }
0x13cd   :  { %v1714_v14 = vmul.f32 %v3022_v7, %v1712_v4  ;;  %vm1719_vm5 = vweird.f32 %v3022_v7  ;;  %v1687_v58 = vmul.f32 %v1685_v28, %v1680_v29 }
0x13ce   :  { %vm1720_vm7 = vmor %vm1718_vm6, %vm1719_vm5 }
0x13cf   :  { %v1715_v21 = vsub.f32 1.0, %v1714_v14 }
0x13d1   :  { %v1716_v61 = vmul.f32 %v3022_v7, %v1715_v21 }
0x13d3   :  { %v1717_v1 = vadd.f32 %v3022_v7, %v1716_v61 }
0x13d5   :  { %v1721_v38 = vsel %vm1720_vm7, %v3022_v7, %v1717_v1 }
0x13d6   :  { %v1726_v56 = vsel %vm1723_vm8, %v1725_v45, %v1721_v38 }
0x13df   :  { %v1690_v37 = vpop.permute.xlu2 %1689 }
0x13e0   :  { %v1692_v62 = vmul.f32 %v1690_v37, %v1680_v29 }
0x13e2   :  { %1694 = vrot.lane.b32.xlu0 %v1692_v62, %s3401_s19 }
0x13e7   :  { %v1731_v20 = vpop.permute.xlu2 %1730 }
0x13e8   :  { %v1733_v47 = vmul.f32 %v1731_v20, %v1726_v56 }
0x142b   :  { %v1736_v53 = vpop.permute.xlu0 %1735 }
0x142c   :  { %v1738_v60 = vmul.f32 %v1736_v53, %v1726_v56 }
0x142e   :  { %1740 = vrot.lane.b32.xlu1 %v1738_v60, %s3401_s19 }
0x1454   :  { %v1695_v46 = vpop.permute.xlu0 %1694 }
0x1455   :  { %v4100_v26 = vadd.f32 %v1695_v46, %v1687_v58 }
0x1457   :  { %3023 = vtanh.f32 %v4100_v26 }
0x145d   :  { %v3024_v16 = vpop.eup %3023 }
0x145e   :  { %1700 = vrot.lane.b32.xlu2 %v3024_v16, %s3404_s6 }
0x14a0   :  { %v1741_v22 = vpop.permute.xlu1 %1740 }
0x14a1   :  { %v4104_v59 = vadd.f32 %v1741_v22, %v1733_v47 }
0x14a3   :  { %3025 = vtanh.f32 %v4104_v59 }
0x14a9   :  { %v3026_v23 = vpop.eup %3025 }
0x14aa   :  { %1746 = vrot.lane.b32.xlu0 %v3026_v23, %s3404_s6 }
0x14b8   :  { %v1701_v25 = vpop.permute.xlu2 %1700 }
0x14b9   :  { %v1703_v48 = vmul.f32 %v1701_v25, %v1680_v29  ;;  %v1509_v29 = vadd.f32 %v4069_v63, %v4066_v36 }
0x14bb   :  { %1705 = vrot.lane.b32.xlu1 %v1703_v48, %s3401_s19 }
0x151c   :  { %v1747_v27 = vpop.permute.xlu0 %1746 }
0x151d   :  { %v1749_v37 = vmul.f32 %v1747_v27, %v1726_v56 }
0x151f   :  { %1751 = vrot.lane.b32.xlu2 %v1749_v37, %s3404_s6 }
0x152d   :  { %v1706_v62 = vpop.permute.xlu1 %1705 }
0x152e   :  { %1708 = vst.msk [vmem:[#allocation16] sm:$0xff] %vm319_vm1, %v1706_v62 }
0x1579   :  { %v1752_v50 = vpop.permute.xlu2 %1751 }
0x157a   :  { %1755 = vst.msk [vmem:[#allocation16 + $0x38] sm:$0xff] %vm466_vm10, %v1752_v50  ;;  %v1756_v2 = vsel %vm319_vm1, %v1706_v62, %v1752_v50 }
0x157b   :  { %2837 = vmatmul.msk.f32.vlgmr.msrb.gmra.mxu2 %vm170_vm0, %v1756_v2  ;;  %2838 = vmatmul.msk.f32.vlgmr.msrb.gmra.mxu3 %vm170_vm0, %v1756_v2 }
0x157c   :  { %2036 = vmatpush.msrb.mxu2 %v3923_v5  ;;  %2056 = vmatpush.msrb.mxu3 %v3973_v41 }
0x157e   :  { %2037 = vmatpush.msrb.mxu2 %v3925_v9  ;;  %2057 = vmatpush.msrb.mxu3 %v3975_v57 }
0x1580   :  { %2038 = vmatpush.msrb.mxu2 %v3928_v15  ;;  %2058 = vmatpush.msrb.mxu3 %v3990_v10 }
0x1582   :  { %2039 = vmatpush.msrb.mxu2 %v3938_v31  ;;  %2059 = vmatpush.msrb.mxu3 %v3992_v11 }
0x1584   :  { %2040 = vmatpush.msrb.mxu2 %v3941_v51  ;;  %2060 = vmatpush.msrb.mxu3 %v3996_v12 }
0x1586   :  { %2041 = vmatpush.msrb.mxu2 %v3943_v44  ;;  %2061 = vmatpush.msrb.mxu3 %v4002_v13 }
0x1588   :  { %2042 = vmatpush.msrb.mxu2 %v3946_v52  ;;  %2062 = vmatpush.msrb.mxu3 %v4016_v17 }
0x158a   :  { %2043 = vmatpush.msrb.mxu2 %v3950_v55  ;;  %2063 = vmatpush.msrb.mxu3 %v4018_v19 }
0x15fe   :  { %v1777_v4 = vpop.f32.mrf.mxu2  ;;  %v1797_v7 = vpop.f32.mrf.mxu3 }
0x15ff   :  { %v1801_v14 = vadd.f32 %v1777_v4, %v1509_v29  ;;  %v1803_v21 = vadd.f32 %v1797_v7, %v4095_v54 }
0x1601   :  { %3027 = vtanh.f32 %v1801_v14  ;;  %v2839_v35 = vmul.f32 -1.442695, %v1801_v14  ;;  %v2840_v39 = vmul.f32 -1.442695, %v1803_v21 }
0x1602   :  { %3029 = vtanh.f32 %v1803_v21 }
0x1603   :  { %3031 = vpow2.f32 %v2839_v35 }
0x1604   :  { %3033 = vpow2.f32 %v2840_v39 }
0x1607   :  { %v3028_v61 = vpop.eup %3027 }
0x1608   :  { %v3030_v1 = vpop.eup %3029  ;;  %1826 = vrot.lane.b32.xlu0 %v3028_v61, %s3404_s6 }
0x1609   :  { %1869 = vrot.lane.b32.xlu1 %v3030_v1, %s3404_s6  ;;  %v3032_v38 = vpop.eup %3031 }
0x160a   :  { %v3034_v45 = vpop.eup %3033  ;;  %v1807_v63 = vadd.f32 1.0, %v3032_v38 }
0x160b   :  { %v1850_v56 = vadd.f32 1.0, %v3034_v45 }
0x160c   :  { %3035 = vrcp.f32 %v1807_v63  ;;  %v1819_v23 = vand.u32 2147483648, %v1807_v63  ;;  %vm1813_vm12 = vweird.f32 %v1807_v63  ;;  %v1817_v48 = vand.u32 2147483647, %v1807_v63 }
0x160d   :  { %3037 = vrcp.f32 %v1850_v56  ;;  %v1862_v25 = vand.u32 2147483648, %v1850_v56  ;;  %vm1856_vm13 = vweird.f32 %v1850_v56  ;;  %v1860_v27 = vand.u32 2147483647, %v1850_v56 }
0x160e   :  { %v1820_v50 = vor.u32 1.1754944e-38, %v1819_v23  ;;  %vm1818_vm2 = vcmp.eq.f32.partialorder %v1817_v48, 8.507059e+37 }
0x160f   :  { %v1863_v2 = vor.u32 1.1754944e-38, %v1862_v25  ;;  %vm1861_vm3 = vcmp.eq.f32.partialorder %v1860_v27, 8.507059e+37 }
0x1612   :  { %v3036_v53 = vpop.eup %3035 }
0x1613   :  { %v3038_v54 = vpop.eup %3037  ;;  %v1809_v60 = vmul.f32 %v3036_v53, %v1807_v63  ;;  %vm1814_vm9 = vweird.f32 %v3036_v53 }
0x1614   :  { %v1852_v28 = vmul.f32 %v3038_v54, %v1850_v56  ;;  %vm1857_vm11 = vweird.f32 %v3038_v54  ;;  %vm1815_vm14 = vmor %vm1813_vm12, %vm1814_vm9 }
0x1615   :  { %v1810_v58 = vsub.f32 1.0, %v1809_v60  ;;  %vm1858_vm15 = vmor %vm1856_vm13, %vm1857_vm11 }
0x1616   :  { %v1853_v46 = vsub.f32 1.0, %v1852_v28 }
0x1617   :  { %v1811_v16 = vmul.f32 %v3036_v53, %v1810_v58 }
0x1618   :  { %v1854_v20 = vmul.f32 %v3038_v54, %v1853_v46 }
0x1619   :  { %v1812_v47 = vadd.f32 %v3036_v53, %v1811_v16  ;;  %v1512_v16 = vadd.f32 %v4073_v6, %v4066_v36 }
0x161a   :  { %v1855_v22 = vadd.f32 %v3038_v54, %v1854_v20 }
0x161b   :  { %v1816_v37 = vsel %vm1815_vm14, %v3036_v53, %v1812_v47 }
0x161c   :  { %v1859_v62 = vsel %vm1858_vm15, %v3038_v54, %v1855_v22  ;;  %v1821_v4 = vsel %vm1818_vm2, %v1820_v50, %v1816_v37 }
0x161d   :  { %v1864_v14 = vsel %vm1861_vm3, %v1863_v2, %v1859_v62  ;;  %v1824_v1 = vmul.f32 %v1821_v4, %v4100_v26 }
0x161e   :  { %v1867_v45 = vmul.f32 %v1864_v14, %v4104_v59 }
0x167a   :  { %v1827_v29 = vpop.permute.xlu0 %1826 }
0x167b   :  { %v1870_v7 = vpop.permute.xlu1 %1869  ;;  %v1829_v21 = vmul.f32 %v1827_v29, %v1821_v4 }
0x167c   :  { %v1872_v61 = vmul.f32 %v1870_v7, %v1864_v14 }
0x167d   :  { %1831 = vrot.lane.b32.xlu2 %v1829_v21, %s3401_s19 }
0x167e   :  { %1874 = vrot.lane.b32.xlu0 %v1872_v61, %s3401_s19 }
0x16d7   :  { %v1832_v35 = vpop.permute.xlu2 %1831 }
0x16d8   :  { %v4139_v39 = vadd.f32 %v1832_v35, %v1824_v1 }
0x16da   :  { %3039 = vtanh.f32 %v4139_v39 }
0x16e0   :  { %v3040_v38 = vpop.eup %3039 }
0x16e1   :  { %1837 = vrot.lane.b32.xlu1 %v3040_v38, %s3404_s6 }
0x16f0   :  { %v1875_v63 = vpop.permute.xlu0 %1874 }
0x16f1   :  { %v4144_v56 = vadd.f32 %v1875_v63, %v1867_v45 }
0x16f3   :  { %3041 = vtanh.f32 %v4144_v56 }
0x16f9   :  { %v3042_v53 = vpop.eup %3041 }
0x16fa   :  { %1880 = vrot.lane.b32.xlu2 %v3042_v53, %s3404_s6 }
0x1753   :  { %v1838_v54 = vpop.permute.xlu1 %1837 }
0x1754   :  { %v1881_v26 = vpop.permute.xlu2 %1880  ;;  %v1840_v60 = vmul.f32 %v1838_v54, %v1821_v4 }
0x1755   :  { %v1883_v28 = vmul.f32 %v1881_v26, %v1864_v14 }
0x1756   :  { %1842 = vrot.lane.b32.xlu0 %v1840_v60, %s3401_s19 }
0x1757   :  { %1885 = vrot.lane.b32.xlu1 %v1883_v28, %s3404_s6 }
0x17c8   :  { %v1843_v58 = vpop.permute.xlu0 %1842 }
0x17c9   :  { %1846 = vst.msk [vmem:[#allocation16 + $0x8] sm:$0xff] %vm319_vm1, %v1843_v58  ;;  %v1886_v59 = vpop.permute.xlu1 %1885 }
0x17ca   :  { %1889 = vst.msk [vmem:[#allocation16 + $0x30] sm:$0xff] %vm466_vm10, %v1886_v59  ;;  %v1890_v46 = vsel %vm319_vm1, %v1843_v58, %v1886_v59 }
0x17cb   :  { %2841 = vmatmul.msk.f32.vlgmr.msra.gmra.mxu2 %vm170_vm0, %v1890_v46  ;;  %2842 = vmatmul.msk.f32.vlgmr.msra.gmra.mxu3 %vm170_vm0, %v1890_v46 }
0x17cc   :  { %2302 = vmatpush.msra.mxu2 %v3923_v5  ;;  %2322 = vmatpush.msra.mxu3 %v3973_v41 }
0x17ce   :  { %2303 = vmatpush.msra.mxu2 %v3925_v9  ;;  %2323 = vmatpush.msra.mxu3 %v3975_v57 }
0x17d0   :  { %2304 = vmatpush.msra.mxu2 %v3928_v15  ;;  %2324 = vmatpush.msra.mxu3 %v3990_v10 }
0x17d2   :  { %2305 = vmatpush.msra.mxu2 %v3938_v31  ;;  %2325 = vmatpush.msra.mxu3 %v3992_v11 }
0x17d4   :  { %2306 = vmatpush.msra.mxu2 %v3941_v51  ;;  %2326 = vmatpush.msra.mxu3 %v3996_v12 }
0x17d6   :  { %2307 = vmatpush.msra.mxu2 %v3943_v44  ;;  %2327 = vmatpush.msra.mxu3 %v4002_v13 }
0x17d8   :  { %2308 = vmatpush.msra.mxu2 %v3946_v52  ;;  %2328 = vmatpush.msra.mxu3 %v4016_v17 }
0x17da   :  { %2309 = vmatpush.msra.mxu2 %v3950_v55  ;;  %2329 = vmatpush.msra.mxu3 %v4018_v19 }
0x184e   :  { %v1911_v20 = vpop.f32.mrf.mxu2  ;;  %v1931_v47 = vpop.f32.mrf.mxu3 }
0x184f   :  { %v1935_v22 = vadd.f32 %v1911_v20, %v1512_v16  ;;  %v1937_v23 = vadd.f32 %v1931_v47, %v4090_v43 }
0x1851   :  { %3043 = vtanh.f32 %v1935_v22  ;;  %v2843_v27 = vmul.f32 -1.442695, %v1935_v22  ;;  %v2844_v6 = vmul.f32 -1.442695, %v1937_v23 }
0x1852   :  { %3045 = vtanh.f32 %v1937_v23 }
0x1853   :  { %3047 = vpow2.f32 %v2843_v27 }
0x1857   :  { %v3044_v25 = vpop.eup %3043 }
0x1858   :  { %v3046_v48 = vpop.eup %3045  ;;  %1960 = vrot.lane.b32.xlu2 %v3044_v25, %s3404_s6 }
0x1859   :  { %2003 = vrot.lane.b32.xlu0 %v3046_v48, %s3404_s6  ;;  %v3048_v37 = vpop.eup %3047 }
0x185a   :  { %v1941_v62 = vadd.f32 1.0, %v3048_v37 }
0x185c   :  { %3049 = vrcp.f32 %v1941_v62  ;;  %v1953_v21 = vand.u32 2147483648, %v1941_v62  ;;  %vm1947_vm5 = vweird.f32 %v1941_v62  ;;  %v1951_v61 = vand.u32 2147483647, %v1941_v62 }
0x185d   :  { %3051 = vpow2.f32 %v2844_v6 }
0x185e   :  { %v1954_v35 = vor.u32 1.1754944e-38, %v1953_v21  ;;  %vm1952_vm7 = vcmp.eq.f32.partialorder %v1951_v61, 8.507059e+37 }
0x1862   :  { %v3050_v50 = vpop.eup %3049 }
0x1863   :  { %v1943_v2 = vmul.f32 %v3050_v50, %v1941_v62  ;;  %v3052_v43 = vpop.eup %3051  ;;  %vm1948_vm4 = vweird.f32 %v3050_v50 }
0x1864   :  { %v1984_v7 = vadd.f32 1.0, %v3052_v43  ;;  %vm1949_vm6 = vmor %vm1947_vm5, %vm1948_vm4 }
0x1865   :  { %v1944_v29 = vsub.f32 1.0, %v1943_v2 }
0x1866   :  { %3053 = vrcp.f32 %v1984_v7  ;;  %v1996_v58 = vand.u32 2147483648, %v1984_v7  ;;  %vm1990_vm9 = vweird.f32 %v1984_v7  ;;  %v1994_v59 = vand.u32 2147483647, %v1984_v7 }
0x1867   :  { %v1945_v4 = vmul.f32 %v3050_v50, %v1944_v29 }
0x1868   :  { %v1997_v16 = vor.u32 1.1754944e-38, %v1996_v58  ;;  %vm1995_vm12 = vcmp.eq.f32.partialorder %v1994_v59, 8.507059e+37 }
0x1869   :  { %v1946_v14 = vadd.f32 %v3050_v50, %v1945_v4 }
0x186b   :  { %v1950_v1 = vsel %vm1949_vm6, %v3050_v50, %v1946_v14 }
0x186c   :  { %v1955_v45 = vsel %vm1952_vm7, %v1954_v35, %v1950_v1  ;;  %v3054_v53 = vpop.eup %3053 }
0x186d   :  { %v1986_v54 = vmul.f32 %v3054_v53, %v1984_v7  ;;  %vm1991_vm8 = vweird.f32 %v3054_v53  ;;  %v1958_v23 = vmul.f32 %v1955_v45, %v4139_v39 }
0x186e   :  { %vm1992_vm11 = vmor %vm1990_vm9, %vm1991_vm8 }
0x186f   :  { %v1987_v26 = vsub.f32 1.0, %v1986_v54 }
0x1871   :  { %v1988_v60 = vmul.f32 %v3054_v53, %v1987_v26 }
0x1873   :  { %v1989_v28 = vadd.f32 %v3054_v53, %v1988_v60 }
0x1875   :  { %v1993_v46 = vsel %vm1992_vm11, %v3054_v53, %v1989_v28 }
0x1876   :  { %v1998_v47 = vsel %vm1995_vm12, %v1997_v16, %v1993_v46 }
0x1877   :  { %v2001_v25 = vmul.f32 %v1998_v47, %v4144_v56 }
0x18b2   :  { %v1961_v38 = vpop.permute.xlu2 %1960 }
0x18b3   :  { %v1963_v63 = vmul.f32 %v1961_v38, %v1955_v45 }
0x18b5   :  { %1965 = vrot.lane.b32.xlu1 %v1963_v63, %s3401_s19 }
0x18cb   :  { %v2004_v20 = vpop.permute.xlu0 %2003 }
0x18cc   :  { %v2006_v22 = vmul.f32 %v2004_v20, %v1998_v47 }
0x18ce   :  { %2008 = vrot.lane.b32.xlu2 %v2006_v22, %s3401_s19 }
0x1927   :  { %v1966_v48 = vpop.permute.xlu1 %1965 }
0x1928   :  { %v2009_v27 = vpop.permute.xlu2 %2008  ;;  %v4180_v37 = vadd.f32 %v1966_v48, %v1958_v23 }
0x1929   :  { %v4182_v62 = vadd.f32 %v2009_v27, %v2001_v25 }
0x192a   :  { %3055 = vtanh.f32 %v4180_v37 }
0x192b   :  { %3057 = vtanh.f32 %v4182_v62 }
0x1930   :  { %v3056_v50 = vpop.eup %3055 }
0x1931   :  { %v3058_v6 = vpop.eup %3057  ;;  %1971 = vrot.lane.b32.xlu0 %v3056_v50, %s3404_s6 }
0x1932   :  { %2014 = vrot.lane.b32.xlu1 %v3058_v6, %s3404_s6 }
0x19a3   :  { %v1972_v2 = vpop.permute.xlu0 %1971 }
0x19a4   :  { %v2015_v39 = vpop.permute.xlu1 %2014  ;;  %v1974_v29 = vmul.f32 %v1972_v2, %v1955_v45 }
0x19a5   :  { %v2017_v56 = vmul.f32 %v2015_v39, %v1998_v47 }
0x19a6   :  { %1976 = vrot.lane.b32.xlu2 %v1974_v29, %s3401_s19 }
0x19a7   :  { %2019 = vrot.lane.b32.xlu0 %v2017_v56, %s3404_s6 }
0x1a00   :  { %v1977_v4 = vpop.permute.xlu2 %1976 }
0x1a01   :  { %1980 = vst.msk [vmem:[#allocation16 + $0x10] sm:$0xff] %vm319_vm1, %v1977_v4 }
0x1a19   :  { %v2020_v43 = vpop.permute.xlu0 %2019 }
0x1a1a   :  { %2023 = vst.msk [vmem:[#allocation16 + $0x28] sm:$0xff] %vm466_vm10, %v2020_v43  ;;  %v2024_v7 = vsel %vm319_vm1, %v1977_v4, %v2020_v43 }
0x1a1b   :  { %2845 = vmatmul.msk.f32.vlgmr.msrb.gmra.mxu2 %vm170_vm0, %v2024_v7  ;;  %2846 = vmatmul.msk.f32.vlgmr.msrb.gmra.mxu3 %vm170_vm0, %v2024_v7  ;;  %v4235_v7 = vpop.f32.mrf.mxu0 }
0x1a1c   :  { %2566 = vmatpush.msrb.mxu2 %v3923_v5  ;;  %2586 = vmatpush.msrb.mxu3 %v3973_v41  ;;  %v1515_v5 = vadd.f32 %v4078_v18, %v4066_v36 }
0x1a1e   :  { %2567 = vmatpush.msrb.mxu2 %v3925_v9  ;;  %2587 = vmatpush.msrb.mxu3 %v3975_v57 }
0x1a20   :  { %2568 = vmatpush.msrb.mxu2 %v3928_v15  ;;  %2588 = vmatpush.msrb.mxu3 %v3990_v10 }
0x1a22   :  { %2569 = vmatpush.msrb.mxu2 %v3938_v31  ;;  %2589 = vmatpush.msrb.mxu3 %v3992_v11 }
0x1a24   :  { %2570 = vmatpush.msrb.mxu2 %v3941_v51  ;;  %2590 = vmatpush.msrb.mxu3 %v3996_v12 }
0x1a26   :  { %2571 = vmatpush.msrb.mxu2 %v3943_v44  ;;  %2591 = vmatpush.msrb.mxu3 %v4002_v13 }
0x1a28   :  { %2572 = vmatpush.msrb.mxu2 %v3946_v52  ;;  %2592 = vmatpush.msrb.mxu3 %v4016_v17 }
0x1a2a   :  { %2573 = vmatpush.msrb.mxu2 %v3950_v55  ;;  %2593 = vmatpush.msrb.mxu3 %v4018_v19 }
0x1a9e   :  { %v2045_v9 = vpop.f32.mrf.mxu2  ;;  %v2065_v15 = vpop.f32.mrf.mxu3 }
0x1a9f   :  { %v2069_v31 = vadd.f32 %v2045_v9, %v1515_v5  ;;  %v2071_v51 = vadd.f32 %v2065_v15, %v4085_v34  ;;  %v1518_v5 = vadd.f32 %v4083_v33, %v4066_v36 }
0x1aa1   :  { %3059 = vtanh.f32 %v2069_v31  ;;  %v2848_v52 = vmul.f32 -1.442695, %v2071_v51  ;;  %v2847_v11 = vmul.f32 -1.442695, %v2069_v31 }
0x1aa2   :  { %3061 = vtanh.f32 %v2071_v51 }
0x1aa3   :  { %3063 = vpow2.f32 %v2848_v52 }
0x1aa7   :  { %v3060_v44 = vpop.eup %3059 }
0x1aa8   :  { %v3062_v41 = vpop.eup %3061  ;;  %2094 = vrot.lane.b32.xlu1 %v3060_v44, %s3404_s6 }
0x1aa9   :  { %2137 = vrot.lane.b32.xlu2 %v3062_v41, %s3404_s6  ;;  %v3064_v55 = vpop.eup %3063 }
0x1aaa   :  { %v2118_v57 = vadd.f32 1.0, %v3064_v55 }
0x1aac   :  { %3065 = vrcp.f32 %v2118_v57  ;;  %v2130_v14 = vand.u32 2147483648, %v2118_v57  ;;  %vm2124_vm14 = vweird.f32 %v2118_v57  ;;  %v2128_v21 = vand.u32 2147483647, %v2118_v57 }
0x1aad   :  { %3067 = vpow2.f32 %v2847_v11 }
0x1aae   :  { %v2131_v1 = vor.u32 1.1754944e-38, %v2130_v14  ;;  %vm2129_vm2 = vcmp.eq.f32.partialorder %v2128_v21, 8.507059e+37 }
0x1ab2   :  { %v3066_v10 = vpop.eup %3065 }
0x1ab3   :  { %v2120_v12 = vmul.f32 %v3066_v10, %v2118_v57  ;;  %v3068_v17 = vpop.eup %3067  ;;  %vm2125_vm13 = vweird.f32 %v3066_v10 }
0x1ab4   :  { %v2075_v18 = vadd.f32 1.0, %v3068_v17  ;;  %vm2126_vm15 = vmor %vm2124_vm14, %vm2125_vm13 }
0x1ab5   :  { %v2121_v13 = vsub.f32 1.0, %v2120_v12 }
0x1ab6   :  { %3069 = vrcp.f32 %v2075_v18  ;;  %v2087_v28 = vand.u32 2147483648, %v2075_v18  ;;  %vm2081_vm4 = vweird.f32 %v2075_v18  ;;  %v2085_v58 = vand.u32 2147483647, %v2075_v18 }
0x1ab7   :  { %v2122_v19 = vmul.f32 %v3066_v10, %v2121_v13 }
0x1ab8   :  { %v2088_v46 = vor.u32 1.1754944e-38, %v2087_v28  ;;  %vm2086_vm6 = vcmp.eq.f32.partialorder %v2085_v58, 8.507059e+37 }
0x1ab9   :  { %v2123_v34 = vadd.f32 %v3066_v10, %v2122_v19 }
0x1abb   :  { %v2127_v61 = vsel %vm2126_vm15, %v3066_v10, %v2123_v34 }
0x1abc   :  { %v2132_v38 = vsel %vm2129_vm2, %v2131_v1, %v2127_v61  ;;  %v3070_v45 = vpop.eup %3069 }
0x1abd   :  { %v2077_v53 = vmul.f32 %v3070_v45, %v2075_v18  ;;  %vm2082_vm3 = vweird.f32 %v3070_v45  ;;  %v2135_v22 = vmul.f32 %v2132_v38, %v4182_v62 }
0x1abe   :  { %vm2083_vm5 = vmor %vm2081_vm4, %vm2082_vm3 }
0x1abf   :  { %v2078_v54 = vsub.f32 1.0, %v2077_v53 }
0x1ac1   :  { %v2079_v26 = vmul.f32 %v3070_v45, %v2078_v54 }
0x1ac3   :  { %v2080_v60 = vadd.f32 %v3070_v45, %v2079_v26 }
0x1ac5   :  { %v2084_v59 = vsel %vm2083_vm5, %v3070_v45, %v2080_v60 }
0x1ac6   :  { %v2089_v20 = vsel %vm2086_vm6, %v2088_v46, %v2084_v59 }
0x1ac7   :  { %v2092_v27 = vmul.f32 %v2089_v20, %v4180_v37 }
0x1b03   :  { %v2138_v35 = vpop.permute.xlu2 %2137 }
0x1b04   :  { %v2140_v63 = vmul.f32 %v2138_v35, %v2132_v38 }
0x1b06   :  { %2142 = vrot.lane.b32.xlu1 %v2140_v63, %s3401_s19 }
0x1b1a   :  { %v2095_v16 = vpop.permute.xlu1 %2094 }
0x1b1b   :  { %v2097_v47 = vmul.f32 %v2095_v16, %v2089_v20 }
0x1b1d   :  { %2099 = vrot.lane.b32.xlu0 %v2097_v47, %s3401_s19 }
0x1b78   :  { %v2143_v23 = vpop.permute.xlu1 %2142 }
0x1b79   :  { %v4219_v25 = vadd.f32 %v2143_v23, %v2135_v22 }
0x1b7b   :  { %3071 = vtanh.f32 %v4219_v25 }
0x1b81   :  { %v3072_v48 = vpop.eup %3071 }
0x1b82   :  { %2148 = vrot.lane.b32.xlu0 %v3072_v48, %s3404_s6 }
0x1b8f   :  { %v2100_v50 = vpop.permute.xlu0 %2099 }
0x1b90   :  { %v4224_v6 = vadd.f32 %v2100_v50, %v2092_v27 }
0x1b92   :  { %3073 = vtanh.f32 %v4224_v6 }
0x1b98   :  { %v3074_v2 = vpop.eup %3073 }
0x1b99   :  { %2105 = vrot.lane.b32.xlu2 %v3074_v2, %s3404_s6 }
0x1bf3   :  { %v2106_v39 = vpop.permute.xlu2 %2105 }
0x1bf4   :  { %v2149_v62 = vpop.permute.xlu0 %2148  ;;  %v2108_v29 = vmul.f32 %v2106_v39, %v2089_v20 }
0x1bf5   :  { %v2151_v56 = vmul.f32 %v2149_v62, %v2132_v38 }
0x1bf6   :  { %2110 = vrot.lane.b32.xlu1 %v2108_v29, %s3401_s19 }
0x1bf7   :  { %2153 = vrot.lane.b32.xlu2 %v2151_v56, %s3404_s6 }
0x1c51   :  { %v2154_v4 = vpop.permute.xlu2 %2153 }
0x1c52   :  { %2157 = vst.msk [vmem:[#allocation16 + $0x20] sm:$0xff] %vm466_vm10, %v2154_v4 }
0x1c68   :  { %v2111_v37 = vpop.permute.xlu1 %2110 }
0x1c69   :  { %2114 = vst.msk [vmem:[#allocation16 + $0x18] sm:$0xff] %vm319_vm1, %v2111_v37  ;;  %v2158_v43 = vsel %vm319_vm1, %v2111_v37, %v2154_v4 }
0x1c6a   :  { %2849 = vmatmul.msk.f32.vlgmr.msra.gmra.mxu0 %vm170_vm0, %v2158_v43  ;;  %2850 = vmatmul.msk.f32.vlgmr.msra.gmra.mxu1 %vm170_vm0, %v2158_v43 }
0x1ce7   :  { %v2179_v9 = vpop.f32.mrf.mxu0  ;;  %v2199_v15 = vpop.f32.mrf.mxu1 }
0x1ce8   :  { %v2203_v31 = vadd.f32 %v2179_v9, %v1518_v5  ;;  %v2205_v51 = vadd.f32 %v2199_v15, %v4080_v24 }
0x1cea   :  { %3075 = vtanh.f32 %v2203_v31  ;;  %v2851_v52 = vmul.f32 -1.442695, %v2203_v31  ;;  %v2852_v55 = vmul.f32 -1.442695, %v2205_v51 }
0x1ceb   :  { %3077 = vtanh.f32 %v2205_v51 }
0x1cec   :  { %3079 = vpow2.f32 %v2851_v52 }
0x1ced   :  { %3081 = vpow2.f32 %v2852_v55 }
0x1cf0   :  { %v3076_v44 = vpop.eup %3075 }
0x1cf1   :  { %v3078_v41 = vpop.eup %3077  ;;  %2228 = vrot.lane.b32.xlu0 %v3076_v44, %s3404_s6 }
0x1cf2   :  { %2270 = vrot.lane.b32.xlu1 %v3078_v41, %s3404_s6  ;;  %v3080_v57 = vpop.eup %3079 }
0x1cf3   :  { %v3082_v10 = vpop.eup %3081  ;;  %v2209_v33 = vadd.f32 1.0, %v3080_v57 }
0x1cf4   :  { %v2251_v11 = vadd.f32 1.0, %v3082_v10 }
0x1cf5   :  { %3083 = vrcp.f32 %v2209_v33  ;;  %v2221_v1 = vand.u32 2147483648, %v2209_v33  ;;  %vm2215_vm9 = vweird.f32 %v2209_v33  ;;  %v2219_v38 = vand.u32 2147483647, %v2209_v33 }
0x1cf6   :  { %3085 = vrcp.f32 %v2251_v11  ;;  %v2263_v35 = vand.u32 2147483648, %v2251_v11  ;;  %vm2257_vm11 = vweird.f32 %v2251_v11  ;;  %v2261_v45 = vand.u32 2147483647, %v2251_v11 }
0x1cf7   :  { %v2222_v54 = vor.u32 1.1754944e-38, %v2221_v1  ;;  %vm2220_vm14 = vcmp.eq.f32.partialorder %v2219_v38, 8.507059e+37 }
0x1cf8   :  { %v2264_v26 = vor.u32 1.1754944e-38, %v2263_v35  ;;  %vm2262_vm15 = vcmp.eq.f32.partialorder %v2261_v45, 8.507059e+37 }
0x1cfb   :  { %v3084_v12 = vpop.eup %3083 }
0x1cfc   :  { %v3086_v24 = vpop.eup %3085  ;;  %v2211_v13 = vmul.f32 %v3084_v12, %v2209_v33  ;;  %vm2216_vm7 = vweird.f32 %v3084_v12 }
0x1cfd   :  { %v2253_v17 = vmul.f32 %v3086_v24, %v2251_v11  ;;  %vm2258_vm8 = vweird.f32 %v3086_v24  ;;  %vm2217_vm12 = vmor %vm2215_vm9, %vm2216_vm7 }
0x1cfe   :  { %v2212_v19 = vsub.f32 1.0, %v2211_v13  ;;  %vm2259_vm13 = vmor %vm2257_vm11, %vm2258_vm8 }
0x1cff   :  { %v2254_v18 = vsub.f32 1.0, %v2253_v17 }
0x1d00   :  { %v2213_v34 = vmul.f32 %v3084_v12, %v2212_v19 }
0x1d01   :  { %v2255_v14 = vmul.f32 %v3086_v24, %v2254_v18 }
0x1d02   :  { %v2214_v21 = vadd.f32 %v3084_v12, %v2213_v34 }
0x1d03   :  { %v2256_v61 = vadd.f32 %v3086_v24, %v2255_v14 }
0x1d04   :  { %v2218_v63 = vsel %vm2217_vm12, %v3084_v12, %v2214_v21 }
0x1d05   :  { %v2260_v53 = vsel %vm2259_vm13, %v3086_v24, %v2256_v61  ;;  %v2223_v28 = vsel %vm2220_vm14, %v2222_v54, %v2218_v63 }
0x1d06   :  { %v2265_v59 = vsel %vm2262_vm15, %v2264_v26, %v2260_v53  ;;  %v2226_v20 = vmul.f32 %v2223_v28, %v4224_v6 }
0x1d07   :  { %v2268_v48 = vmul.f32 %v2265_v59, %v4219_v25 }
0x1d63   :  { %v2229_v60 = vpop.permute.xlu0 %2228 }
0x1d64   :  { %v2271_v58 = vpop.permute.xlu1 %2270  ;;  %v2231_v46 = vmul.f32 %v2229_v60, %v2223_v28 }
0x1d65   :  { %v2273_v16 = vmul.f32 %v2271_v58, %v2265_v59 }
0x1d66   :  { %2233 = vrot.lane.b32.xlu2 %v2231_v46, %s3401_s19 }
0x1d67   :  { %2275 = vrot.lane.b32.xlu0 %v2273_v16, %s3401_s19 }
0x1dc0   :  { %v2234_v47 = vpop.permute.xlu2 %2233 }
0x1dc1   :  { %v4245_v22 = vadd.f32 %v2234_v47, %v2226_v20 }
0x1dc3   :  { %3087 = vtanh.f32 %v4245_v22 }
0x1dc9   :  { %v3088_v23 = vpop.eup %3087 }
0x1dca   :  { %2239 = vrot.lane.b32.xlu1 %v3088_v23, %s3404_s6 }
0x1dd9   :  { %v2276_v27 = vpop.permute.xlu0 %2275 }
0x1dda   :  { %v4250_v50 = vadd.f32 %v2276_v27, %v2268_v48 }
0x1ddc   :  { %3089 = vtanh.f32 %v4250_v50 }
0x1de2   :  { %v3090_v2 = vpop.eup %3089 }
0x1de3   :  { %2281 = vrot.lane.b32.xlu2 %v3090_v2, %s3404_s6 }
0x1e3c   :  { %v2240_v39 = vpop.permute.xlu1 %2239 }
0x1e3d   :  { %v2282_v6 = vpop.permute.xlu2 %2281  ;;  %v2242_v62 = vmul.f32 %v2240_v39, %v2223_v28 }
0x1e3e   :  { %v2284_v29 = vmul.f32 %v2282_v6, %v2265_v59 }
0x1e3f   :  { %2244 = vrot.lane.b32.xlu0 %v2242_v62, %s3401_s19 }
0x1e40   :  { %2286 = vrot.lane.b32.xlu1 %v2284_v29, %s3404_s6 }
0x1eb1   :  { %v2245_v56 = vpop.permute.xlu0 %2244 }
0x1eb2   :  { %2247 = vst.msk [vmem:[#allocation16 + $0x20] sm:$0xff] %vm319_vm1, %v2245_v56  ;;  %v2287_v25 = vpop.permute.xlu1 %2286 }
0x1eb3   :  { %2289 = vst.msk [vmem:[#allocation16 + $0x18] sm:$0xff] %vm466_vm10, %v2287_v25  ;;  %v2290_v4 = vsel %vm319_vm1, %v2245_v56, %v2287_v25 }
0x1eb4   :  { %2853 = vmatmul.msk.f32.vlgmr.msra.gmra.mxu2 %vm170_vm0, %v2290_v4  ;;  %2854 = vmatmul.msk.f32.vlgmr.msra.gmra.mxu3 %vm170_vm0, %v2290_v4 }
0x1f37   :  { %v2311_v37 = vpop.f32.mrf.mxu2  ;;  %v2331_v43 = vpop.f32.mrf.mxu3 }
0x1f38   :  { %v2335_v5 = vadd.f32 %v2311_v37, %v4088_v40  ;;  %v2337_v9 = vadd.f32 %v2331_v43, %v4075_v8 }
0x1f3a   :  { %3091 = vtanh.f32 %v2335_v5  ;;  %v2855_v51 = vmul.f32 -1.442695, %v2335_v5  ;;  %v2856_v55 = vmul.f32 -1.442695, %v2337_v9 }
0x1f3b   :  { %3093 = vtanh.f32 %v2337_v9 }
0x1f3c   :  { %3095 = vpow2.f32 %v2855_v51 }
0x1f40   :  { %v3092_v15 = vpop.eup %3091 }
0x1f41   :  { %v3094_v31 = vpop.eup %3093  ;;  %2360 = vrot.lane.b32.xlu2 %v3092_v15, %s3404_s6 }
0x1f42   :  { %2402 = vrot.lane.b32.xlu0 %v3094_v31, %s3404_s6  ;;  %v3096_v44 = vpop.eup %3095 }
0x1f43   :  { %v2341_v41 = vadd.f32 1.0, %v3096_v44 }
0x1f45   :  { %3097 = vrcp.f32 %v2341_v41  ;;  %v2353_v12 = vand.u32 2147483648, %v2341_v41  ;;  %vm2347_vm3 = vweird.f32 %v2341_v41  ;;  %v2351_v24 = vand.u32 2147483647, %v2341_v41 }
0x1f46   :  { %3099 = vpow2.f32 %v2856_v55 }
0x1f47   :  { %v2354_v17 = vor.u32 1.1754944e-38, %v2353_v12  ;;  %vm2352_vm5 = vcmp.eq.f32.partialorder %v2351_v24, 8.507059e+37 }
0x1f4b   :  { %v3098_v52 = vpop.eup %3097 }
0x1f4c   :  { %v2343_v57 = vmul.f32 %v3098_v52, %v2341_v41  ;;  %v3100_v8 = vpop.eup %3099  ;;  %vm2348_vm2 = vweird.f32 %v3098_v52 }
0x1f4d   :  { %v2383_v33 = vadd.f32 1.0, %v3100_v8  ;;  %vm2349_vm4 = vmor %vm2347_vm3, %vm2348_vm2 }
0x1f4e   :  { %v2344_v40 = vsub.f32 1.0, %v2343_v57 }
0x1f4f   :  { %3101 = vrcp.f32 %v2383_v33  ;;  %v2395_v38 = vand.u32 2147483648, %v2383_v33  ;;  %vm2389_vm7 = vweird.f32 %v2383_v33  ;;  %v2393_v45 = vand.u32 2147483647, %v2383_v33 }
0x1f50   :  { %v2345_v10 = vmul.f32 %v3098_v52, %v2344_v40 }
0x1f51   :  { %v2396_v53 = vor.u32 1.1754944e-38, %v2395_v38  ;;  %vm2394_vm9 = vcmp.eq.f32.partialorder %v2393_v45, 8.507059e+37 }
0x1f52   :  { %v2346_v11 = vadd.f32 %v3098_v52, %v2345_v10 }
0x1f54   :  { %v2350_v13 = vsel %vm2349_vm4, %v3098_v52, %v2346_v11 }
0x1f55   :  { %v2355_v18 = vsel %vm2352_vm5, %v2354_v17, %v2350_v13  ;;  %v3102_v14 = vpop.eup %3101 }
0x1f56   :  { %v2385_v21 = vmul.f32 %v3102_v14, %v2383_v33  ;;  %vm2390_vm6 = vweird.f32 %v3102_v14  ;;  %v2358_v28 = vmul.f32 %v2355_v18, %v4245_v22 }
0x1f57   :  { %vm2391_vm8 = vmor %vm2389_vm7, %vm2390_vm6 }
0x1f58   :  { %v2386_v61 = vsub.f32 1.0, %v2385_v21 }
0x1f5a   :  { %v2387_v1 = vmul.f32 %v3102_v14, %v2386_v61 }
0x1f5c   :  { %v2388_v35 = vadd.f32 %v3102_v14, %v2387_v1 }
0x1f5e   :  { %v2392_v63 = vsel %vm2391_vm8, %v3102_v14, %v2388_v35 }
0x1f5f   :  { %v2397_v26 = vsel %vm2394_vm9, %v2396_v53, %v2392_v63 }
0x1f60   :  { %v2400_v58 = vmul.f32 %v2397_v26, %v4250_v50 }
0x1f9b   :  { %v2361_v19 = vpop.permute.xlu2 %2360 }
0x1f9c   :  { %v2363_v34 = vmul.f32 %v2361_v19, %v2355_v18 }
0x1f9e   :  { %2365 = vrot.lane.b32.xlu1 %v2363_v34, %s3401_s19 }
0x1fb4   :  { %v2403_v54 = vpop.permute.xlu0 %2402 }
0x1fb5   :  { %v2405_v60 = vmul.f32 %v2403_v54, %v2397_v26 }
0x1fb7   :  { %2407 = vrot.lane.b32.xlu2 %v2405_v60, %s3401_s19 }
0x2010   :  { %v2366_v59 = vpop.permute.xlu1 %2365 }
0x2011   :  { %v2408_v46 = vpop.permute.xlu2 %2407  ;;  %v4269_v16 = vadd.f32 %v2366_v59, %v2358_v28 }
0x2012   :  { %v4271_v20 = vadd.f32 %v2408_v46, %v2400_v58 }
0x2013   :  { %3103 = vtanh.f32 %v4269_v16 }
0x2014   :  { %3105 = vtanh.f32 %v4271_v20 }
0x2019   :  { %v3104_v47 = vpop.eup %3103 }
0x201a   :  { %v3106_v23 = vpop.eup %3105  ;;  %2371 = vrot.lane.b32.xlu0 %v3104_v47, %s3404_s6 }
0x201b   :  { %2413 = vrot.lane.b32.xlu1 %v3106_v23, %s3404_s6 }
0x208c   :  { %v2372_v48 = vpop.permute.xlu0 %2371 }
0x208d   :  { %v2414_v22 = vpop.permute.xlu1 %2413  ;;  %v2374_v27 = vmul.f32 %v2372_v48, %v2355_v18  ;;  %v1527_v48 = vadd.f32 %v4235_v7, %v4066_v36 }
0x208e   :  { %v2416_v50 = vmul.f32 %v2414_v22, %v2397_v26 }
0x208f   :  { %2376 = vrot.lane.b32.xlu2 %v2374_v27, %s3401_s19 }
0x2090   :  { %2418 = vrot.lane.b32.xlu0 %v2416_v50, %s3404_s6 }
0x20e9   :  { %v2377_v2 = vpop.permute.xlu2 %2376 }
0x20ea   :  { %2379 = vst.msk [vmem:[#allocation16 + $0x28] sm:$0xff] %vm319_vm1, %v2377_v2 }
0x2102   :  { %v2419_v39 = vpop.permute.xlu0 %2418 }
0x2103   :  { %2421 = vst.msk [vmem:[#allocation16 + $0x10] sm:$0xff] %vm466_vm10, %v2419_v39  ;;  %v2422_v6 = vsel %vm319_vm1, %v2377_v2, %v2419_v39 }
0x2104   :  { %2857 = vmatmul.msk.f32.vlgmr.msrb.gmra.mxu0 %vm170_vm0, %v2422_v6  ;;  %2858 = vmatmul.msk.f32.vlgmr.msrb.gmra.mxu1 %vm170_vm0, %v2422_v6 }
0x2181   :  { %v2443_v62 = vpop.f32.mrf.mxu0  ;;  %v2463_v29 = vpop.f32.mrf.mxu1 }
0x2182   :  { %v2467_v56 = vadd.f32 %v2443_v62, %v4093_v42  ;;  %v2469_v25 = vadd.f32 %v2463_v29, %v4071_v3 }
0x2184   :  { %3107 = vtanh.f32 %v2467_v56  ;;  %v2860_v43 = vmul.f32 -1.442695, %v2469_v25  ;;  %v2859_v31 = vmul.f32 -1.442695, %v2467_v56 }
0x2185   :  { %3109 = vtanh.f32 %v2469_v25 }
0x2186   :  { %3111 = vpow2.f32 %v2860_v43 }
0x218a   :  { %v3108_v4 = vpop.eup %3107 }
0x218b   :  { %v3110_v37 = vpop.eup %3109  ;;  %2492 = vrot.lane.b32.xlu1 %v3108_v4, %s3404_s6 }
0x218c   :  { %2534 = vrot.lane.b32.xlu2 %v3110_v37, %s3404_s6  ;;  %v3112_v5 = vpop.eup %3111 }
0x218d   :  { %v2515_v9 = vadd.f32 1.0, %v3112_v5 }
0x218f   :  { %3113 = vrcp.f32 %v2515_v9  ;;  %v2527_v55 = vand.u32 2147483648, %v2515_v9  ;;  %vm2521_vm12 = vweird.f32 %v2515_v9  ;;  %v2525_v57 = vand.u32 2147483647, %v2515_v9 }
0x2190   :  { %3115 = vpow2.f32 %v2859_v31 }
0x2191   :  { %v2528_v10 = vor.u32 1.1754944e-38, %v2527_v55  ;;  %vm2526_vm14 = vcmp.eq.f32.partialorder %v2525_v57, 8.507059e+37 }
0x2195   :  { %v3114_v15 = vpop.eup %3113 }
0x2196   :  { %v2517_v51 = vmul.f32 %v3114_v15, %v2515_v9  ;;  %v3116_v44 = vpop.eup %3115  ;;  %vm2522_vm11 = vweird.f32 %v3114_v15 }
0x2197   :  { %v2473_v41 = vadd.f32 1.0, %v3116_v44  ;;  %vm2523_vm13 = vmor %vm2521_vm12, %vm2522_vm11 }
0x2198   :  { %v2518_v42 = vsub.f32 1.0, %v2517_v51 }
0x2199   :  { %3117 = vrcp.f32 %v2473_v41  ;;  %v2485_v18 = vand.u32 2147483648, %v2473_v41  ;;  %vm2479_vm2 = vweird.f32 %v2473_v41  ;;  %v2483_v34 = vand.u32 2147483647, %v2473_v41 }
0x219a   :  { %v2519_v3 = vmul.f32 %v3114_v15, %v2518_v42 }
0x219b   :  { %v2486_v21 = vor.u32 1.1754944e-38, %v2485_v18  ;;  %vm2484_vm4 = vcmp.eq.f32.partialorder %v2483_v34, 8.507059e+37 }
0x219c   :  { %v2520_v52 = vadd.f32 %v3114_v15, %v2519_v3 }
0x219e   :  { %v2524_v40 = vsel %vm2523_vm13, %v3114_v15, %v2520_v52 }
0x219f   :  { %v2529_v33 = vsel %vm2526_vm14, %v2528_v10, %v2524_v40  ;;  %v3118_v11 = vpop.eup %3117 }
0x21a0   :  { %v2475_v24 = vmul.f32 %v3118_v11, %v2473_v41  ;;  %vm2480_vm15 = vweird.f32 %v3118_v11  ;;  %v2532_v38 = vmul.f32 %v2529_v33, %v4271_v20 }
0x21a1   :  { %vm2481_vm3 = vmor %vm2479_vm2, %vm2480_vm15 }
0x21a2   :  { %v2476_v13 = vsub.f32 1.0, %v2475_v24 }
0x21a4   :  { %v2477_v17 = vmul.f32 %v3118_v11, %v2476_v13 }
0x21a6   :  { %v2478_v19 = vadd.f32 %v3118_v11, %v2477_v17 }
0x21a8   :  { %v2482_v14 = vsel %vm2481_vm3, %v3118_v11, %v2478_v19 }
0x21a9   :  { %v2487_v1 = vsel %vm2484_vm4, %v2486_v21, %v2482_v14 }
0x21aa   :  { %v2490_v54 = vmul.f32 %v2487_v1, %v4269_v16 }
0x21e6   :  { %v2535_v8 = vpop.permute.xlu2 %2534 }
0x21e7   :  { %v2537_v12 = vmul.f32 %v2535_v8, %v2529_v33 }
0x21e9   :  { %2539 = vrot.lane.b32.xlu1 %v2537_v12, %s3401_s19 }
0x21fd   :  { %v2493_v61 = vpop.permute.xlu1 %2492 }
0x21fe   :  { %v2495_v35 = vmul.f32 %v2493_v61, %v2487_v1 }
0x2200   :  { %2497 = vrot.lane.b32.xlu0 %v2495_v35, %s3401_s19 }
0x225b   :  { %v2540_v45 = vpop.permute.xlu1 %2539 }
0x225c   :  { %v4291_v63 = vadd.f32 %v2540_v45, %v2532_v38 }
0x225e   :  { %3119 = vtanh.f32 %v4291_v63 }
0x2264   :  { %v3120_v53 = vpop.eup %3119 }
0x2265   :  { %2545 = vrot.lane.b32.xlu0 %v3120_v53, %s3404_s6 }
0x2272   :  { %v2498_v26 = vpop.permute.xlu0 %2497 }
0x2273   :  { %v4296_v60 = vadd.f32 %v2498_v26, %v2490_v54 }
0x2275   :  { %3121 = vtanh.f32 %v4296_v60 }
0x227b   :  { %v3122_v28 = vpop.eup %3121 }
0x227c   :  { %2503 = vrot.lane.b32.xlu2 %v3122_v28, %s3404_s6 }
0x22d6   :  { %v2504_v58 = vpop.permute.xlu2 %2503 }
0x22d7   :  { %v2546_v59 = vpop.permute.xlu0 %2545  ;;  %v2506_v46 = vmul.f32 %v2504_v58, %v2487_v1 }
0x22d8   :  { %v2548_v20 = vmul.f32 %v2546_v59, %v2529_v33 }
0x22d9   :  { %2508 = vrot.lane.b32.xlu1 %v2506_v46, %s3401_s19 }
0x22da   :  { %2550 = vrot.lane.b32.xlu2 %v2548_v20, %s3404_s6 }
0x2334   :  { %v2551_v47 = vpop.permute.xlu2 %2550 }
0x2335   :  { %2553 = vst.msk [vmem:[#allocation16 + $0x8] sm:$0xff] %vm466_vm10, %v2551_v47 }
0x234b   :  { %v2509_v16 = vpop.permute.xlu1 %2508 }
0x234c   :  { %2511 = vst.msk [vmem:[#allocation16 + $0x30] sm:$0xff] %vm319_vm1, %v2509_v16  ;;  %v2554_v23 = vsel %vm319_vm1, %v2509_v16, %v2551_v47 }
0x234d   :  { %2861 = vmatmul.msk.f32.vlgmr.msrb.gmra.mxu2 %vm170_vm0, %v2554_v23  ;;  %2862 = vmatmul.msk.f32.vlgmr.msrb.gmra.mxu3 %vm170_vm0, %v2554_v23 }
0x23d0   :  { %v2575_v22 = vpop.f32.mrf.mxu2  ;;  %v2595_v27 = vpop.f32.mrf.mxu3 }
0x23d1   :  { %v2599_v50 = vadd.f32 %v2575_v22, %v1527_v48  ;;  %v2601_v2 = vadd.f32 %v2595_v27, %v4064_v30 }
0x23d3   :  { %3123 = vtanh.f32 %v2599_v50  ;;  %v2863_v62 = vmul.f32 -1.442695, %v2599_v50  ;;  %v2864_v29 = vmul.f32 -1.442695, %v2601_v2 }
0x23d4   :  { %3125 = vtanh.f32 %v2601_v2 }
0x23d5   :  { %3127 = vpow2.f32 %v2863_v62 }
0x23d6   :  { %3129 = vpow2.f32 %v2864_v29 }
0x23d9   :  { %v3124_v39 = vpop.eup %3123 }
0x23da   :  { %v3126_v6 = vpop.eup %3125  ;;  %2624 = vrot.lane.b32.xlu0 %v3124_v39, %s3404_s6 }
0x23db   :  { %2666 = vrot.lane.b32.xlu1 %v3126_v6, %s3404_s6  ;;  %v3128_v56 = vpop.eup %3127 }
0x23dc   :  { %v3130_v25 = vpop.eup %3129  ;;  %v2605_v36 = vadd.f32 1.0, %v3128_v56 }
0x23dd   :  { %v2647_v7 = vadd.f32 1.0, %v3130_v25 }
0x23de   :  { %3131 = vrcp.f32 %v2605_v36  ;;  %v2617_v44 = vand.u32 2147483648, %v2605_v36  ;;  %vm2611_vm6 = vweird.f32 %v2605_v36  ;;  %v2615_v41 = vand.u32 2147483647, %v2605_v36 }
0x23df   :  { %3133 = vrcp.f32 %v2647_v7  ;;  %v2659_v3 = vand.u32 2147483648, %v2647_v7  ;;  %vm2653_vm7 = vweird.f32 %v2647_v7  ;;  %v2657_v52 = vand.u32 2147483647, %v2647_v7 }
0x23e0   :  { %v2618_v40 = vor.u32 1.1754944e-38, %v2617_v44  ;;  %vm2616_vm11 = vcmp.eq.f32.partialorder %v2615_v41, 8.507059e+37 }
0x23e1   :  { %v2660_v10 = vor.u32 1.1754944e-38, %v2659_v3  ;;  %vm2658_vm12 = vcmp.eq.f32.partialorder %v2657_v52, 8.507059e+37 }
0x23e4   :  { %v3132_v4 = vpop.eup %3131 }
0x23e5   :  { %v3134_v30 = vpop.eup %3133  ;;  %v2607_v37 = vmul.f32 %v3132_v4, %v2605_v36  ;;  %vm2612_vm0 = vweird.f32 %v3132_v4 }
0x23e6   :  { %v2649_v43 = vmul.f32 %v3134_v30, %v2647_v7  ;;  %vm2654_vm5 = vweird.f32 %v3134_v30  ;;  %vm2613_vm8 = vmor %vm2611_vm6, %vm2612_vm0 }
0x23e7   :  { %v2608_v5 = vsub.f32 1.0, %v2607_v37  ;;  %vm2655_vm9 = vmor %vm2653_vm7, %vm2654_vm5 }
0x23e8   :  { %v2650_v9 = vsub.f32 1.0, %v2649_v43 }
0x23e9   :  { %v2609_v15 = vmul.f32 %v3132_v4, %v2608_v5 }
0x23ea   :  { %v2651_v31 = vmul.f32 %v3134_v30, %v2650_v9 }
0x23eb   :  { %v2610_v51 = vadd.f32 %v3132_v4, %v2609_v15 }
0x23ec   :  { %v2652_v42 = vadd.f32 %v3134_v30, %v2651_v31 }
0x23ed   :  { %v2614_v55 = vsel %vm2613_vm8, %v3132_v4, %v2610_v51 }
0x23ee   :  { %v2656_v57 = vsel %vm2655_vm9, %v3134_v30, %v2652_v42  ;;  %v2619_v33 = vsel %vm2616_vm11, %v2618_v40, %v2614_v55 }
0x23ef   :  { %v2661_v12 = vsel %vm2658_vm12, %v2660_v10, %v2656_v57  ;;  %v2622_v17 = vmul.f32 %v2619_v33, %v4296_v60 }
0x23f0   :  { %v2664_v14 = vmul.f32 %v2661_v12, %v4291_v63 }
0x244c   :  { %v2625_v8 = vpop.permute.xlu0 %2624 }
0x244d   :  { %v2667_v11 = vpop.permute.xlu1 %2666  ;;  %v2627_v24 = vmul.f32 %v2625_v8, %v2619_v33 }
0x244e   :  { %v2669_v13 = vmul.f32 %v2667_v11, %v2661_v12 }
0x244f   :  { %2629 = vrot.lane.b32.xlu2 %v2627_v24, %s3401_s19 }
0x2450   :  { %2671 = vrot.lane.b32.xlu0 %v2669_v13, %s3401_s19 }
0x2458   :  { %1422 = vrot.lane.b32.xlu0 %v3932_v32, %s3401_s19 }
0x2460   :  { %1418 = vrot.lane.b32.xlu0 %v3919_v0, %s3405_s17 }
0x24a9   :  { %v2630_v19 = vpop.permute.xlu2 %2629 }
0x24aa   :  { %v2632_v18 = vadd.f32 %v2630_v19, %v2622_v17 }
0x24ac   :  { %3135 = vtanh.f32 %v2632_v18  ;;  %2689 = vrot.lane.b32.xlu0 %v2632_v18, %s3405_s17 }
0x24b2   :  { %v3136_v34 = vpop.eup %3135 }
0x24b3   :  { %2635 = vrot.lane.b32.xlu1 %v3136_v34, %s3404_s6 }
0x24bb   :  { %1428 = vrot.lane.b32.xlu1 %v3914_v49, %s3405_s17 }
0x24c2   :  { %v2672_v21 = vpop.permute.xlu0 %2671 }
0x24c3   :  { %v2674_v61 = vadd.f32 %v2672_v21, %v2664_v14 }
0x24c5   :  { %3137 = vtanh.f32 %v2674_v61 }
0x24ca   :  { %v1423_v32 = vpop.permute.xlu0 %1422 }
0x24cb   :  { %v3138_v1 = vpop.eup %3137  ;;  %1426 = vst.msk [vmem:[#allocation17 + $0x8] sm:$0xff] %vm319_vm1, %v1423_v32 }
0x24cc   :  { %2677 = vrot.lane.b32.xlu2 %v3138_v1, %s3404_s6 }
0x24d2   :  { %v1419_v0 = vpop.permute.xlu0 %1418 }
0x24d3   :  { %1421 = vst.msk [vmem:[#allocation19] sm:$0xff] %vm319_vm1, %v1419_v0 }
0x251e   :  { %v2690_v35 = vpop.permute.xlu0 %2689 }
0x251f   :  { %2693 = vst.msk [vmem:[#allocation19 + $0x10] sm:$0xff] %vm319_vm1, %v2690_v35 }
0x2525   :  { %v2636_v38 = vpop.permute.xlu1 %2635 }
0x2526   :  { %v2678_v45 = vpop.permute.xlu2 %2677  ;;  %v2638_v49 = vmul.f32 %v2636_v38, %v2619_v33 }
0x2527   :  { %v2680_v53 = vmul.f32 %v2678_v45, %v2661_v12 }
0x2528   :  { %2640 = vrot.lane.b32.xlu1 %v2638_v49, %s3401_s19 }
0x2529   :  { %2694 = vrot.lane.b32.xlu2 %v2680_v53, %s3401_s19 }
0x252d   :  { %v1429_v63 = vpop.permute.xlu1 %1428 }
0x252e   :  { %1432 = vst.msk [vmem:[#allocation19 + $0x8] sm:$0xff] %vm319_vm1, %v1429_v63 }
0x2530   :  { %2700 = vrot.lane.b32.xlu1 %v2674_v61, %s3405_s17 }
0x2531   :  { %2682 = vrot.lane.b32.xlu2 %v2680_v53, %s3404_s6 }
0x2583   :  { %v2695_v54 = vpop.permute.xlu2 %2694 }
0x2584   :  { %2698 = vst.msk [vmem:[#allocation17 + $0x18] sm:$0xff] %vm319_vm1, %v2695_v54 }
0x258b   :  { %v2683_v26 = vpop.permute.xlu2 %2682 }
0x258c   :  { %2685 = vst.msk [vmem:[#allocation16] sm:$0xff] %vm466_vm10, %v2683_v26 }
0x259a   :  { %v2641_v60 = vpop.permute.xlu1 %2640 }
0x259b   :  { %2643 = vst.msk [vmem:[#allocation16 + $0x38] sm:$0xff] %vm319_vm1, %v2641_v60 }
0x259c   :  { %2687 = vst.msk [vmem:[#allocation17 + $0x10] sm:$0xff] %vm319_vm1, %v2641_v60  ;;  %2717 = dma.vmem_to_hbm [thread:$0]  %s2710_s23, 1024, %s2712_s26, [#allocation6], %s3396_s27, %s3396_s27, %s3397_s28  }
0x259d   :  { %2730 = dma.vmem_to_hbm [thread:$0]  %s2723_s30, 512, %s2725_s5, [#allocation18], %s3396_s27, %s3396_s27, %s3397_s28  }
0x25a2   :  { %v2701_v28 = vpop.permute.xlu1 %2700 }
0x25a3   :  { %2704 = vst.msk [vmem:[#allocation19 + $0x18] sm:$0xff] %vm319_vm1, %v2701_v28 }
0x25a4   :  { %2743 = dma.vmem_to_hbm [thread:$0]  %s2736_s0, 512, %s2738_s13, [#allocation18], %s3396_s27, %s3396_s27, %s3397_s28  }
0x25a5   :  { %3387 = dma.done.wait [#allocation6], 1024  }
0x25a6   :  { %3388 = vsyncadd [#allocation6], 4294966272 }
0x25a7   :  { %3389 = dma.done.wait [#allocation18], 1024  }
0x25a8   :  { %3390 = vsyncadd [#allocation18], 4294966272 }
0x25a9   :  { %2756 = vsyncpa [#allocation5], 1 }
0x25aa   :  { %2757 = vsyncpa [#allocation8], 1 }
0x25ab   :  { %2758 = vsyncpa [#allocation11], 1 }
0x25ac   :  { %2759 = vsyncpa [#allocation14], 1 }
0x25ad   :  { %2760 = vsyncpa [#allocation6], 1 }
0x25ae   :  { %2761 = vsyncpa [#allocation18], 1 }

</bundles_post_ra>
